<compile_context>
chip_gen: v6e
topology: v6e:2x2x1
jax: 0.10.0
libtpu: 0.0.40
codegen_flags: <defaults>
</compile_context>

<pallas_src>
import functools
import math

import jax
import jax.numpy as jnp
from jax.experimental import pallas as pl
from jax.experimental.pallas import tpu as pltpu

_LN_EPS = 1e-6  # MAE uses norm_layer=partial(nn.LayerNorm, eps=1e-6)


# ----------------------------- small helpers ----------------------------------

def _layernorm(x, g, b, eps):
    mean = jnp.mean(x, axis=-1, keepdims=True)
    var = jnp.mean((x - mean) ** 2, axis=-1, keepdims=True)
    return (x - mean) * jax.lax.rsqrt(var + eps) * g + b


def _gelu_exact(x):
    # exact erf GELU matches torch.nn.GELU default used inside timm Blocks.
    # TODO(synk): on v5e consider tanh-approx GELU (EUP slot) if the fused MLP
    #             turns out VALU-bound; kept exact here to match torch numerics.
    return 0.5 * x * (1.0 + jax.lax.erf(x * (1.0 / math.sqrt(2.0))))


def _pick_tile(n, pref):
    """Largest multiple-of-8 divisor of n that is <= pref; falls back to n."""
    if n <= pref:
        return n
    t = (pref // 8) * 8
    while t >= 8:
        if n % t == 0:
            return t
        t -= 8
    return n


def _vmem_limit(resident_bytes):
    """Scoped-VMEM limit sized from the resident blocks (double-buffer + slop)."""
    need = int(2.5 * resident_bytes) + (4 << 20)
    return int(min(100 << 20, max(32 << 20, need)))


# ----------------------------- Pallas kernels ---------------------------------

def _patch_embed_kernel(p_ref, w_ref, b_ref, pos_ref, o_ref):
    """Row tile of one batch element: patches @ W + b + pos_embed."""
    x = p_ref[...].astype(jnp.bfloat16)                       # (tl, C*p*p)
    acc = jnp.dot(x, w_ref[...], preferred_element_type=jnp.float32)
    o_ref[...] = (acc + b_ref[...] + pos_ref[...]).astype(o_ref.dtype)


def patch_embed(patches, w, b, pos):
    """patches: (B, L, K), w: (K, D) bf16, b: (1, D), pos: (1, L, D) -> (B, L, D) bf16."""
    B, L, K = patches.shape
    D = w.shape[1]
    tl = _pick_tile(L, 256)
    est = 4 * (tl * K + 3 * tl * D) + 2 * K * D
    return pl.pallas_call(
        _patch_embed_kernel,
        out_shape=jax.ShapeDtypeStruct((B, L, D), jnp.bfloat16),
        grid=(B, L // tl),
        in_specs=[pl.BlockSpec((pl.Squeezed(), tl, K), lambda b_, l_: (b_, l_, 0)),
                  pl.BlockSpec((K, D), lambda b_, l_: (0, 0)),
                  pl.BlockSpec((1, D), lambda b_, l_: (0, 0)),
                  pl.BlockSpec((pl.Squeezed(), tl, D), lambda b_, l_: (0, l_, 0))],
        out_specs=pl.BlockSpec((pl.Squeezed(), tl, D), lambda b_, l_: (b_, l_, 0)),
        compiler_params=pltpu.CompilerParams(
            dimension_semantics=("parallel", "parallel"),
            vmem_limit_bytes=_vmem_limit(est)),
    )(patches, w, b, pos)


def _block_kernel(x_ref, ln1_g_ref, ln1_b_ref, qkv_w_ref, qkv_b_ref,
                  proj_w_ref, proj_b_ref, ln2_g_ref, ln2_b_ref,
                  fc1_w_ref, fc1_b_ref, fc2_w_ref, fc2_b_ref,
                  o_ref, attn_ref, *, num_heads, eps):
    """Fully fused timm ViT Block for one batch element (all intermediates in VMEM)."""
    x = x_ref[...].astype(jnp.float32)                        # (S, D)
    S, D = x.shape
    dh = D // num_heads
    scale = dh ** -0.5

    # ---- attention: ln1 -> qkv -> per-head softmax(QK^T)V -> proj -> residual
    h = _layernorm(x, ln1_g_ref[...], ln1_b_ref[...], eps)
    qkv = jnp.dot(h.astype(jnp.bfloat16), qkv_w_ref[...],
                  preferred_element_type=jnp.float32) + qkv_b_ref[...]     # (S, 3D) f32
    # Each head's output is stored straight into its lane slice of the VMEM
    # scratch: no python list of live heads, no lane concatenation.
    # TODO(synk): at ViT-L decoder sizes (S=1025) switch to KV-tiled online
    #             softmax (flash) + K-tiled fc1/fc2 so per-step VMEM fits the
    #             64 MiB v7x budget; not needed at these test shapes.
    for hh in range(num_heads):                                # static unroll over heads
        qh = qkv[:, hh * dh:(hh + 1) * dh].astype(jnp.bfloat16)
        kh = qkv[:, D + hh * dh:D + (hh + 1) * dh].astype(jnp.bfloat16)
        vh = qkv[:, 2 * D + hh * dh:2 * D + (hh + 1) * dh].astype(jnp.bfloat16)
        s = jax.lax.dot_general(qh, kh, (((1,), (1,)), ((), ())),
                                preferred_element_type=jnp.float32) * scale
        s = s - jnp.max(s, axis=-1, keepdims=True)
        p = jnp.exp(s)
        p = p * pl.reciprocal(jnp.sum(p, axis=-1, keepdims=True), approx=True)
        attn_ref[:, hh * dh:(hh + 1) * dh] = jnp.dot(
            p.astype(jnp.bfloat16), vh, preferred_element_type=jnp.float32)
    a = jnp.dot(attn_ref[...].astype(jnp.bfloat16), proj_w_ref[...],
                preferred_element_type=jnp.float32) + proj_b_ref[...]
    x = x + a

    # ---- MLP: ln2 -> fc1 + GELU -> fc2 -> residual
    h = _layernorm(x, ln2_g_ref[...], ln2_b_ref[...], eps)
    h = jnp.dot(h.astype(jnp.bfloat16), fc1_w_ref[...],
                preferred_element_type=jnp.float32) + fc1_b_ref[...]
    h = _gelu_exact(h)
    h = jnp.dot(h.astype(jnp.bfloat16), fc2_w_ref[...],
                preferred_element_type=jnp.float32) + fc2_b_ref[...]
    o_ref[...] = (x + h).astype(o_ref.dtype)


def transformer_block(x, bp, num_heads):
    """x: (B, S, D) -> (B, S, D) bf16.  One fused pallas_call per block, grid over B."""
    B, S, D = x.shape
    Hdim = bp['fc1_w'].shape[1]
    kern = functools.partial(_block_kernel, num_heads=num_heads, eps=_LN_EPS)
    const = lambda b_: (0, 0)
    est = (2 * (D * 3 * D + D * D + D * Hdim + Hdim * D)        # bf16 weights (resident)
           + 4 * (3 * D + 6 * D + Hdim)                          # biases + LN params (f32)
           + 6 * S * D                                           # x in (<=f32) + out (bf16)
           + 4 * (S * 3 * D + num_heads * S * S + S * Hdim + 2 * S * D))  # intermediates
    return pl.pallas_call(
        kern,
        out_shape=jax.ShapeDtypeStruct((B, S, D), jnp.bfloat16),
        grid=(B,),
        in_specs=[pl.BlockSpec((pl.Squeezed(), S, D), lambda b_: (b_, 0, 0)),
                  pl.BlockSpec((1, D), const), pl.BlockSpec((1, D), const),
                  pl.BlockSpec((D, 3 * D), const), pl.BlockSpec((1, 3 * D), const),
                  pl.BlockSpec((D, D), const), pl.BlockSpec((1, D), const),
                  pl.BlockSpec((1, D), const), pl.BlockSpec((1, D), const),
                  pl.BlockSpec((D, Hdim), const), pl.BlockSpec((1, Hdim), const),
                  pl.BlockSpec((Hdim, D), const), pl.BlockSpec((1, D), const)],
        out_specs=pl.BlockSpec((pl.Squeezed(), S, D), lambda b_: (b_, 0, 0)),
        scratch_shapes=[pltpu.VMEM((S, D), jnp.float32)],
        compiler_params=pltpu.CompilerParams(
            dimension_semantics=("parallel",),
            vmem_limit_bytes=_vmem_limit(est)),
    )(x, bp['ln1_g'], bp['ln1_b'], bp['qkv_w'], bp['qkv_b'],
      bp['proj_w'], bp['proj_b'], bp['ln2_g'], bp['ln2_b'],
      bp['fc1_w'], bp['fc1_b'], bp['fc2_w'], bp['fc2_b'])


def _norm_linear_kernel(x_ref, g_ref, bln_ref, w_ref, b_ref, o_ref, *, eps):
    """Fused LayerNorm + Linear on one row tile of one batch element."""
    x = x_ref[...].astype(jnp.float32)                         # (ts, D)
    h = _layernorm(x, g_ref[...], bln_ref[...], eps)
    o_ref[...] = (jnp.dot(h.astype(jnp.bfloat16), w_ref[...],
                          preferred_element_type=jnp.float32)
                  + b_ref[...]).astype(o_ref.dtype)


def norm_linear(x, g, bln, w, b, out_dtype=jnp.bfloat16):
    """x: (B, S, D), g/bln: (1, D), w: (D, N) bf16, b: (1, N) -> (B, S, N)."""
    B, S, D = x.shape
    N = w.shape[1]
    ts = _pick_tile(S, 256)
    kern = functools.partial(_norm_linear_kernel, eps=_LN_EPS)
    est = 4 * (ts * D + 2 * ts * N) + 2 * D * N
    return pl.pallas_call(
        kern,
        out_shape=jax.ShapeDtypeStruct((B, S, N), out_dtype),
        grid=(B, S // ts),
        in_specs=[pl.BlockSpec((pl.Squeezed(), ts, D), lambda b_, s_: (b_, s_, 0)),
                  pl.BlockSpec((1, D), lambda b_, s_: (0, 0)),
                  pl.BlockSpec((1, D), lambda b_, s_: (0, 0)),
                  pl.BlockSpec((D, N), lambda b_, s_: (0, 0)),
                  pl.BlockSpec((1, N), lambda b_, s_: (0, 0))],
        out_specs=pl.BlockSpec((pl.Squeezed(), ts, N), lambda b_, s_: (b_, s_, 0)),
        compiler_params=pltpu.CompilerParams(
            dimension_semantics=("parallel", "parallel"),
            vmem_limit_bytes=_vmem_limit(est)),
    )(x, g, bln, w, b)


def _mae_loss_kernel(pred_ref, tgt_ref, mask_ref, o_ref, num_sm, den_sm):
    """Tiled masked-MSE reduction; SMEM scalar accumulators, SMEM scalar output."""
    i = pl.program_id(0)

    @pl.when(i == 0)
    def _():
        num_sm[0] = 0.0
        den_sm[0] = 0.0

    diff = pred_ref[...].astype(jnp.float32) - tgt_ref[...].astype(jnp.float32)
    per_patch = jnp.mean(diff * diff, axis=-1, keepdims=True)   # (tm, 1)
    m = mask_ref[...]                                           # (tm, 1)
    num_sm[0] += jnp.sum(per_patch * m)
    den_sm[0] += jnp.sum(m)

    @pl.when(i == pl.num_programs(0) - 1)
    def _():
        o_ref[0] = num_sm[0] / jnp.maximum(den_sm[0], 1.0)      # guard sum(mask)==0


def mae_masked_loss(pred, target, mask):
    """pred/target: (B, L, P), mask: (B, L) -> scalar."""
    B, L, P = pred.shape
    M = B * L
    tm = _pick_tile(M, 512)
    est = 4 * tm * (2 * P + 1)
    out = pl.pallas_call(
        _mae_loss_kernel,
        out_shape=jax.ShapeDtypeStruct((1,), jnp.float32),
        grid=(M // tm,),
        in_specs=[pl.BlockSpec((tm, P), lambda i: (i, 0)),
                  pl.BlockSpec((tm, P), lambda i: (i, 0)),
                  pl.BlockSpec((tm, 1), lambda i: (i, 0))],
        out_specs=pl.BlockSpec(memory_space=pltpu.MemorySpace.SMEM),
        scratch_shapes=[pltpu.SMEM((1,), jnp.float32),
                        pltpu.SMEM((1,), jnp.float32)],
        compiler_params=pltpu.CompilerParams(
            dimension_semantics=("arbitrary",),
            vmem_limit_bytes=_vmem_limit(est)),
    )(pred.reshape(M, P), target.reshape(M, P), mask.reshape(M, 1))
    return out[0]


# -------------------------------- config --------------------------------------

class Cfg:
    # scaled-down stand-in for mae_vit_large_patch16 on img_size (256, 1024).
    # TODO(synk): at the real ViT-large sizes the fused block needs flash-style
    #             KV tiling + K-tiled fc1/fc2 for the 64 MiB v7x VMEM budget.
    img_size = (16, 32)
    patch = 8
    in_chans = 3
    enc_dim = 32
    enc_depth = 2
    enc_heads = 4
    dec_dim = 32
    dec_depth = 1
    dec_heads = 4
    mlp_ratio = 4
    img_mask_ratio = 0.75


# --------------------------- parameter init -----------------------------------

def _nrm(k, shape, dtype=jnp.float32):
    return (0.02 * jax.random.normal(k, shape, jnp.float32)).astype(dtype)


def init_block(key, dim, mlp_ratio):
    ks = jax.random.split(key, 4)
    hidden = dim * mlp_ratio
    bf = jnp.bfloat16
    return dict(
        ln1_g=jnp.ones((1, dim), jnp.float32), ln1_b=jnp.zeros((1, dim), jnp.float32),
        qkv_w=_nrm(ks[0], (dim, 3 * dim), bf), qkv_b=jnp.zeros((1, 3 * dim), jnp.float32),
        proj_w=_nrm(ks[1], (dim, dim), bf), proj_b=jnp.zeros((1, dim), jnp.float32),
        ln2_g=jnp.ones((1, dim), jnp.float32), ln2_b=jnp.zeros((1, dim), jnp.float32),
        fc1_w=_nrm(ks[2], (dim, hidden), bf), fc1_b=jnp.zeros((1, hidden), jnp.float32),
        fc2_w=_nrm(ks[3], (hidden, dim), bf), fc2_b=jnp.zeros((1, dim), jnp.float32),
    )


def init_params(key, cfg):
    p = cfg.patch
    L = (cfg.img_size[0] // p) * (cfg.img_size[1] // p)
    patch_dim = cfg.in_chans * p * p
    pred_dim = p * p * cfg.in_chans
    keys = jax.random.split(key, 10)
    bf = jnp.bfloat16
    params = {
        # PatchEmbed conv(in_chans, enc_dim, k=p, s=p) expressed as matmul weight (bf16)
        'patch_w': _nrm(keys[0], (patch_dim, cfg.enc_dim), bf),
        'patch_b': jnp.zeros((1, cfg.enc_dim), jnp.float32),
        'cls_token': _nrm(keys[1], (1, 1, cfg.enc_dim)),
        # TODO(synk): real MAE uses fixed 2D sin-cos pos embeds; deterministic random here
        'pos_embed': _nrm(keys[2], (1, L + 1, cfg.enc_dim)),
        'enc_norm_g': jnp.ones((1, cfg.enc_dim), jnp.float32),
        'enc_norm_b': jnp.zeros((1, cfg.enc_dim), jnp.float32),
        'dec_embed_w': _nrm(keys[3], (cfg.enc_dim, cfg.dec_dim), bf),
        'dec_embed_b': jnp.zeros((1, cfg.dec_dim), jnp.float32),
        'mask_token': _nrm(keys[4], (1, 1, cfg.dec_dim)),
        'dec_pos_embed': _nrm(keys[5], (1, L + 1, cfg.dec_dim)),
        'dec_norm_g': jnp.ones((1, cfg.dec_dim), jnp.float32),
        'dec_norm_b': jnp.zeros((1, cfg.dec_dim), jnp.float32),
        'dec_pred_w': _nrm(keys[6], (cfg.dec_dim, pred_dim), bf),
        'dec_pred_b': jnp.zeros((1, pred_dim), jnp.float32),
    }
    params['enc_blocks'] = [init_block(k, cfg.enc_dim, cfg.mlp_ratio)
                            for k in jax.random.split(keys[7], cfg.enc_depth)]
    params['dec_blocks'] = [init_block(k, cfg.dec_dim, cfg.mlp_ratio)
                            for k in jax.random.split(keys[8], cfg.dec_depth)]
    return params


# ------------------------------- model glue ------------------------------------

def im2patches_conv_order(imgs, p):
    """(B, C, H, W) -> (B, L, C*p*p)   (matches Conv2d(k=p, s=p) weight flatten)."""
    B, C, H, W = imgs.shape
    h, w = H // p, W // p
    x = imgs.reshape(B, C, h, p, w, p)
    x = jnp.transpose(x, (0, 2, 4, 1, 3, 5))   # B, h, w, C, p, p
    return x.reshape(B, h * w, C * p * p)


def patchify_mae(imgs, p):
    """(B, C, H, W) -> (B, L, p*p*C)   (MAE's patchify ordering for the loss)."""
    B, C, H, W = imgs.shape
    h, w = H // p, W // p
    x = imgs.reshape(B, C, h, p, w, p)
    x = jnp.einsum('nchpwq->nhwpqc', x)
    return x.reshape(B, h * w, p * p * C)


def random_masking(x, mask_ratio, key):
    B, L, D = x.shape
    len_keep = int(L * (1 - mask_ratio))
    noise = jax.random.uniform(key, (B, L))
    ids_shuffle = jnp.argsort(noise, axis=1)
    ids_restore = jnp.argsort(ids_shuffle, axis=1)
    ids_keep = ids_shuffle[:, :len_keep]
    x_masked = jnp.take_along_axis(
        x, jnp.broadcast_to(ids_keep[:, :, None], (B, len_keep, D)), axis=1)
    mask = jnp.ones((B, L), jnp.float32).at[:, :len_keep].set(0.0)
    mask = jnp.take_along_axis(mask, ids_restore, axis=1)
    return x_masked, mask, ids_restore


def forward_encoder(params, images, cfg, mask_key):
    B = images.shape[0]
    p = cfg.patch
    D = cfg.enc_dim
    patches = im2patches_conv_order(images, p)                 # (B, L, C*p*p)
    # patch-embed matmul + bias + pos-embed add fused in one Pallas kernel
    x = patch_embed(patches, params['patch_w'], params['patch_b'],
                    params['pos_embed'][:, 1:, :])             # (B, L, D) bf16
    x, mask, ids_restore = random_masking(x, cfg.img_mask_ratio, mask_key)
    cls = (params['cls_token'] + params['pos_embed'][:, :1, :]).astype(x.dtype)
    x = jnp.concatenate([jnp.broadcast_to(cls, (B, 1, D)), x], axis=1)
    for bp in params['enc_blocks']:
        x = transformer_block(x, bp, cfg.enc_heads)
    # NOTE: the encoder's final LayerNorm is fused with decoder_embed inside
    # forward_decoder (norm_linear) — semantically identical to norm-then-embed.
    return x, mask, ids_restore


def forward_decoder(params, x, ids_restore, cfg):
    B, S_in, _ = x.shape
    Dd = cfg.dec_dim
    L = ids_restore.shape[1]
    # fused: encoder-final LayerNorm + decoder_embed linear
    x = norm_linear(x, params['enc_norm_g'], params['enc_norm_b'],
                    params['dec_embed_w'], params['dec_embed_b'])   # (B, S_in, Dd) bf16
    n_mask = L + 1 - S_in
    mask_tokens = jnp.broadcast_to(params['mask_token'], (B, n_mask, Dd)).astype(x.dtype)
    x_ = jnp.concatenate([x[:, 1:, :], mask_tokens], axis=1)        # (B, L, Dd)
    # TODO(synk): fold this restore-gather into the first decoder block via
    #             PrefetchScalarGridSpec row-gather instead of HBM take_along_axis.
    x_ = jnp.take_along_axis(
        x_, jnp.broadcast_to(ids_restore[:, :, None], (B, L, Dd)), axis=1)
    x = jnp.concatenate([x[:, :1, :], x_], axis=1)                  # (B, L+1, Dd)
    x = (x + params['dec_pos_embed']).astype(jnp.bfloat16)
    for bp in params['dec_blocks']:
        x = transformer_block(x, bp, cfg.dec_heads)
    # fused: decoder-final LayerNorm + decoder_pred linear (f32 pred for the loss)
    x = norm_linear(x, params['dec_norm_g'], params['dec_norm_b'],
                    params['dec_pred_w'], params['dec_pred_b'],
                    out_dtype=jnp.float32)                          # (B, L+1, P)
    return x[:, 1:, :]                                              # drop cls


def forward_loss(images, pred, mask, cfg):
    target = patchify_mae(images, cfg.patch)     # norm_pix_loss=False
    return mae_masked_loss(pred, target, mask)


def mae_image_forward(params, batch_dict, mask_key, cfg, training=True):
    raw_images = batch_dict['images']
    B, C, _, _ = raw_images.shape
    # bilinear resize to self.img_size (glue; matches F.interpolate align_corners=False)
    images = jax.image.resize(raw_images, (B, C) + cfg.img_size, method='bilinear')
    latent, mask, ids_restore = forward_encoder(params, images, cfg, mask_key)
    pred = forward_decoder(params, latent, ids_restore, cfg)
    img_loss = forward_loss(images, pred, mask, cfg)
    range_loss = 0.0
    loss = range_loss + img_loss
    if training:
        tb_dict = {'range_loss': range_loss, 'img_loss': img_loss}
        ret_dict = {'loss': loss}
        return ret_dict, tb_dict, {}
    else:
        return {}, {}


# --------------------------------- main -----------------------------------------

if __name__ == "__main__":
    cfg = Cfg()
    root = jax.random.PRNGKey(0)
    k_param, k_img, k_mask = jax.random.split(root, 3)

    params = init_params(k_param, cfg)
    raw_images = jax.random.normal(k_img, (2, 3, 12, 24), jnp.float32)
    batch_dict = {'images': raw_images}

    fwd = jax.jit(functools.partial(mae_image_forward, cfg=cfg, training=True))
    ret_dict, tb_dict, _ = fwd(params, batch_dict, k_mask)
    loss = jax.block_until_ready(ret_dict['loss'])
    assert jnp.isfinite(loss), "loss is not finite"
    print("KERNEL_OK")
</pallas_src>

<mosaic_0001>
module attributes {stable_mosaic.version = 11 : i64} {
  func.func @_patch_embed_kernel(%arg0: i32, %arg1: i32, %arg2: memref<1x8x192xf32, #tpu.memory_space<vmem>>, %arg3: memref<192x32xbf16, #tpu.memory_space<vmem>>, %arg4: memref<1x32xf32, #tpu.memory_space<vmem>>, %arg5: memref<1x8x32xf32, #tpu.memory_space<vmem>>, %arg6: memref<1x8x32xbf16, #tpu.memory_space<vmem>>) attributes {dimension_semantics = [#tpu.dimension_semantics<parallel>, #tpu.dimension_semantics<parallel>], iteration_bounds = array<i64: 2, 1>, scalar_prefetch = 0 : i64, scratch_operands = 0 : i64, tpu.core_type = #tpu.core_type<tc>, window_params = [{transform_indices = @transform_0, window_bounds = array<i64: 1, 8, 192>}, {pipeline_mode = #tpu.pipeline_mode<synchronous>, transform_indices = @transform_1, window_bounds = array<i64: 192, 32>}, {pipeline_mode = #tpu.pipeline_mode<synchronous>, transform_indices = @transform_2, window_bounds = array<i64: 1, 32>}, {transform_indices = @transform_3, window_bounds = array<i64: 1, 8, 32>}, {transform_indices = @transform_4, window_bounds = array<i64: 1, 8, 32>}]} {
    %c0 = arith.constant 0 : index
    %c0_0 = arith.constant 0 : index
    %c0_1 = arith.constant 0 : index
    %0 = vector.load %arg2[%c0, %c0_0, %c0_1] : memref<1x8x192xf32, #tpu.memory_space<vmem>>, vector<1x8x192xf32>
    %1 = vector.shape_cast %0 : vector<1x8x192xf32> to vector<8x192xf32>
    %2 = arith.truncf %1 : vector<8x192xf32> to vector<8x192xbf16>
    %c0_2 = arith.constant 0 : index
    %c0_3 = arith.constant 0 : index
    %3 = vector.load %arg3[%c0_2, %c0_3] : memref<192x32xbf16, #tpu.memory_space<vmem>>, vector<192x32xbf16>
    %cst = arith.constant dense<0.000000e+00> : vector<8x32xf32>
    %4 = tpu.matmul %2, %3, %cst {dimension_numbers = #tpu.dot_dimension_numbers<[1], [0], [0], [1], [0, 0, 1, 1], [], []>} : vector<8x192xbf16>, vector<192x32xbf16>, vector<8x32xf32> -> vector<8x32xf32>
    %c0_4 = arith.constant 0 : index
    %c0_5 = arith.constant 0 : index
    %5 = vector.load %arg4[%c0_4, %c0_5] : memref<1x32xf32, #tpu.memory_space<vmem>>, vector<1x32xf32>
    %6 = vector.broadcast %5 : vector<1x32xf32> to vector<8x32xf32>
    %7 = arith.addf %4, %6 : vector<8x32xf32>
    %c0_6 = arith.constant 0 : index
    %c0_7 = arith.constant 0 : index
    %c0_8 = arith.constant 0 : index
    %8 = vector.load %arg5[%c0_6, %c0_7, %c0_8] : memref<1x8x32xf32, #tpu.memory_space<vmem>>, vector<1x8x32xf32>
    %9 = vector.shape_cast %8 : vector<1x8x32xf32> to vector<8x32xf32>
    %10 = arith.addf %7, %9 : vector<8x32xf32>
    %11 = arith.truncf %10 : vector<8x32xf32> to vector<8x32xbf16>
    %c0_9 = arith.constant 0 : index
    %c0_10 = arith.constant 0 : index
    %c0_11 = arith.constant 0 : index
    %12 = vector.load %arg6[%c0_9, %c0_10, %c0_11] : memref<1x8x32xbf16, #tpu.memory_space<vmem>>, vector<1x8x32xbf16>
    %13 = vector.shape_cast %12 : vector<1x8x32xbf16> to vector<8x32xbf16>
    %14 = vector.shape_cast %11 : vector<8x32xbf16> to vector<1x8x32xbf16>
    tpu.vector_store %arg6[%c0_9, %c0_10, %c0_11], %14 {strides = array<i32>} : memref<1x8x32xbf16, #tpu.memory_space<vmem>>, vector<1x8x32xbf16>,
    return
  }
  func.func @transform_0(%arg0: i32, %arg1: i32) -> (i32, i32, i32) {
    %c0_i32 = arith.constant 0 : i32
    %c0_i32_0 = arith.constant 0 : i32
    return %arg0, %arg1, %c0_i32 : i32, i32, i32
  }
  func.func @transform_1(%arg0: i32, %arg1: i32) -> (i32, i32) {
    %c0_i32 = arith.constant 0 : i32
    %c0_i32_0 = arith.constant 0 : i32
    %c0_i32_1 = arith.constant 0 : i32
    return %c0_i32, %c0_i32_0 : i32, i32
  }
  func.func @transform_2(%arg0: i32, %arg1: i32) -> (i32, i32) {
    %c0_i32 = arith.constant 0 : i32
    %c0_i32_0 = arith.constant 0 : i32
    %c0_i32_1 = arith.constant 0 : i32
    return %c0_i32, %c0_i32_0 : i32, i32
  }
  func.func @transform_3(%arg0: i32, %arg1: i32) -> (i32, i32, i32) {
    %c0_i32 = arith.constant 0 : i32
    %c0_i32_0 = arith.constant 0 : i32
    %c0_i32_1 = arith.constant 0 : i32
    return %c0_i32, %arg1, %c0_i32_0 : i32, i32, i32
  }
  func.func @transform_4(%arg0: i32, %arg1: i32) -> (i32, i32, i32) {
    %c0_i32 = arith.constant 0 : i32
    %c0_i32_0 = arith.constant 0 : i32
    return %arg0, %arg1, %c0_i32 : i32, i32, i32
  }
}

module attributes {stable_mosaic.version = 11 : i64} {
  func.func @_block_kernel(%arg0: i32, %arg1: memref<1x3x32xbf16, #tpu.memory_space<vmem>>, %arg2: memref<1x32xf32, #tpu.memory_space<vmem>>, %arg3: memref<1x32xf32, #tpu.memory_space<vmem>>, %arg4: memref<32x96xbf16, #tpu.memory_space<vmem>>, %arg5: memref<1x96xf32, #tpu.memory_space<vmem>>, %arg6: memref<32x32xbf16, #tpu.memory_space<vmem>>, %arg7: memref<1x32xf32, #tpu.memory_space<vmem>>, %arg8: memref<1x32xf32, #tpu.memory_space<vmem>>, %arg9: memref<1x32xf32, #tpu.memory_space<vmem>>, %arg10: memref<32x128xbf16, #tpu.memory_space<vmem>>, %arg11: memref<1x128xf32, #tpu.memory_space<vmem>>, %arg12: memref<128x32xbf16, #tpu.memory_space<vmem>>, %arg13: memref<1x32xf32, #tpu.memory_space<vmem>>, %arg14: memref<1x3x32xbf16, #tpu.memory_space<vmem>>, %arg15: memref<3x32xf32, #tpu.memory_space<vmem>>) attributes {dimension_semantics = [#tpu.dimension_semantics<parallel>], iteration_bounds = array<i64: 2>, scalar_prefetch = 0 : i64, scratch_operands = 1 : i64, tpu.core_type = #tpu.core_type<tc>, window_params = [{transform_indices = @transform_0, window_bounds = array<i64: 1, 3, 32>}, {pipeline_mode = #tpu.pipeline_mode<synchronous>, transform_indices = @transform_1, window_bounds = array<i64: 1, 32>}, {pipeline_mode = #tpu.pipeline_mode<synchronous>, transform_indices = @transform_2, window_bounds = array<i64: 1, 32>}, {pipeline_mode = #tpu.pipeline_mode<synchronous>, transform_indices = @transform_3, window_bounds = array<i64: 32, 96>}, {pipeline_mode = #tpu.pipeline_mode<synchronous>, transform_indices = @transform_4, window_bounds = array<i64: 1, 96>}, {pipeline_mode = #tpu.pipeline_mode<synchronous>, transform_indices = @transform_5, window_bounds = array<i64: 32, 32>}, {pipeline_mode = #tpu.pipeline_mode<synchronous>, transform_indices = @transform_6, window_bounds = array<i64: 1, 32>}, {pipeline_mode = #tpu.pipeline_mode<synchronous>, transform_indices = @transform_7, window_bounds = array<i64: 1, 32>}, {pipeline_mode = #tpu.pipeline_mode<synchronous>, transform_indices = @transform_8, window_bounds = array<i64: 1, 32>}, {pipeline_mode = #tpu.pipeline_mode<synchronous>, transform_indices = @transform_9, window_bounds = array<i64: 32, 128>}, {pipeline_mode = #tpu.pipeline_mode<synchronous>, transform_indices = @transform_10, window_bounds = array<i64: 1, 128>}, {pipeline_mode = #tpu.pipeline_mode<synchronous>, transform_indices = @transform_11, window_bounds = array<i64: 128, 32>}, {pipeline_mode = #tpu.pipeline_mode<synchronous>, transform_indices = @transform_12, window_bounds = array<i64: 1, 32>}, {transform_indices = @transform_13, window_bounds = array<i64: 1, 3, 32>}]} {
    %c0 = arith.constant 0 : index
    %c0_0 = arith.constant 0 : index
    %c0_1 = arith.constant 0 : index
    %0 = vector.load %arg1[%c0, %c0_0, %c0_1] : memref<1x3x32xbf16, #tpu.memory_space<vmem>>, vector<1x3x32xbf16>
    %1 = vector.shape_cast %0 : vector<1x3x32xbf16> to vector<3x32xbf16>
    %2 = arith.extf %1 : vector<3x32xbf16> to vector<3x32xf32>
    %c0_2 = arith.constant 0 : index
    %c0_3 = arith.constant 0 : index
    %3 = vector.load %arg2[%c0_2, %c0_3] : memref<1x32xf32, #tpu.memory_space<vmem>>, vector<1x32xf32>
    %c0_4 = arith.constant 0 : index
    %c0_5 = arith.constant 0 : index
    %4 = vector.load %arg3[%c0_4, %c0_5] : memref<1x32xf32, #tpu.memory_space<vmem>>, vector<1x32xf32>
    %cst = arith.constant dense<0.000000e+00> : vector<3xf32>
    %5 = vector.multi_reduction <add>, %2, %cst [1] : vector<3x32xf32> to vector<3xf32>
    %6 = vector.shape_cast %5 : vector<3xf32> to vector<3x1xf32>
    %cst_6 = arith.constant 3.200000e+01 : f32
    %7 = vector.broadcast %cst_6 : f32 to vector<3x1xf32>
    %8 = arith.divf %6, %7 : vector<3x1xf32>
    %9 = vector.broadcast %8 : vector<3x1xf32> to vector<3x32xf32>
    %10 = arith.subf %2, %9 : vector<3x32xf32>
    %11 = arith.mulf %10, %10 : vector<3x32xf32>
    %cst_7 = arith.constant dense<0.000000e+00> : vector<3xf32>
    %12 = vector.multi_reduction <add>, %11, %cst_7 [1] : vector<3x32xf32> to vector<3xf32>
    %13 = vector.shape_cast %12 : vector<3xf32> to vector<3x1xf32>
    %cst_8 = arith.constant 3.200000e+01 : f32
    %14 = vector.broadcast %cst_8 : f32 to vector<3x1xf32>
    %15 = arith.divf %13, %14 : vector<3x1xf32>
    %16 = vector.broadcast %8 : vector<3x1xf32> to vector<3x32xf32>
    %17 = arith.subf %2, %16 : vector<3x32xf32>
    %cst_9 = arith.constant 9.99999997E-7 : f32
    %18 = vector.broadcast %cst_9 : f32 to vector<3x1xf32>
    %19 = arith.addf %15, %18 : vector<3x1xf32>
    %20 = math.rsqrt %19 : vector<3x1xf32>
    %21 = vector.broadcast %20 : vector<3x1xf32> to vector<3x32xf32>
    %22 = arith.mulf %17, %21 : vector<3x32xf32>
    %23 = vector.broadcast %3 : vector<1x32xf32> to vector<3x32xf32>
    %24 = arith.mulf %22, %23 : vector<3x32xf32>
    %25 = vector.broadcast %4 : vector<1x32xf32> to vector<3x32xf32>
    %26 = arith.addf %24, %25 : vector<3x32xf32>
    %27 = arith.truncf %26 : vector<3x32xf32> to vector<3x32xbf16>
    %c0_10 = arith.constant 0 : index
    %c0_11 = arith.constant 0 : index
    %28 = vector.load %arg4[%c0_10, %c0_11] : memref<32x96xbf16, #tpu.memory_space<vmem>>, vector<32x96xbf16>
    %cst_12 = arith.constant dense<0.000000e+00> : vector<3x96xf32>
    %29 = tpu.matmul %27, %28, %cst_12 {dimension_numbers = #tpu.dot_dimension_numbers<[1], [0], [0], [1], [0, 0, 1, 1], [], []>} : vector<3x32xbf16>, vector<32x96xbf16>, vector<3x96xf32> -> vector<3x96xf32>
    %c0_13 = arith.constant 0 : index
    %c0_14 = arith.constant 0 : index
    %30 = vector.load %arg5[%c0_13, %c0_14] : memref<1x96xf32, #tpu.memory_space<vmem>>, vector<1x96xf32>
    %31 = vector.broadcast %30 : vector<1x96xf32> to vector<3x96xf32>
    %32 = arith.addf %29, %31 : vector<3x96xf32>
    %33 = vector.extract_strided_slice %32 {offsets = [0, 0], sizes = [3, 8], strides = [1, 1]} : vector<3x96xf32> to vector<3x8xf32>
    %34 = arith.truncf %33 : vector<3x8xf32> to vector<3x8xbf16>
    %35 = vector.extract_strided_slice %32 {offsets = [0, 32], sizes = [3, 8], strides = [1, 1]} : vector<3x96xf32> to vector<3x8xf32>
    %36 = arith.truncf %35 : vector<3x8xf32> to vector<3x8xbf16>
    %37 = vector.extract_strided_slice %32 {offsets = [0, 64], sizes = [3, 8], strides = [1, 1]} : vector<3x96xf32> to vector<3x8xf32>
    %38 = arith.truncf %37 : vector<3x8xf32> to vector<3x8xbf16>
    %cst_15 = arith.constant dense<0.000000e+00> : vector<3x3xf32>
    %39 = tpu.matmul %34, %36, %cst_15 {dimension_numbers = #tpu.dot_dimension_numbers<[1], [1], [0], [0], [0, 0, 1, 0], [], []>} : vector<3x8xbf16>, vector<3x8xbf16>, vector<3x3xf32> -> vector<3x3xf32>
    %cst_16 = arith.constant 0.353553385 : f32
    %40 = vector.broadcast %cst_16 : f32 to vector<3x3xf32>
    %41 = arith.mulf %39, %40 : vector<3x3xf32>
    %cst_17 = arith.constant dense<0xFF800000> : vector<3xf32>
    %42 = vector.multi_reduction <maximumf>, %41, %cst_17 [1] : vector<3x3xf32> to vector<3xf32>
    %43 = vector.shape_cast %42 : vector<3xf32> to vector<3x1xf32>
    %44 = vector.broadcast %43 : vector<3x1xf32> to vector<3x3xf32>
    %45 = arith.subf %41, %44 : vector<3x3xf32>
    %46 = math.exp %45 : vector<3x3xf32>
    %cst_18 = arith.constant dense<0.000000e+00> : vector<3xf32>
    %47 = vector.multi_reduction <add>, %46, %cst_18 [1] : vector<3x3xf32> to vector<3xf32>
    %48 = vector.shape_cast %47 : vector<3xf32> to vector<3x1xf32>
    %49 = tpu.reciprocal %48 {approx = true} : vector<3x1xf32> -> vector<3x1xf32>
    %50 = vector.broadcast %49 : vector<3x1xf32> to vector<3x3xf32>
    %51 = arith.mulf %46, %50 : vector<3x3xf32>
    %52 = arith.truncf %51 : vector<3x3xf32> to vector<3x3xbf16>
    %cst_19 = arith.constant dense<0.000000e+00> : vector<3x8xf32>
    %53 = tpu.matmul %52, %38, %cst_19 {dimension_numbers = #tpu.dot_dimension_numbers<[1], [0], [0], [1], [0, 0, 1, 1], [], []>} : vector<3x3xbf16>, vector<3x8xbf16>, vector<3x8xf32> -> vector<3x8xf32>
    %c0_20 = arith.constant 0 : index
    %c0_21 = arith.constant 0 : index
    %54 = vector.load %arg15[%c0_20, %c0_21] : memref<3x32xf32, #tpu.memory_space<vmem>>, vector<3x8xf32>
    tpu.vector_store %arg15[%c0_20, %c0_21], %53 {strides = array<i32>} : memref<3x32xf32, #tpu.memory_space<vmem>>, vector<3x8xf32>,
    %55 = vector.extract_strided_slice %32 {offsets = [0, 8], sizes = [3, 8], strides = [1, 1]} : vector<3x96xf32> to vector<3x8xf32>
    %56 = arith.truncf %55 : vector<3x8xf32> to vector<3x8xbf16>
    %57 = vector.extract_strided_slice %32 {offsets = [0, 40], sizes = [3, 8], strides = [1, 1]} : vector<3x96xf32> to vector<3x8xf32>
    %58 = arith.truncf %57 : vector<3x8xf32> to vector<3x8xbf16>
    %59 = vector.extract_strided_slice %32 {offsets = [0, 72], sizes = [3, 8], strides = [1, 1]} : vector<3x96xf32> to vector<3x8xf32>
    %60 = arith.truncf %59 : vector<3x8xf32> to vector<3x8xbf16>
    %cst_22 = arith.constant dense<0.000000e+00> : vector<3x3xf32>
    %61 = tpu.matmul %56, %58, %cst_22 {dimension_numbers = #tpu.dot_dimension_numbers<[1], [1], [0], [0], [0, 0, 1, 0], [], []>} : vector<3x8xbf16>, vector<3x8xbf16>, vector<3x3xf32> -> vector<3x3xf32>
    %cst_23 = arith.constant 0.353553385 : f32
    %62 = vector.broadcast %cst_23 : f32 to vector<3x3xf32>
    %63 = arith.mulf %61, %62 : vector<3x3xf32>
    %cst_24 = arith.constant dense<0xFF800000> : vector<3xf32>
    %64 = vector.multi_reduction <maximumf>, %63, %cst_24 [1] : vector<3x3xf32> to vector<3xf32>
    %65 = vector.shape_cast %64 : vector<3xf32> to vector<3x1xf32>
    %66 = vector.broadcast %65 : vector<3x1xf32> to vector<3x3xf32>
    %67 = arith.subf %63, %66 : vector<3x3xf32>
    %68 = math.exp %67 : vector<3x3xf32>
    %cst_25 = arith.constant dense<0.000000e+00> : vector<3xf32>
    %69 = vector.multi_reduction <add>, %68, %cst_25 [1] : vector<3x3xf32> to vector<3xf32>
    %70 = vector.shape_cast %69 : vector<3xf32> to vector<3x1xf32>
    %71 = tpu.reciprocal %70 {approx = true} : vector<3x1xf32> -> vector<3x1xf32>
    %72 = vector.broadcast %71 : vector<3x1xf32> to vector<3x3xf32>
    %73 = arith.mulf %68, %72 : vector<3x3xf32>
    %74 = arith.truncf %73 : vector<3x3xf32> to vector<3x3xbf16>
    %cst_26 = arith.constant dense<0.000000e+00> : vector<3x8xf32>
    %75 = tpu.matmul %74, %60, %cst_26 {dimension_numbers = #tpu.dot_dimension_numbers<[1], [0], [0], [1], [0, 0, 1, 1], [], []>} : vector<3x3xbf16>, vector<3x8xbf16>, vector<3x8xf32> -> vector<3x8xf32>
    %c0_27 = arith.constant 0 : index
    %c8 = arith.constant 8 : index
    %76 = vector.load %arg15[%c0_27, %c8] : memref<3x32xf32, #tpu.memory_space<vmem>>, vector<3x8xf32>
    tpu.vector_store %arg15[%c0_27, %c8], %75 {strides = array<i32>} : memref<3x32xf32, #tpu.memory_space<vmem>>, vector<3x8xf32>,
    %77 = vector.extract_strided_slice %32 {offsets = [0, 16], sizes = [3, 8], strides = [1, 1]} : vector<3x96xf32> to vector<3x8xf32>
    %78 = arith.truncf %77 : vector<3x8xf32> to vector<3x8xbf16>
    %79 = vector.extract_strided_slice %32 {offsets = [0, 48], sizes = [3, 8], strides = [1, 1]} : vector<3x96xf32> to vector<3x8xf32>
    %80 = arith.truncf %79 : vector<3x8xf32> to vector<3x8xbf16>
    %81 = vector.extract_strided_slice %32 {offsets = [0, 80], sizes = [3, 8], strides = [1, 1]} : vector<3x96xf32> to vector<3x8xf32>
    %82 = arith.truncf %81 : vector<3x8xf32> to vector<3x8xbf16>
    %cst_28 = arith.constant dense<0.000000e+00> : vector<3x3xf32>
    %83 = tpu.matmul %78, %80, %cst_28 {dimension_numbers = #tpu.dot_dimension_numbers<[1], [1], [0], [0], [0, 0, 1, 0], [], []>} : vector<3x8xbf16>, vector<3x8xbf16>, vector<3x3xf32> -> vector<3x3xf32>
    %cst_29 = arith.constant 0.353553385 : f32
    %84 = vector.broadcast %cst_29 : f32 to vector<3x3xf32>
    %85 = arith.mulf %83, %84 : vector<3x3xf32>
    %cst_30 = arith.constant dense<0xFF800000> : vector<3xf32>
    %86 = vector.multi_reduction <maximumf>, %85, %cst_30 [1] : vector<3x3xf32> to vector<3xf32>
    %87 = vector.shape_cast %86 : vector<3xf32> to vector<3x1xf32>
    %88 = vector.broadcast %87 : vector<3x1xf32> to vector<3x3xf32>
    %89 = arith.subf %85, %88 : vector<3x3xf32>
    %90 = math.exp %89 : vector<3x3xf32>
    %cst_31 = arith.constant dense<0.000000e+00> : vector<3xf32>
    %91 = vector.multi_reduction <add>, %90, %cst_31 [1] : vector<3x3xf32> to vector<3xf32>
    %92 = vector.shape_cast %91 : vector<3xf32> to vector<3x1xf32>
    %93 = tpu.reciprocal %92 {approx = true} : vector<3x1xf32> -> vector<3x1xf32>
    %94 = vector.broadcast %93 : vector<3x1xf32> to vector<3x3xf32>
    %95 = arith.mulf %90, %94 : vector<3x3xf32>
    %96 = arith.truncf %95 : vector<3x3xf32> to vector<3x3xbf16>
    %cst_32 = arith.constant dense<0.000000e+00> : vector<3x8xf32>
    %97 = tpu.matmul %96, %82, %cst_32 {dimension_numbers = #tpu.dot_dimension_numbers<[1], [0], [0], [1], [0, 0, 1, 1], [], []>} : vector<3x3xbf16>, vector<3x8xbf16>, vector<3x8xf32> -> vector<3x8xf32>
    %c0_33 = arith.constant 0 : index
    %c16 = arith.constant 16 : index
    %98 = vector.load %arg15[%c0_33, %c16] : memref<3x32xf32, #tpu.memory_space<vmem>>, vector<3x8xf32>
    tpu.vector_store %arg15[%c0_33, %c16], %97 {strides = array<i32>} : memref<3x32xf32, #tpu.memory_space<vmem>>, vector<3x8xf32>,
    %99 = vector.extract_strided_slice %32 {offsets = [0, 24], sizes = [3, 8], strides = [1, 1]} : vector<3x96xf32> to vector<3x8xf32>
    %100 = arith.truncf %99 : vector<3x8xf32> to vector<3x8xbf16>
    %101 = vector.extract_strided_slice %32 {offsets = [0, 56], sizes = [3, 8], strides = [1, 1]} : vector<3x96xf32> to vector<3x8xf32>
    %102 = arith.truncf %101 : vector<3x8xf32> to vector<3x8xbf16>
    %103 = vector.extract_strided_slice %32 {offsets = [0, 88], sizes = [3, 8], strides = [1, 1]} : vector<3x96xf32> to vector<3x8xf32>
    %104 = arith.truncf %103 : vector<3x8xf32> to vector<3x8xbf16>
    %cst_34 = arith.constant dense<0.000000e+00> : vector<3x3xf32>
    %105 = tpu.matmul %100, %102, %cst_34 {dimension_numbers = #tpu.dot_dimension_numbers<[1], [1], [0], [0], [0, 0, 1, 0], [], []>} : vector<3x8xbf16>, vector<3x8xbf16>, vector<3x3xf32> -> vector<3x3xf32>
    %cst_35 = arith.constant 0.353553385 : f32
    %106 = vector.broadcast %cst_35 : f32 to vector<3x3xf32>
    %107 = arith.mulf %105, %106 : vector<3x3xf32>
    %cst_36 = arith.constant dense<0xFF800000> : vector<3xf32>
    %108 = vector.multi_reduction <maximumf>, %107, %cst_36 [1] : vector<3x3xf32> to vector<3xf32>
    %109 = vector.shape_cast %108 : vector<3xf32> to vector<3x1xf32>
    %110 = vector.broadcast %109 : vector<3x1xf32> to vector<3x3xf32>
    %111 = arith.subf %107, %110 : vector<3x3xf32>
    %112 = math.exp %111 : vector<3x3xf32>
    %cst_37 = arith.constant dense<0.000000e+00> : vector<3xf32>
    %113 = vector.multi_reduction <add>, %112, %cst_37 [1] : vector<3x3xf32> to vector<3xf32>
    %114 = vector.shape_cast %113 : vector<3xf32> to vector<3x1xf32>
    %115 = tpu.reciprocal %114 {approx = true} : vector<3x1xf32> -> vector<3x1xf32>
    %116 = vector.broadcast %115 : vector<3x1xf32> to vector<3x3xf32>
    %117 = arith.mulf %112, %116 : vector<3x3xf32>
    %118 = arith.truncf %117 : vector<3x3xf32> to vector<3x3xbf16>
    %cst_38 = arith.constant dense<0.000000e+00> : vector<3x8xf32>
    %119 = tpu.matmul %118, %104, %cst_38 {dimension_numbers = #tpu.dot_dimension_numbers<[1], [0], [0], [1], [0, 0, 1, 1], [], []>} : vector<3x3xbf16>, vector<3x8xbf16>, vector<3x8xf32> -> vector<3x8xf32>
    %c0_39 = arith.constant 0 : index
    %c24 = arith.constant 24 : index
    %120 = vector.load %arg15[%c0_39, %c24] : memref<3x32xf32, #tpu.memory_space<vmem>>, vector<3x8xf32>
    tpu.vector_store %arg15[%c0_39, %c24], %119 {strides = array<i32>} : memref<3x32xf32, #tpu.memory_space<vmem>>, vector<3x8xf32>,
    %c0_40 = arith.constant 0 : index
    %c0_41 = arith.constant 0 : index
    %121 = vector.load %arg15[%c0_40, %c0_41] : memref<3x32xf32, #tpu.memory_space<vmem>>, vector<3x32xf32>
    %122 = arith.truncf %121 : vector<3x32xf32> to vector<3x32xbf16>
    %c0_42 = arith.constant 0 : index
    %c0_43 = arith.constant 0 : index
    %123 = vector.load %arg6[%c0_42, %c0_43] : memref<32x32xbf16, #tpu.memory_space<vmem>>, vector<32x32xbf16>
    %cst_44 = arith.constant dense<0.000000e+00> : vector<3x32xf32>
    %124 = tpu.matmul %122, %123, %cst_44 {dimension_numbers = #tpu.dot_dimension_numbers<[1], [0], [0], [1], [0, 0, 1, 1], [], []>} : vector<3x32xbf16>, vector<32x32xbf16>, vector<3x32xf32> -> vector<3x32xf32>
    %c0_45 = arith.constant 0 : index
    %c0_46 = arith.constant 0 : index
    %125 = vector.load %arg7[%c0_45, %c0_46] : memref<1x32xf32, #tpu.memory_space<vmem>>, vector<1x32xf32>
    %126 = vector.broadcast %125 : vector<1x32xf32> to vector<3x32xf32>
    %127 = arith.addf %124, %126 : vector<3x32xf32>
    %128 = arith.addf %2, %127 : vector<3x32xf32>
    %c0_47 = arith.constant 0 : index
    %c0_48 = arith.constant 0 : index
    %129 = vector.load %arg8[%c0_47, %c0_48] : memref<1x32xf32, #tpu.memory_space<vmem>>, vector<1x32xf32>
    %c0_49 = arith.constant 0 : index
    %c0_50 = arith.constant 0 : index
    %130 = vector.load %arg9[%c0_49, %c0_50] : memref<1x32xf32, #tpu.memory_space<vmem>>, vector<1x32xf32>
    %cst_51 = arith.constant dense<0.000000e+00> : vector<3xf32>
    %131 = vector.multi_reduction <add>, %128, %cst_51 [1] : vector<3x32xf32> to vector<3xf32>
    %132 = vector.shape_cast %131 : vector<3xf32> to vector<3x1xf32>
    %cst_52 = arith.constant 3.200000e+01 : f32
    %133 = vector.broadcast %cst_52 : f32 to vector<3x1xf32>
    %134 = arith.divf %132, %133 : vector<3x1xf32>
    %135 = vector.broadcast %134 : vector<3x1xf32> to vector<3x32xf32>
    %136 = arith.subf %128, %135 : vector<3x32xf32>
    %137 = arith.mulf %136, %136 : vector<3x32xf32>
    %cst_53 = arith.constant dense<0.000000e+00> : vector<3xf32>
    %138 = vector.multi_reduction <add>, %137, %cst_53 [1] : vector<3x32xf32> to vector<3xf32>
    %139 = vector.shape_cast %138 : vector<3xf32> to vector<3x1xf32>
    %cst_54 = arith.constant 3.200000e+01 : f32
    %140 = vector.broadcast %cst_54 : f32 to vector<3x1xf32>
    %141 = arith.divf %139, %140 : vector<3x1xf32>
    %142 = vector.broadcast %134 : vector<3x1xf32> to vector<3x32xf32>
    %143 = arith.subf %128, %142 : vector<3x32xf32>
    %cst_55 = arith.constant 9.99999997E-7 : f32
    %144 = vector.broadcast %cst_55 : f32 to vector<3x1xf32>
    %145 = arith.addf %141, %144 : vector<3x1xf32>
    %146 = math.rsqrt %145 : vector<3x1xf32>
    %147 = vector.broadcast %146 : vector<3x1xf32> to vector<3x32xf32>
    %148 = arith.mulf %143, %147 : vector<3x32xf32>
    %149 = vector.broadcast %129 : vector<1x32xf32> to vector<3x32xf32>
    %150 = arith.mulf %148, %149 : vector<3x32xf32>
    %151 = vector.broadcast %130 : vector<1x32xf32> to vector<3x32xf32>
    %152 = arith.addf %150, %151 : vector<3x32xf32>
    %153 = arith.truncf %152 : vector<3x32xf32> to vector<3x32xbf16>
    %c0_56 = arith.constant 0 : index
    %c0_57 = arith.constant 0 : index
    %154 = vector.load %arg10[%c0_56, %c0_57] : memref<32x128xbf16, #tpu.memory_space<vmem>>, vector<32x128xbf16>
    %cst_58 = arith.constant dense<0.000000e+00> : vector<3x128xf32>
    %155 = tpu.matmul %153, %154, %cst_58 {dimension_numbers = #tpu.dot_dimension_numbers<[1], [0], [0], [1], [0, 0, 1, 1], [], []>} : vector<3x32xbf16>, vector<32x128xbf16>, vector<3x128xf32> -> vector<3x128xf32>
    %c0_59 = arith.constant 0 : index
    %c0_60 = arith.constant 0 : index
    %156 = vector.load %arg11[%c0_59, %c0_60] : memref<1x128xf32, #tpu.memory_space<vmem>>, vector<1x128xf32>
    %157 = vector.broadcast %156 : vector<1x128xf32> to vector<3x128xf32>
    %158 = arith.addf %155, %157 : vector<3x128xf32>
    %cst_61 = arith.constant 5.000000e-01 : f32
    %159 = vector.broadcast %cst_61 : f32 to vector<3x128xf32>
    %160 = arith.mulf %159, %158 : vector<3x128xf32>
    %cst_62 = arith.constant 0.707106769 : f32
    %161 = vector.broadcast %cst_62 : f32 to vector<3x128xf32>
    %162 = arith.mulf %158, %161 : vector<3x128xf32>
    %163 = math.erf %162 : vector<3x128xf32>
    %cst_63 = arith.constant 1.000000e+00 : f32
    %164 = vector.broadcast %cst_63 : f32 to vector<3x128xf32>
    %165 = arith.addf %164, %163 : vector<3x128xf32>
    %166 = arith.mulf %160, %165 : vector<3x128xf32>
    %167 = arith.truncf %166 : vector<3x128xf32> to vector<3x128xbf16>
    %c0_64 = arith.constant 0 : index
    %c0_65 = arith.constant 0 : index
    %168 = vector.load %arg12[%c0_64, %c0_65] : memref<128x32xbf16, #tpu.memory_space<vmem>>, vector<128x32xbf16>
    %cst_66 = arith.constant dense<0.000000e+00> : vector<3x32xf32>
    %169 = tpu.matmul %167, %168, %cst_66 {dimension_numbers = #tpu.dot_dimension_numbers<[1], [0], [0], [1], [0, 0, 1, 1], [], []>} : vector<3x128xbf16>, vector<128x32xbf16>, vector<3x32xf32> -> vector<3x32xf32>
    %c0_67 = arith.constant 0 : index
    %c0_68 = arith.constant 0 : index
    %170 = vector.load %arg13[%c0_67, %c0_68] : memref<1x32xf32, #tpu.memory_space<vmem>>, vector<1x32xf32>
    %171 = vector.broadcast %170 : vector<1x32xf32> to vector<3x32xf32>
    %172 = arith.addf %169, %171 : vector<3x32xf32>
    %173 = arith.addf %128, %172 : vector<3x32xf32>
    %174 = arith.truncf %173 : vector<3x32xf32> to vector<3x32xbf16>
    %c0_69 = arith.constant 0 : index
    %c0_70 = arith.constant 0 : index
    %c0_71 = arith.constant 0 : index
    %175 = vector.load %arg14[%c0_69, %c0_70, %c0_71] : memref<1x3x32xbf16, #tpu.memory_space<vmem>>, vector<1x3x32xbf16>
    %176 = vector.shape_cast %175 : vector<1x3x32xbf16> to vector<3x32xbf16>
    %177 = vector.shape_cast %174 : vector<3x32xbf16> to vector<1x3x32xbf16>
    tpu.vector_store %arg14[%c0_69, %c0_70, %c0_71], %177 {strides = array<i32>} : memref<1x3x32xbf16, #tpu.memory_space<vmem>>, vector<1x3x32xbf16>,
    return
  }
  func.func @transform_0(%arg0: i32) -> (i32, i32, i32) {
    %c0_i32 = arith.constant 0 : i32
    %c0_i32_0 = arith.constant 0 : i32
    %c0_i32_1 = arith.constant 0 : i32
    return %arg0, %c0_i32, %c0_i32_0 : i32, i32, i32
  }
  func.func @transform_1(%arg0: i32) -> (i32, i32) {
    %c0_i32 = arith.constant 0 : i32
    %c0_i32_0 = arith.constant 0 : i32
    %c0_i32_1 = arith.constant 0 : i32
    return %c0_i32, %c0_i32_0 : i32, i32
  }
  func.func @transform_2(%arg0: i32) -> (i32, i32) {
    %c0_i32 = arith.constant 0 : i32
    %c0_i32_0 = arith.constant 0 : i32
    %c0_i32_1 = arith.constant 0 : i32
    return %c0_i32, %c0_i32_0 : i32, i32
  }
  func.func @transform_3(%arg0: i32) -> (i32, i32) {
    %c0_i32 = arith.constant 0 : i32
    %c0_i32_0 = arith.constant 0 : i32
    %c0_i32_1 = arith.constant 0 : i32
    return %c0_i32, %c0_i32_0 : i32, i32
  }
  func.func @transform_4(%arg0: i32) -> (i32, i32) {
    %c0_i32 = arith.constant 0 : i32
    %c0_i32_0 = arith.constant 0 : i32
    %c0_i32_1 = arith.constant 0 : i32
    return %c0_i32, %c0_i32_0 : i32, i32
  }
  func.func @transform_5(%arg0: i32) -> (i32, i32) {
    %c0_i32 = arith.constant 0 : i32
    %c0_i32_0 = arith.constant 0 : i32
    %c0_i32_1 = arith.constant 0 : i32
    return %c0_i32, %c0_i32_0 : i32, i32
  }
  func.func @transform_6(%arg0: i32) -> (i32, i32) {
    %c0_i32 = arith.constant 0 : i32
    %c0_i32_0 = arith.constant 0 : i32
    %c0_i32_1 = arith.constant 0 : i32
    return %c0_i32, %c0_i32_0 : i32, i32
  }
  func.func @transform_7(%arg0: i32) -> (i32, i32) {
    %c0_i32 = arith.constant 0 : i32
    %c0_i32_0 = arith.constant 0 : i32
    %c0_i32_1 = arith.constant 0 : i32
    return %c0_i32, %c0_i32_0 : i32, i32
  }
  func.func @transform_8(%arg0: i32) -> (i32, i32) {
    %c0_i32 = arith.constant 0 : i32
    %c0_i32_0 = arith.constant 0 : i32
    %c0_i32_1 = arith.constant 0 : i32
    return %c0_i32, %c0_i32_0 : i32, i32
  }
  func.func @transform_9(%arg0: i32) -> (i32, i32) {
    %c0_i32 = arith.constant 0 : i32
    %c0_i32_0 = arith.constant 0 : i32
    %c0_i32_1 = arith.constant 0 : i32
    return %c0_i32, %c0_i32_0 : i32, i32
  }
  func.func @transform_10(%arg0: i32) -> (i32, i32) {
    %c0_i32 = arith.constant 0 : i32
    %c0_i32_0 = arith.constant 0 : i32
    %c0_i32_1 = arith.constant 0 : i32
    return %c0_i32, %c0_i32_0 : i32, i32
  }
  func.func @transform_11(%arg0: i32) -> (i32, i32) {
    %c0_i32 = arith.constant 0 : i32
    %c0_i32_0 = arith.constant 0 : i32
    %c0_i32_1 = arith.constant 0 : i32
    return %c0_i32, %c0_i32_0 : i32, i32
  }
  func.func @transform_12(%arg0: i32) -> (i32, i32) {
    %c0_i32 = arith.constant 0 : i32
    %c0_i32_0 = arith.constant 0 : i32
    %c0_i32_1 = arith.constant 0 : i32
    return %c0_i32, %c0_i32_0 : i32, i32
  }
  func.func @transform_13(%arg0: i32) -> (i32, i32, i32) {
    %c0_i32 = arith.constant 0 : i32
    %c0_i32_0 = arith.constant 0 : i32
    %c0_i32_1 = arith.constant 0 : i32
    return %arg0, %c0_i32, %c0_i32_0 : i32, i32, i32
  }
}

module attributes {stable_mosaic.version = 11 : i64} {
  func.func @_norm_linear_kernel(%arg0: i32, %arg1: i32, %arg2: memref<1x3x32xbf16, #tpu.memory_space<vmem>>, %arg3: memref<1x32xf32, #tpu.memory_space<vmem>>, %arg4: memref<1x32xf32, #tpu.memory_space<vmem>>, %arg5: memref<32x32xbf16, #tpu.memory_space<vmem>>, %arg6: memref<1x32xf32, #tpu.memory_space<vmem>>, %arg7: memref<1x3x32xbf16, #tpu.memory_space<vmem>>) attributes {dimension_semantics = [#tpu.dimension_semantics<parallel>, #tpu.dimension_semantics<parallel>], iteration_bounds = array<i64: 2, 1>, scalar_prefetch = 0 : i64, scratch_operands = 0 : i64, tpu.core_type = #tpu.core_type<tc>, window_params = [{transform_indices = @transform_0, window_bounds = array<i64: 1, 3, 32>}, {pipeline_mode = #tpu.pipeline_mode<synchronous>, transform_indices = @transform_1, window_bounds = array<i64: 1, 32>}, {pipeline_mode = #tpu.pipeline_mode<synchronous>, transform_indices = @transform_2, window_bounds = array<i64: 1, 32>}, {pipeline_mode = #tpu.pipeline_mode<synchronous>, transform_indices = @transform_3, window_bounds = array<i64: 32, 32>}, {pipeline_mode = #tpu.pipeline_mode<synchronous>, transform_indices = @transform_4, window_bounds = array<i64: 1, 32>}, {transform_indices = @transform_5, window_bounds = array<i64: 1, 3, 32>}]} {
    %c0 = arith.constant 0 : index
    %c0_0 = arith.constant 0 : index
    %c0_1 = arith.constant 0 : index
    %0 = vector.load %arg2[%c0, %c0_0, %c0_1] : memref<1x3x32xbf16, #tpu.memory_space<vmem>>, vector<1x3x32xbf16>
    %1 = vector.shape_cast %0 : vector<1x3x32xbf16> to vector<3x32xbf16>
    %2 = arith.extf %1 : vector<3x32xbf16> to vector<3x32xf32>
    %c0_2 = arith.constant 0 : index
    %c0_3 = arith.constant 0 : index
    %3 = vector.load %arg3[%c0_2, %c0_3] : memref<1x32xf32, #tpu.memory_space<vmem>>, vector<1x32xf32>
    %c0_4 = arith.constant 0 : index
    %c0_5 = arith.constant 0 : index
    %4 = vector.load %arg4[%c0_4, %c0_5] : memref<1x32xf32, #tpu.memory_space<vmem>>, vector<1x32xf32>
    %cst = arith.constant dense<0.000000e+00> : vector<3xf32>
    %5 = vector.multi_reduction <add>, %2, %cst [1] : vector<3x32xf32> to vector<3xf32>
    %6 = vector.shape_cast %5 : vector<3xf32> to vector<3x1xf32>
    %cst_6 = arith.constant 3.200000e+01 : f32
    %7 = vector.broadcast %cst_6 : f32 to vector<3x1xf32>
    %8 = arith.divf %6, %7 : vector<3x1xf32>
    %9 = vector.broadcast %8 : vector<3x1xf32> to vector<3x32xf32>
    %10 = arith.subf %2, %9 : vector<3x32xf32>
    %11 = arith.mulf %10, %10 : vector<3x32xf32>
    %cst_7 = arith.constant dense<0.000000e+00> : vector<3xf32>
    %12 = vector.multi_reduction <add>, %11, %cst_7 [1] : vector<3x32xf32> to vector<3xf32>
    %13 = vector.shape_cast %12 : vector<3xf32> to vector<3x1xf32>
    %cst_8 = arith.constant 3.200000e+01 : f32
    %14 = vector.broadcast %cst_8 : f32 to vector<3x1xf32>
    %15 = arith.divf %13, %14 : vector<3x1xf32>
    %16 = vector.broadcast %8 : vector<3x1xf32> to vector<3x32xf32>
    %17 = arith.subf %2, %16 : vector<3x32xf32>
    %cst_9 = arith.constant 9.99999997E-7 : f32
    %18 = vector.broadcast %cst_9 : f32 to vector<3x1xf32>
    %19 = arith.addf %15, %18 : vector<3x1xf32>
    %20 = math.rsqrt %19 : vector<3x1xf32>
    %21 = vector.broadcast %20 : vector<3x1xf32> to vector<3x32xf32>
    %22 = arith.mulf %17, %21 : vector<3x32xf32>
    %23 = vector.broadcast %3 : vector<1x32xf32> to vector<3x32xf32>
    %24 = arith.mulf %22, %23 : vector<3x32xf32>
    %25 = vector.broadcast %4 : vector<1x32xf32> to vector<3x32xf32>
    %26 = arith.addf %24, %25 : vector<3x32xf32>
    %27 = arith.truncf %26 : vector<3x32xf32> to vector<3x32xbf16>
    %c0_10 = arith.constant 0 : index
    %c0_11 = arith.constant 0 : index
    %28 = vector.load %arg5[%c0_10, %c0_11] : memref<32x32xbf16, #tpu.memory_space<vmem>>, vector<32x32xbf16>
    %cst_12 = arith.constant dense<0.000000e+00> : vector<3x32xf32>
    %29 = tpu.matmul %27, %28, %cst_12 {dimension_numbers = #tpu.dot_dimension_numbers<[1], [0], [0], [1], [0, 0, 1, 1], [], []>} : vector<3x32xbf16>, vector<32x32xbf16>, vector<3x32xf32> -> vector<3x32xf32>
    %c0_13 = arith.constant 0 : index
    %c0_14 = arith.constant 0 : index
    %30 = vector.load %arg6[%c0_13, %c0_14] : memref<1x32xf32, #tpu.memory_space<vmem>>, vector<1x32xf32>
    %31 = vector.broadcast %30 : vector<1x32xf32> to vector<3x32xf32>
    %32 = arith.addf %29, %31 : vector<3x32xf32>
    %33 = arith.truncf %32 : vector<3x32xf32> to vector<3x32xbf16>
    %c0_15 = arith.constant 0 : index
    %c0_16 = arith.constant 0 : index
    %c0_17 = arith.constant 0 : index
    %34 = vector.load %arg7[%c0_15, %c0_16, %c0_17] : memref<1x3x32xbf16, #tpu.memory_space<vmem>>, vector<1x3x32xbf16>
    %35 = vector.shape_cast %34 : vector<1x3x32xbf16> to vector<3x32xbf16>
    %36 = vector.shape_cast %33 : vector<3x32xbf16> to vector<1x3x32xbf16>
    tpu.vector_store %arg7[%c0_15, %c0_16, %c0_17], %36 {strides = array<i32>} : memref<1x3x32xbf16, #tpu.memory_space<vmem>>, vector<1x3x32xbf16>,
    return
  }
  func.func @transform_0(%arg0: i32, %arg1: i32) -> (i32, i32, i32) {
    %c0_i32 = arith.constant 0 : i32
    %c0_i32_0 = arith.constant 0 : i32
    return %arg0, %arg1, %c0_i32 : i32, i32, i32
  }
  func.func @transform_1(%arg0: i32, %arg1: i32) -> (i32, i32) {
    %c0_i32 = arith.constant 0 : i32
    %c0_i32_0 = arith.constant 0 : i32
    %c0_i32_1 = arith.constant 0 : i32
    return %c0_i32, %c0_i32_0 : i32, i32
  }
  func.func @transform_2(%arg0: i32, %arg1: i32) -> (i32, i32) {
    %c0_i32 = arith.constant 0 : i32
    %c0_i32_0 = arith.constant 0 : i32
    %c0_i32_1 = arith.constant 0 : i32
    return %c0_i32, %c0_i32_0 : i32, i32
  }
  func.func @transform_3(%arg0: i32, %arg1: i32) -> (i32, i32) {
    %c0_i32 = arith.constant 0 : i32
    %c0_i32_0 = arith.constant 0 : i32
    %c0_i32_1 = arith.constant 0 : i32
    return %c0_i32, %c0_i32_0 : i32, i32
  }
  func.func @transform_4(%arg0: i32, %arg1: i32) -> (i32, i32) {
    %c0_i32 = arith.constant 0 : i32
    %c0_i32_0 = arith.constant 0 : i32
    %c0_i32_1 = arith.constant 0 : i32
    return %c0_i32, %c0_i32_0 : i32, i32
  }
  func.func @transform_5(%arg0: i32, %arg1: i32) -> (i32, i32, i32) {
    %c0_i32 = arith.constant 0 : i32
    %c0_i32_0 = arith.constant 0 : i32
    return %arg0, %arg1, %c0_i32 : i32, i32, i32
  }
}

module attributes {stable_mosaic.version = 11 : i64} {
  func.func @_block_kernel(%arg0: i32, %arg1: memref<1x9x32xbf16, #tpu.memory_space<vmem>>, %arg2: memref<1x32xf32, #tpu.memory_space<vmem>>, %arg3: memref<1x32xf32, #tpu.memory_space<vmem>>, %arg4: memref<32x96xbf16, #tpu.memory_space<vmem>>, %arg5: memref<1x96xf32, #tpu.memory_space<vmem>>, %arg6: memref<32x32xbf16, #tpu.memory_space<vmem>>, %arg7: memref<1x32xf32, #tpu.memory_space<vmem>>, %arg8: memref<1x32xf32, #tpu.memory_space<vmem>>, %arg9: memref<1x32xf32, #tpu.memory_space<vmem>>, %arg10: memref<32x128xbf16, #tpu.memory_space<vmem>>, %arg11: memref<1x128xf32, #tpu.memory_space<vmem>>, %arg12: memref<128x32xbf16, #tpu.memory_space<vmem>>, %arg13: memref<1x32xf32, #tpu.memory_space<vmem>>, %arg14: memref<1x9x32xbf16, #tpu.memory_space<vmem>>, %arg15: memref<9x32xf32, #tpu.memory_space<vmem>>) attributes {dimension_semantics = [#tpu.dimension_semantics<parallel>], iteration_bounds = array<i64: 2>, scalar_prefetch = 0 : i64, scratch_operands = 1 : i64, tpu.core_type = #tpu.core_type<tc>, window_params = [{transform_indices = @transform_0, window_bounds = array<i64: 1, 9, 32>}, {pipeline_mode = #tpu.pipeline_mode<synchronous>, transform_indices = @transform_1, window_bounds = array<i64: 1, 32>}, {pipeline_mode = #tpu.pipeline_mode<synchronous>, transform_indices = @transform_2, window_bounds = array<i64: 1, 32>}, {pipeline_mode = #tpu.pipeline_mode<synchronous>, transform_indices = @transform_3, window_bounds = array<i64: 32, 96>}, {pipeline_mode = #tpu.pipeline_mode<synchronous>, transform_indices = @transform_4, window_bounds = array<i64: 1, 96>}, {pipeline_mode = #tpu.pipeline_mode<synchronous>, transform_indices = @transform_5, window_bounds = array<i64: 32, 32>}, {pipeline_mode = #tpu.pipeline_mode<synchronous>, transform_indices = @transform_6, window_bounds = array<i64: 1, 32>}, {pipeline_mode = #tpu.pipeline_mode<synchronous>, transform_indices = @transform_7, window_bounds = array<i64: 1, 32>}, {pipeline_mode = #tpu.pipeline_mode<synchronous>, transform_indices = @transform_8, window_bounds = array<i64: 1, 32>}, {pipeline_mode = #tpu.pipeline_mode<synchronous>, transform_indices = @transform_9, window_bounds = array<i64: 32, 128>}, {pipeline_mode = #tpu.pipeline_mode<synchronous>, transform_indices = @transform_10, window_bounds = array<i64: 1, 128>}, {pipeline_mode = #tpu.pipeline_mode<synchronous>, transform_indices = @transform_11, window_bounds = array<i64: 128, 32>}, {pipeline_mode = #tpu.pipeline_mode<synchronous>, transform_indices = @transform_12, window_bounds = array<i64: 1, 32>}, {transform_indices = @transform_13, window_bounds = array<i64: 1, 9, 32>}]} {
    %c0 = arith.constant 0 : index
    %c0_0 = arith.constant 0 : index
    %c0_1 = arith.constant 0 : index
    %0 = vector.load %arg1[%c0, %c0_0, %c0_1] : memref<1x9x32xbf16, #tpu.memory_space<vmem>>, vector<1x9x32xbf16>
    %1 = vector.shape_cast %0 : vector<1x9x32xbf16> to vector<9x32xbf16>
    %2 = arith.extf %1 : vector<9x32xbf16> to vector<9x32xf32>
    %c0_2 = arith.constant 0 : index
    %c0_3 = arith.constant 0 : index
    %3 = vector.load %arg2[%c0_2, %c0_3] : memref<1x32xf32, #tpu.memory_space<vmem>>, vector<1x32xf32>
    %c0_4 = arith.constant 0 : index
    %c0_5 = arith.constant 0 : index
    %4 = vector.load %arg3[%c0_4, %c0_5] : memref<1x32xf32, #tpu.memory_space<vmem>>, vector<1x32xf32>
    %cst = arith.constant dense<0.000000e+00> : vector<9xf32>
    %5 = vector.multi_reduction <add>, %2, %cst [1] : vector<9x32xf32> to vector<9xf32>
    %6 = vector.shape_cast %5 : vector<9xf32> to vector<9x1xf32>
    %cst_6 = arith.constant 3.200000e+01 : f32
    %7 = vector.broadcast %cst_6 : f32 to vector<9x1xf32>
    %8 = arith.divf %6, %7 : vector<9x1xf32>
    %9 = vector.broadcast %8 : vector<9x1xf32> to vector<9x32xf32>
    %10 = arith.subf %2, %9 : vector<9x32xf32>
    %11 = arith.mulf %10, %10 : vector<9x32xf32>
    %cst_7 = arith.constant dense<0.000000e+00> : vector<9xf32>
    %12 = vector.multi_reduction <add>, %11, %cst_7 [1] : vector<9x32xf32> to vector<9xf32>
    %13 = vector.shape_cast %12 : vector<9xf32> to vector<9x1xf32>
    %cst_8 = arith.constant 3.200000e+01 : f32
    %14 = vector.broadcast %cst_8 : f32 to vector<9x1xf32>
    %15 = arith.divf %13, %14 : vector<9x1xf32>
    %16 = vector.broadcast %8 : vector<9x1xf32> to vector<9x32xf32>
    %17 = arith.subf %2, %16 : vector<9x32xf32>
    %cst_9 = arith.constant 9.99999997E-7 : f32
    %18 = vector.broadcast %cst_9 : f32 to vector<9x1xf32>
    %19 = arith.addf %15, %18 : vector<9x1xf32>
    %20 = math.rsqrt %19 : vector<9x1xf32>
    %21 = vector.broadcast %20 : vector<9x1xf32> to vector<9x32xf32>
    %22 = arith.mulf %17, %21 : vector<9x32xf32>
    %23 = vector.broadcast %3 : vector<1x32xf32> to vector<9x32xf32>
    %24 = arith.mulf %22, %23 : vector<9x32xf32>
    %25 = vector.broadcast %4 : vector<1x32xf32> to vector<9x32xf32>
    %26 = arith.addf %24, %25 : vector<9x32xf32>
    %27 = arith.truncf %26 : vector<9x32xf32> to vector<9x32xbf16>
    %c0_10 = arith.constant 0 : index
    %c0_11 = arith.constant 0 : index
    %28 = vector.load %arg4[%c0_10, %c0_11] : memref<32x96xbf16, #tpu.memory_space<vmem>>, vector<32x96xbf16>
    %cst_12 = arith.constant dense<0.000000e+00> : vector<9x96xf32>
    %29 = tpu.matmul %27, %28, %cst_12 {dimension_numbers = #tpu.dot_dimension_numbers<[1], [0], [0], [1], [0, 0, 1, 1], [], []>} : vector<9x32xbf16>, vector<32x96xbf16>, vector<9x96xf32> -> vector<9x96xf32>
    %c0_13 = arith.constant 0 : index
    %c0_14 = arith.constant 0 : index
    %30 = vector.load %arg5[%c0_13, %c0_14] : memref<1x96xf32, #tpu.memory_space<vmem>>, vector<1x96xf32>
    %31 = vector.broadcast %30 : vector<1x96xf32> to vector<9x96xf32>
    %32 = arith.addf %29, %31 : vector<9x96xf32>
    %33 = vector.extract_strided_slice %32 {offsets = [0, 0], sizes = [9, 8], strides = [1, 1]} : vector<9x96xf32> to vector<9x8xf32>
    %34 = arith.truncf %33 : vector<9x8xf32> to vector<9x8xbf16>
    %35 = vector.extract_strided_slice %32 {offsets = [0, 32], sizes = [9, 8], strides = [1, 1]} : vector<9x96xf32> to vector<9x8xf32>
    %36 = arith.truncf %35 : vector<9x8xf32> to vector<9x8xbf16>
    %37 = vector.extract_strided_slice %32 {offsets = [0, 64], sizes = [9, 8], strides = [1, 1]} : vector<9x96xf32> to vector<9x8xf32>
    %38 = arith.truncf %37 : vector<9x8xf32> to vector<9x8xbf16>
    %cst_15 = arith.constant dense<0.000000e+00> : vector<9x9xf32>
    %39 = tpu.matmul %34, %36, %cst_15 {dimension_numbers = #tpu.dot_dimension_numbers<[1], [1], [0], [0], [0, 0, 1, 0], [], []>} : vector<9x8xbf16>, vector<9x8xbf16>, vector<9x9xf32> -> vector<9x9xf32>
    %cst_16 = arith.constant 0.353553385 : f32
    %40 = vector.broadcast %cst_16 : f32 to vector<9x9xf32>
    %41 = arith.mulf %39, %40 : vector<9x9xf32>
    %cst_17 = arith.constant dense<0xFF800000> : vector<9xf32>
    %42 = vector.multi_reduction <maximumf>, %41, %cst_17 [1] : vector<9x9xf32> to vector<9xf32>
    %43 = vector.shape_cast %42 : vector<9xf32> to vector<9x1xf32>
    %44 = vector.broadcast %43 : vector<9x1xf32> to vector<9x9xf32>
    %45 = arith.subf %41, %44 : vector<9x9xf32>
    %46 = math.exp %45 : vector<9x9xf32>
    %cst_18 = arith.constant dense<0.000000e+00> : vector<9xf32>
    %47 = vector.multi_reduction <add>, %46, %cst_18 [1] : vector<9x9xf32> to vector<9xf32>
    %48 = vector.shape_cast %47 : vector<9xf32> to vector<9x1xf32>
    %49 = tpu.reciprocal %48 {approx = true} : vector<9x1xf32> -> vector<9x1xf32>
    %50 = vector.broadcast %49 : vector<9x1xf32> to vector<9x9xf32>
    %51 = arith.mulf %46, %50 : vector<9x9xf32>
    %52 = arith.truncf %51 : vector<9x9xf32> to vector<9x9xbf16>
    %cst_19 = arith.constant dense<0.000000e+00> : vector<9x8xf32>
    %53 = tpu.matmul %52, %38, %cst_19 {dimension_numbers = #tpu.dot_dimension_numbers<[1], [0], [0], [1], [0, 0, 1, 1], [], []>} : vector<9x9xbf16>, vector<9x8xbf16>, vector<9x8xf32> -> vector<9x8xf32>
    %c0_20 = arith.constant 0 : index
    %c0_21 = arith.constant 0 : index
    %54 = vector.load %arg15[%c0_20, %c0_21] : memref<9x32xf32, #tpu.memory_space<vmem>>, vector<9x8xf32>
    tpu.vector_store %arg15[%c0_20, %c0_21], %53 {strides = array<i32>} : memref<9x32xf32, #tpu.memory_space<vmem>>, vector<9x8xf32>,
    %55 = vector.extract_strided_slice %32 {offsets = [0, 8], sizes = [9, 8], strides = [1, 1]} : vector<9x96xf32> to vector<9x8xf32>
    %56 = arith.truncf %55 : vector<9x8xf32> to vector<9x8xbf16>
    %57 = vector.extract_strided_slice %32 {offsets = [0, 40], sizes = [9, 8], strides = [1, 1]} : vector<9x96xf32> to vector<9x8xf32>
    %58 = arith.truncf %57 : vector<9x8xf32> to vector<9x8xbf16>
    %59 = vector.extract_strided_slice %32 {offsets = [0, 72], sizes = [9, 8], strides = [1, 1]} : vector<9x96xf32> to vector<9x8xf32>
    %60 = arith.truncf %59 : vector<9x8xf32> to vector<9x8xbf16>
    %cst_22 = arith.constant dense<0.000000e+00> : vector<9x9xf32>
    %61 = tpu.matmul %56, %58, %cst_22 {dimension_numbers = #tpu.dot_dimension_numbers<[1], [1], [0], [0], [0, 0, 1, 0], [], []>} : vector<9x8xbf16>, vector<9x8xbf16>, vector<9x9xf32> -> vector<9x9xf32>
    %cst_23 = arith.constant 0.353553385 : f32
    %62 = vector.broadcast %cst_23 : f32 to vector<9x9xf32>
    %63 = arith.mulf %61, %62 : vector<9x9xf32>
    %cst_24 = arith.constant dense<0xFF800000> : vector<9xf32>
    %64 = vector.multi_reduction <maximumf>, %63, %cst_24 [1] : vector<9x9xf32> to vector<9xf32>
    %65 = vector.shape_cast %64 : vector<9xf32> to vector<9x1xf32>
    %66 = vector.broadcast %65 : vector<9x1xf32> to vector<9x9xf32>
    %67 = arith.subf %63, %66 : vector<9x9xf32>
    %68 = math.exp %67 : vector<9x9xf32>
    %cst_25 = arith.constant dense<0.000000e+00> : vector<9xf32>
    %69 = vector.multi_reduction <add>, %68, %cst_25 [1] : vector<9x9xf32> to vector<9xf32>
    %70 = vector.shape_cast %69 : vector<9xf32> to vector<9x1xf32>
    %71 = tpu.reciprocal %70 {approx = true} : vector<9x1xf32> -> vector<9x1xf32>
    %72 = vector.broadcast %71 : vector<9x1xf32> to vector<9x9xf32>
    %73 = arith.mulf %68, %72 : vector<9x9xf32>
    %74 = arith.truncf %73 : vector<9x9xf32> to vector<9x9xbf16>
    %cst_26 = arith.constant dense<0.000000e+00> : vector<9x8xf32>
    %75 = tpu.matmul %74, %60, %cst_26 {dimension_numbers = #tpu.dot_dimension_numbers<[1], [0], [0], [1], [0, 0, 1, 1], [], []>} : vector<9x9xbf16>, vector<9x8xbf16>, vector<9x8xf32> -> vector<9x8xf32>
    %c0_27 = arith.constant 0 : index
    %c8 = arith.constant 8 : index
    %76 = vector.load %arg15[%c0_27, %c8] : memref<9x32xf32, #tpu.memory_space<vmem>>, vector<9x8xf32>
    tpu.vector_store %arg15[%c0_27, %c8], %75 {strides = array<i32>} : memref<9x32xf32, #tpu.memory_space<vmem>>, vector<9x8xf32>,
    %77 = vector.extract_strided_slice %32 {offsets = [0, 16], sizes = [9, 8], strides = [1, 1]} : vector<9x96xf32> to vector<9x8xf32>
    %78 = arith.truncf %77 : vector<9x8xf32> to vector<9x8xbf16>
    %79 = vector.extract_strided_slice %32 {offsets = [0, 48], sizes = [9, 8], strides = [1, 1]} : vector<9x96xf32> to vector<9x8xf32>
    %80 = arith.truncf %79 : vector<9x8xf32> to vector<9x8xbf16>
    %81 = vector.extract_strided_slice %32 {offsets = [0, 80], sizes = [9, 8], strides = [1, 1]} : vector<9x96xf32> to vector<9x8xf32>
    %82 = arith.truncf %81 : vector<9x8xf32> to vector<9x8xbf16>
    %cst_28 = arith.constant dense<0.000000e+00> : vector<9x9xf32>
    %83 = tpu.matmul %78, %80, %cst_28 {dimension_numbers = #tpu.dot_dimension_numbers<[1], [1], [0], [0], [0, 0, 1, 0], [], []>} : vector<9x8xbf16>, vector<9x8xbf16>, vector<9x9xf32> -> vector<9x9xf32>
    %cst_29 = arith.constant 0.353553385 : f32
    %84 = vector.broadcast %cst_29 : f32 to vector<9x9xf32>
    %85 = arith.mulf %83, %84 : vector<9x9xf32>
    %cst_30 = arith.constant dense<0xFF800000> : vector<9xf32>
    %86 = vector.multi_reduction <maximumf>, %85, %cst_30 [1] : vector<9x9xf32> to vector<9xf32>
    %87 = vector.shape_cast %86 : vector<9xf32> to vector<9x1xf32>
    %88 = vector.broadcast %87 : vector<9x1xf32> to vector<9x9xf32>
    %89 = arith.subf %85, %88 : vector<9x9xf32>
    %90 = math.exp %89 : vector<9x9xf32>
    %cst_31 = arith.constant dense<0.000000e+00> : vector<9xf32>
    %91 = vector.multi_reduction <add>, %90, %cst_31 [1] : vector<9x9xf32> to vector<9xf32>
    %92 = vector.shape_cast %91 : vector<9xf32> to vector<9x1xf32>
    %93 = tpu.reciprocal %92 {approx = true} : vector<9x1xf32> -> vector<9x1xf32>
    %94 = vector.broadcast %93 : vector<9x1xf32> to vector<9x9xf32>
    %95 = arith.mulf %90, %94 : vector<9x9xf32>
    %96 = arith.truncf %95 : vector<9x9xf32> to vector<9x9xbf16>
    %cst_32 = arith.constant dense<0.000000e+00> : vector<9x8xf32>
    %97 = tpu.matmul %96, %82, %cst_32 {dimension_numbers = #tpu.dot_dimension_numbers<[1], [0], [0], [1], [0, 0, 1, 1], [], []>} : vector<9x9xbf16>, vector<9x8xbf16>, vector<9x8xf32> -> vector<9x8xf32>
    %c0_33 = arith.constant 0 : index
    %c16 = arith.constant 16 : index
    %98 = vector.load %arg15[%c0_33, %c16] : memref<9x32xf32, #tpu.memory_space<vmem>>, vector<9x8xf32>
    tpu.vector_store %arg15[%c0_33, %c16], %97 {strides = array<i32>} : memref<9x32xf32, #tpu.memory_space<vmem>>, vector<9x8xf32>,
    %99 = vector.extract_strided_slice %32 {offsets = [0, 24], sizes = [9, 8], strides = [1, 1]} : vector<9x96xf32> to vector<9x8xf32>
    %100 = arith.truncf %99 : vector<9x8xf32> to vector<9x8xbf16>
    %101 = vector.extract_strided_slice %32 {offsets = [0, 56], sizes = [9, 8], strides = [1, 1]} : vector<9x96xf32> to vector<9x8xf32>
    %102 = arith.truncf %101 : vector<9x8xf32> to vector<9x8xbf16>
    %103 = vector.extract_strided_slice %32 {offsets = [0, 88], sizes = [9, 8], strides = [1, 1]} : vector<9x96xf32> to vector<9x8xf32>
    %104 = arith.truncf %103 : vector<9x8xf32> to vector<9x8xbf16>
    %cst_34 = arith.constant dense<0.000000e+00> : vector<9x9xf32>
    %105 = tpu.matmul %100, %102, %cst_34 {dimension_numbers = #tpu.dot_dimension_numbers<[1], [1], [0], [0], [0, 0, 1, 0], [], []>} : vector<9x8xbf16>, vector<9x8xbf16>, vector<9x9xf32> -> vector<9x9xf32>
    %cst_35 = arith.constant 0.353553385 : f32
    %106 = vector.broadcast %cst_35 : f32 to vector<9x9xf32>
    %107 = arith.mulf %105, %106 : vector<9x9xf32>
    %cst_36 = arith.constant dense<0xFF800000> : vector<9xf32>
    %108 = vector.multi_reduction <maximumf>, %107, %cst_36 [1] : vector<9x9xf32> to vector<9xf32>
    %109 = vector.shape_cast %108 : vector<9xf32> to vector<9x1xf32>
    %110 = vector.broadcast %109 : vector<9x1xf32> to vector<9x9xf32>
    %111 = arith.subf %107, %110 : vector<9x9xf32>
    %112 = math.exp %111 : vector<9x9xf32>
    %cst_37 = arith.constant dense<0.000000e+00> : vector<9xf32>
    %113 = vector.multi_reduction <add>, %112, %cst_37 [1] : vector<9x9xf32> to vector<9xf32>
    %114 = vector.shape_cast %113 : vector<9xf32> to vector<9x1xf32>
    %115 = tpu.reciprocal %114 {approx = true} : vector<9x1xf32> -> vector<9x1xf32>
    %116 = vector.broadcast %115 : vector<9x1xf32> to vector<9x9xf32>
    %117 = arith.mulf %112, %116 : vector<9x9xf32>
    %118 = arith.truncf %117 : vector<9x9xf32> to vector<9x9xbf16>
    %cst_38 = arith.constant dense<0.000000e+00> : vector<9x8xf32>
    %119 = tpu.matmul %118, %104, %cst_38 {dimension_numbers = #tpu.dot_dimension_numbers<[1], [0], [0], [1], [0, 0, 1, 1], [], []>} : vector<9x9xbf16>, vector<9x8xbf16>, vector<9x8xf32> -> vector<9x8xf32>
    %c0_39 = arith.constant 0 : index
    %c24 = arith.constant 24 : index
    %120 = vector.load %arg15[%c0_39, %c24] : memref<9x32xf32, #tpu.memory_space<vmem>>, vector<9x8xf32>
    tpu.vector_store %arg15[%c0_39, %c24], %119 {strides = array<i32>} : memref<9x32xf32, #tpu.memory_space<vmem>>, vector<9x8xf32>,
    %c0_40 = arith.constant 0 : index
    %c0_41 = arith.constant 0 : index
    %121 = vector.load %arg15[%c0_40, %c0_41] : memref<9x32xf32, #tpu.memory_space<vmem>>, vector<9x32xf32>
    %122 = arith.truncf %121 : vector<9x32xf32> to vector<9x32xbf16>
    %c0_42 = arith.constant 0 : index
    %c0_43 = arith.constant 0 : index
    %123 = vector.load %arg6[%c0_42, %c0_43] : memref<32x32xbf16, #tpu.memory_space<vmem>>, vector<32x32xbf16>
    %cst_44 = arith.constant dense<0.000000e+00> : vector<9x32xf32>
    %124 = tpu.matmul %122, %123, %cst_44 {dimension_numbers = #tpu.dot_dimension_numbers<[1], [0], [0], [1], [0, 0, 1, 1], [], []>} : vector<9x32xbf16>, vector<32x32xbf16>, vector<9x32xf32> -> vector<9x32xf32>
    %c0_45 = arith.constant 0 : index
    %c0_46 = arith.constant 0 : index
    %125 = vector.load %arg7[%c0_45, %c0_46] : memref<1x32xf32, #tpu.memory_space<vmem>>, vector<1x32xf32>
    %126 = vector.broadcast %125 : vector<1x32xf32> to vector<9x32xf32>
    %127 = arith.addf %124, %126 : vector<9x32xf32>
    %128 = arith.addf %2, %127 : vector<9x32xf32>
    %c0_47 = arith.constant 0 : index
    %c0_48 = arith.constant 0 : index
    %129 = vector.load %arg8[%c0_47, %c0_48] : memref<1x32xf32, #tpu.memory_space<vmem>>, vector<1x32xf32>
    %c0_49 = arith.constant 0 : index
    %c0_50 = arith.constant 0 : index
    %130 = vector.load %arg9[%c0_49, %c0_50] : memref<1x32xf32, #tpu.memory_space<vmem>>, vector<1x32xf32>
    %cst_51 = arith.constant dense<0.000000e+00> : vector<9xf32>
    %131 = vector.multi_reduction <add>, %128, %cst_51 [1] : vector<9x32xf32> to vector<9xf32>
    %132 = vector.shape_cast %131 : vector<9xf32> to vector<9x1xf32>
    %cst_52 = arith.constant 3.200000e+01 : f32
    %133 = vector.broadcast %cst_52 : f32 to vector<9x1xf32>
    %134 = arith.divf %132, %133 : vector<9x1xf32>
    %135 = vector.broadcast %134 : vector<9x1xf32> to vector<9x32xf32>
    %136 = arith.subf %128, %135 : vector<9x32xf32>
    %137 = arith.mulf %136, %136 : vector<9x32xf32>
    %cst_53 = arith.constant dense<0.000000e+00> : vector<9xf32>
    %138 = vector.multi_reduction <add>, %137, %cst_53 [1] : vector<9x32xf32> to vector<9xf32>
    %139 = vector.shape_cast %138 : vector<9xf32> to vector<9x1xf32>
    %cst_54 = arith.constant 3.200000e+01 : f32
    %140 = vector.broadcast %cst_54 : f32 to vector<9x1xf32>
    %141 = arith.divf %139, %140 : vector<9x1xf32>
    %142 = vector.broadcast %134 : vector<9x1xf32> to vector<9x32xf32>
    %143 = arith.subf %128, %142 : vector<9x32xf32>
    %cst_55 = arith.constant 9.99999997E-7 : f32
    %144 = vector.broadcast %cst_55 : f32 to vector<9x1xf32>
    %145 = arith.addf %141, %144 : vector<9x1xf32>
    %146 = math.rsqrt %145 : vector<9x1xf32>
    %147 = vector.broadcast %146 : vector<9x1xf32> to vector<9x32xf32>
    %148 = arith.mulf %143, %147 : vector<9x32xf32>
    %149 = vector.broadcast %129 : vector<1x32xf32> to vector<9x32xf32>
    %150 = arith.mulf %148, %149 : vector<9x32xf32>
    %151 = vector.broadcast %130 : vector<1x32xf32> to vector<9x32xf32>
    %152 = arith.addf %150, %151 : vector<9x32xf32>
    %153 = arith.truncf %152 : vector<9x32xf32> to vector<9x32xbf16>
    %c0_56 = arith.constant 0 : index
    %c0_57 = arith.constant 0 : index
    %154 = vector.load %arg10[%c0_56, %c0_57] : memref<32x128xbf16, #tpu.memory_space<vmem>>, vector<32x128xbf16>
    %cst_58 = arith.constant dense<0.000000e+00> : vector<9x128xf32>
    %155 = tpu.matmul %153, %154, %cst_58 {dimension_numbers = #tpu.dot_dimension_numbers<[1], [0], [0], [1], [0, 0, 1, 1], [], []>} : vector<9x32xbf16>, vector<32x128xbf16>, vector<9x128xf32> -> vector<9x128xf32>
    %c0_59 = arith.constant 0 : index
    %c0_60 = arith.constant 0 : index
    %156 = vector.load %arg11[%c0_59, %c0_60] : memref<1x128xf32, #tpu.memory_space<vmem>>, vector<1x128xf32>
    %157 = vector.broadcast %156 : vector<1x128xf32> to vector<9x128xf32>
    %158 = arith.addf %155, %157 : vector<9x128xf32>
    %cst_61 = arith.constant 5.000000e-01 : f32
    %159 = vector.broadcast %cst_61 : f32 to vector<9x128xf32>
    %160 = arith.mulf %159, %158 : vector<9x128xf32>
    %cst_62 = arith.constant 0.707106769 : f32
    %161 = vector.broadcast %cst_62 : f32 to vector<9x128xf32>
    %162 = arith.mulf %158, %161 : vector<9x128xf32>
    %163 = math.erf %162 : vector<9x128xf32>
    %cst_63 = arith.constant 1.000000e+00 : f32
    %164 = vector.broadcast %cst_63 : f32 to vector<9x128xf32>
    %165 = arith.addf %164, %163 : vector<9x128xf32>
    %166 = arith.mulf %160, %165 : vector<9x128xf32>
    %167 = arith.truncf %166 : vector<9x128xf32> to vector<9x128xbf16>
    %c0_64 = arith.constant 0 : index
    %c0_65 = arith.constant 0 : index
    %168 = vector.load %arg12[%c0_64, %c0_65] : memref<128x32xbf16, #tpu.memory_space<vmem>>, vector<128x32xbf16>
    %cst_66 = arith.constant dense<0.000000e+00> : vector<9x32xf32>
    %169 = tpu.matmul %167, %168, %cst_66 {dimension_numbers = #tpu.dot_dimension_numbers<[1], [0], [0], [1], [0, 0, 1, 1], [], []>} : vector<9x128xbf16>, vector<128x32xbf16>, vector<9x32xf32> -> vector<9x32xf32>
    %c0_67 = arith.constant 0 : index
    %c0_68 = arith.constant 0 : index
    %170 = vector.load %arg13[%c0_67, %c0_68] : memref<1x32xf32, #tpu.memory_space<vmem>>, vector<1x32xf32>
    %171 = vector.broadcast %170 : vector<1x32xf32> to vector<9x32xf32>
    %172 = arith.addf %169, %171 : vector<9x32xf32>
    %173 = arith.addf %128, %172 : vector<9x32xf32>
    %174 = arith.truncf %173 : vector<9x32xf32> to vector<9x32xbf16>
    %c0_69 = arith.constant 0 : index
    %c0_70 = arith.constant 0 : index
    %c0_71 = arith.constant 0 : index
    %175 = vector.load %arg14[%c0_69, %c0_70, %c0_71] : memref<1x9x32xbf16, #tpu.memory_space<vmem>>, vector<1x9x32xbf16>
    %176 = vector.shape_cast %175 : vector<1x9x32xbf16> to vector<9x32xbf16>
    %177 = vector.shape_cast %174 : vector<9x32xbf16> to vector<1x9x32xbf16>
    tpu.vector_store %arg14[%c0_69, %c0_70, %c0_71], %177 {strides = array<i32>} : memref<1x9x32xbf16, #tpu.memory_space<vmem>>, vector<1x9x32xbf16>,
    return
  }
  func.func @transform_0(%arg0: i32) -> (i32, i32, i32) {
    %c0_i32 = arith.constant 0 : i32
    %c0_i32_0 = arith.constant 0 : i32
    %c0_i32_1 = arith.constant 0 : i32
    return %arg0, %c0_i32, %c0_i32_0 : i32, i32, i32
  }
  func.func @transform_1(%arg0: i32) -> (i32, i32) {
    %c0_i32 = arith.constant 0 : i32
    %c0_i32_0 = arith.constant 0 : i32
    %c0_i32_1 = arith.constant 0 : i32
    return %c0_i32, %c0_i32_0 : i32, i32
  }
  func.func @transform_2(%arg0: i32) -> (i32, i32) {
    %c0_i32 = arith.constant 0 : i32
    %c0_i32_0 = arith.constant 0 : i32
    %c0_i32_1 = arith.constant 0 : i32
    return %c0_i32, %c0_i32_0 : i32, i32
  }
  func.func @transform_3(%arg0: i32) -> (i32, i32) {
    %c0_i32 = arith.constant 0 : i32
    %c0_i32_0 = arith.constant 0 : i32
    %c0_i32_1 = arith.constant 0 : i32
    return %c0_i32, %c0_i32_0 : i32, i32
  }
  func.func @transform_4(%arg0: i32) -> (i32, i32) {
    %c0_i32 = arith.constant 0 : i32
    %c0_i32_0 = arith.constant 0 : i32
    %c0_i32_1 = arith.constant 0 : i32
    return %c0_i32, %c0_i32_0 : i32, i32
  }
  func.func @transform_5(%arg0: i32) -> (i32, i32) {
    %c0_i32 = arith.constant 0 : i32
    %c0_i32_0 = arith.constant 0 : i32
    %c0_i32_1 = arith.constant 0 : i32
    return %c0_i32, %c0_i32_0 : i32, i32
  }
  func.func @transform_6(%arg0: i32) -> (i32, i32) {
    %c0_i32 = arith.constant 0 : i32
    %c0_i32_0 = arith.constant 0 : i32
    %c0_i32_1 = arith.constant 0 : i32
    return %c0_i32, %c0_i32_0 : i32, i32
  }
  func.func @transform_7(%arg0: i32) -> (i32, i32) {
    %c0_i32 = arith.constant 0 : i32
    %c0_i32_0 = arith.constant 0 : i32
    %c0_i32_1 = arith.constant 0 : i32
    return %c0_i32, %c0_i32_0 : i32, i32
  }
  func.func @transform_8(%arg0: i32) -> (i32, i32) {
    %c0_i32 = arith.constant 0 : i32
    %c0_i32_0 = arith.constant 0 : i32
    %c0_i32_1 = arith.constant 0 : i32
    return %c0_i32, %c0_i32_0 : i32, i32
  }
  func.func @transform_9(%arg0: i32) -> (i32, i32) {
    %c0_i32 = arith.constant 0 : i32
    %c0_i32_0 = arith.constant 0 : i32
    %c0_i32_1 = arith.constant 0 : i32
    return %c0_i32, %c0_i32_0 : i32, i32
  }
  func.func @transform_10(%arg0: i32) -> (i32, i32) {
    %c0_i32 = arith.constant 0 : i32
    %c0_i32_0 = arith.constant 0 : i32
    %c0_i32_1 = arith.constant 0 : i32
    return %c0_i32, %c0_i32_0 : i32, i32
  }
  func.func @transform_11(%arg0: i32) -> (i32, i32) {
    %c0_i32 = arith.constant 0 : i32
    %c0_i32_0 = arith.constant 0 : i32
    %c0_i32_1 = arith.constant 0 : i32
    return %c0_i32, %c0_i32_0 : i32, i32
  }
  func.func @transform_12(%arg0: i32) -> (i32, i32) {
    %c0_i32 = arith.constant 0 : i32
    %c0_i32_0 = arith.constant 0 : i32
    %c0_i32_1 = arith.constant 0 : i32
    return %c0_i32, %c0_i32_0 : i32, i32
  }
  func.func @transform_13(%arg0: i32) -> (i32, i32, i32) {
    %c0_i32 = arith.constant 0 : i32
    %c0_i32_0 = arith.constant 0 : i32
    %c0_i32_1 = arith.constant 0 : i32
    return %arg0, %c0_i32, %c0_i32_0 : i32, i32, i32
  }
}

module attributes {stable_mosaic.version = 11 : i64} {
  func.func @_norm_linear_kernel(%arg0: i32, %arg1: i32, %arg2: memref<1x9x32xbf16, #tpu.memory_space<vmem>>, %arg3: memref<1x32xf32, #tpu.memory_space<vmem>>, %arg4: memref<1x32xf32, #tpu.memory_space<vmem>>, %arg5: memref<32x192xbf16, #tpu.memory_space<vmem>>, %arg6: memref<1x192xf32, #tpu.memory_space<vmem>>, %arg7: memref<1x9x192xf32, #tpu.memory_space<vmem>>) attributes {dimension_semantics = [#tpu.dimension_semantics<parallel>, #tpu.dimension_semantics<parallel>], iteration_bounds = array<i64: 2, 1>, scalar_prefetch = 0 : i64, scratch_operands = 0 : i64, tpu.core_type = #tpu.core_type<tc>, window_params = [{transform_indices = @transform_0, window_bounds = array<i64: 1, 9, 32>}, {pipeline_mode = #tpu.pipeline_mode<synchronous>, transform_indices = @transform_1, window_bounds = array<i64: 1, 32>}, {pipeline_mode = #tpu.pipeline_mode<synchronous>, transform_indices = @transform_2, window_bounds = array<i64: 1, 32>}, {pipeline_mode = #tpu.pipeline_mode<synchronous>, transform_indices = @transform_3, window_bounds = array<i64: 32, 192>}, {pipeline_mode = #tpu.pipeline_mode<synchronous>, transform_indices = @transform_4, window_bounds = array<i64: 1, 192>}, {transform_indices = @transform_5, window_bounds = array<i64: 1, 9, 192>}]} {
    %c0 = arith.constant 0 : index
    %c0_0 = arith.constant 0 : index
    %c0_1 = arith.constant 0 : index
    %0 = vector.load %arg2[%c0, %c0_0, %c0_1] : memref<1x9x32xbf16, #tpu.memory_space<vmem>>, vector<1x9x32xbf16>
    %1 = vector.shape_cast %0 : vector<1x9x32xbf16> to vector<9x32xbf16>
    %2 = arith.extf %1 : vector<9x32xbf16> to vector<9x32xf32>
    %c0_2 = arith.constant 0 : index
    %c0_3 = arith.constant 0 : index
    %3 = vector.load %arg3[%c0_2, %c0_3] : memref<1x32xf32, #tpu.memory_space<vmem>>, vector<1x32xf32>
    %c0_4 = arith.constant 0 : index
    %c0_5 = arith.constant 0 : index
    %4 = vector.load %arg4[%c0_4, %c0_5] : memref<1x32xf32, #tpu.memory_space<vmem>>, vector<1x32xf32>
    %cst = arith.constant dense<0.000000e+00> : vector<9xf32>
    %5 = vector.multi_reduction <add>, %2, %cst [1] : vector<9x32xf32> to vector<9xf32>
    %6 = vector.shape_cast %5 : vector<9xf32> to vector<9x1xf32>
    %cst_6 = arith.constant 3.200000e+01 : f32
    %7 = vector.broadcast %cst_6 : f32 to vector<9x1xf32>
    %8 = arith.divf %6, %7 : vector<9x1xf32>
    %9 = vector.broadcast %8 : vector<9x1xf32> to vector<9x32xf32>
    %10 = arith.subf %2, %9 : vector<9x32xf32>
    %11 = arith.mulf %10, %10 : vector<9x32xf32>
    %cst_7 = arith.constant dense<0.000000e+00> : vector<9xf32>
    %12 = vector.multi_reduction <add>, %11, %cst_7 [1] : vector<9x32xf32> to vector<9xf32>
    %13 = vector.shape_cast %12 : vector<9xf32> to vector<9x1xf32>
    %cst_8 = arith.constant 3.200000e+01 : f32
    %14 = vector.broadcast %cst_8 : f32 to vector<9x1xf32>
    %15 = arith.divf %13, %14 : vector<9x1xf32>
    %16 = vector.broadcast %8 : vector<9x1xf32> to vector<9x32xf32>
    %17 = arith.subf %2, %16 : vector<9x32xf32>
    %cst_9 = arith.constant 9.99999997E-7 : f32
    %18 = vector.broadcast %cst_9 : f32 to vector<9x1xf32>
    %19 = arith.addf %15, %18 : vector<9x1xf32>
    %20 = math.rsqrt %19 : vector<9x1xf32>
    %21 = vector.broadcast %20 : vector<9x1xf32> to vector<9x32xf32>
    %22 = arith.mulf %17, %21 : vector<9x32xf32>
    %23 = vector.broadcast %3 : vector<1x32xf32> to vector<9x32xf32>
    %24 = arith.mulf %22, %23 : vector<9x32xf32>
    %25 = vector.broadcast %4 : vector<1x32xf32> to vector<9x32xf32>
    %26 = arith.addf %24, %25 : vector<9x32xf32>
    %27 = arith.truncf %26 : vector<9x32xf32> to vector<9x32xbf16>
    %c0_10 = arith.constant 0 : index
    %c0_11 = arith.constant 0 : index
    %28 = vector.load %arg5[%c0_10, %c0_11] : memref<32x192xbf16, #tpu.memory_space<vmem>>, vector<32x192xbf16>
    %cst_12 = arith.constant dense<0.000000e+00> : vector<9x192xf32>
    %29 = tpu.matmul %27, %28, %cst_12 {dimension_numbers = #tpu.dot_dimension_numbers<[1], [0], [0], [1], [0, 0, 1, 1], [], []>} : vector<9x32xbf16>, vector<32x192xbf16>, vector<9x192xf32> -> vector<9x192xf32>
    %c0_13 = arith.constant 0 : index
    %c0_14 = arith.constant 0 : index
    %30 = vector.load %arg6[%c0_13, %c0_14] : memref<1x192xf32, #tpu.memory_space<vmem>>, vector<1x192xf32>
    %31 = vector.broadcast %30 : vector<1x192xf32> to vector<9x192xf32>
    %32 = arith.addf %29, %31 : vector<9x192xf32>
    %c0_15 = arith.constant 0 : index
    %c0_16 = arith.constant 0 : index
    %c0_17 = arith.constant 0 : index
    %33 = vector.load %arg7[%c0_15, %c0_16, %c0_17] : memref<1x9x192xf32, #tpu.memory_space<vmem>>, vector<1x9x192xf32>
    %34 = vector.shape_cast %33 : vector<1x9x192xf32> to vector<9x192xf32>
    %35 = vector.shape_cast %32 : vector<9x192xf32> to vector<1x9x192xf32>
    tpu.vector_store %arg7[%c0_15, %c0_16, %c0_17], %35 {strides = array<i32>} : memref<1x9x192xf32, #tpu.memory_space<vmem>>, vector<1x9x192xf32>,
    return
  }
  func.func @transform_0(%arg0: i32, %arg1: i32) -> (i32, i32, i32) {
    %c0_i32 = arith.constant 0 : i32
    %c0_i32_0 = arith.constant 0 : i32
    return %arg0, %arg1, %c0_i32 : i32, i32, i32
  }
  func.func @transform_1(%arg0: i32, %arg1: i32) -> (i32, i32) {
    %c0_i32 = arith.constant 0 : i32
    %c0_i32_0 = arith.constant 0 : i32
    %c0_i32_1 = arith.constant 0 : i32
    return %c0_i32, %c0_i32_0 : i32, i32
  }
  func.func @transform_2(%arg0: i32, %arg1: i32) -> (i32, i32) {
    %c0_i32 = arith.constant 0 : i32
    %c0_i32_0 = arith.constant 0 : i32
    %c0_i32_1 = arith.constant 0 : i32
    return %c0_i32, %c0_i32_0 : i32, i32
  }
  func.func @transform_3(%arg0: i32, %arg1: i32) -> (i32, i32) {
    %c0_i32 = arith.constant 0 : i32
    %c0_i32_0 = arith.constant 0 : i32
    %c0_i32_1 = arith.constant 0 : i32
    return %c0_i32, %c0_i32_0 : i32, i32
  }
  func.func @transform_4(%arg0: i32, %arg1: i32) -> (i32, i32) {
    %c0_i32 = arith.constant 0 : i32
    %c0_i32_0 = arith.constant 0 : i32
    %c0_i32_1 = arith.constant 0 : i32
    return %c0_i32, %c0_i32_0 : i32, i32
  }
  func.func @transform_5(%arg0: i32, %arg1: i32) -> (i32, i32, i32) {
    %c0_i32 = arith.constant 0 : i32
    %c0_i32_0 = arith.constant 0 : i32
    return %arg0, %arg1, %c0_i32 : i32, i32, i32
  }
}

module attributes {stable_mosaic.version = 11 : i64} {
  func.func @_mae_loss_kernel(%arg0: i32, %arg1: memref<16x192xf32, #tpu.memory_space<vmem>>, %arg2: memref<16x192xf32, #tpu.memory_space<vmem>>, %arg3: memref<16x1xf32, #tpu.memory_space<vmem>>, %arg4: memref<1xf32, #tpu.memory_space<smem>>, %arg5: memref<1xf32, #tpu.memory_space<smem>>, %arg6: memref<1xf32, #tpu.memory_space<smem>>) attributes {dimension_semantics = [#tpu.dimension_semantics<arbitrary>], iteration_bounds = array<i64: 1>, scalar_prefetch = 0 : i64, scratch_operands = 2 : i64, tpu.core_type = #tpu.core_type<tc>, window_params = [{transform_indices = @transform_0, window_bounds = array<i64: 16, 192>}, {transform_indices = @transform_1, window_bounds = array<i64: 16, 192>}, {transform_indices = @transform_2, window_bounds = array<i64: 16, 1>}, {transform_indices = @transform_3, window_bounds = array<i64: 1>}]} {
    %c0_i32 = arith.constant 0 : i32
    %0 = arith.cmpi eq, %arg0, %c0_i32 : i32
    %1 = arith.extui %0 : i1 to i32
    %c0_i32_0 = arith.constant 0 : i32
    %2 = arith.cmpi ne, %1, %c0_i32_0 : i32
    scf.if %2 {
      %cst_15 = arith.constant 0.000000e+00 : f32
      %c0_16 = arith.constant 0 : index
      %30 = memref.load %arg5[%c0_16] : memref<1xf32, #tpu.memory_space<smem>>
      memref.store %cst_15, %arg5[%c0_16] : memref<1xf32, #tpu.memory_space<smem>>
      %cst_17 = arith.constant 0.000000e+00 : f32
      %c0_18 = arith.constant 0 : index
      %31 = memref.load %arg6[%c0_18] : memref<1xf32, #tpu.memory_space<smem>>
      memref.store %cst_17, %arg6[%c0_18] : memref<1xf32, #tpu.memory_space<smem>>
    } else {
    }
    %c0 = arith.constant 0 : index
    %c0_1 = arith.constant 0 : index
    %3 = vector.load %arg1[%c0, %c0_1] : memref<16x192xf32, #tpu.memory_space<vmem>>, vector<16x192xf32>
    %c0_2 = arith.constant 0 : index
    %c0_3 = arith.constant 0 : index
    %4 = vector.load %arg2[%c0_2, %c0_3] : memref<16x192xf32, #tpu.memory_space<vmem>>, vector<16x192xf32>
    %5 = arith.subf %3, %4 : vector<16x192xf32>
    %6 = arith.mulf %5, %5 : vector<16x192xf32>
    %cst = arith.constant dense<0.000000e+00> : vector<16xf32>
    %7 = vector.multi_reduction <add>, %6, %cst [1] : vector<16x192xf32> to vector<16xf32>
    %8 = vector.shape_cast %7 : vector<16xf32> to vector<16x1xf32>
    %cst_4 = arith.constant 1.920000e+02 : f32
    %9 = vector.broadcast %cst_4 : f32 to vector<16x1xf32>
    %10 = arith.divf %8, %9 : vector<16x1xf32>
    %c0_5 = arith.constant 0 : index
    %c0_6 = arith.constant 0 : index
    %11 = vector.load %arg3[%c0_5, %c0_6] : memref<16x1xf32, #tpu.memory_space<vmem>>, vector<16x1xf32>
    %c0_7 = arith.constant 0 : index
    %12 = memref.load %arg5[%c0_7] : memref<1xf32, #tpu.memory_space<smem>>
    %13 = arith.mulf %10, %11 : vector<16x1xf32>
    %14 = vector.shape_cast %13 : vector<16x1xf32> to vector<1x16x1xf32>
    %cst_8 = arith.constant dense<0.000000e+00> : vector<1xf32>
    %15 = vector.multi_reduction <add>, %14, %cst_8 [1, 2] : vector<1x16x1xf32> to vector<1xf32>
    %16 = vector.shape_cast %15 : vector<1xf32> to vector<1x1x1xf32>
    %17 = vector.extract %16[0, 0, 0] : f32 from vector<1x1x1xf32>
    %18 = arith.addf %12, %17 : f32
    %c0_9 = arith.constant 0 : index
    %19 = memref.load %arg5[%c0_9] : memref<1xf32, #tpu.memory_space<smem>>
    memref.store %18, %arg5[%c0_9] : memref<1xf32, #tpu.memory_space<smem>>
    %c0_10 = arith.constant 0 : index
    %20 = memref.load %arg6[%c0_10] : memref<1xf32, #tpu.memory_space<smem>>
    %21 = vector.shape_cast %11 : vector<16x1xf32> to vector<1x16x1xf32>
    %cst_11 = arith.constant dense<0.000000e+00> : vector<1xf32>
    %22 = vector.multi_reduction <add>, %21, %cst_11 [1, 2] : vector<1x16x1xf32> to vector<1xf32>
    %23 = vector.shape_cast %22 : vector<1xf32> to vector<1x1x1xf32>
    %24 = vector.extract %23[0, 0, 0] : f32 from vector<1x1x1xf32>
    %25 = arith.addf %20, %24 : f32
    %c0_12 = arith.constant 0 : index
    %26 = memref.load %arg6[%c0_12] : memref<1xf32, #tpu.memory_space<smem>>
    memref.store %25, %arg6[%c0_12] : memref<1xf32, #tpu.memory_space<smem>>
    %c0_i32_13 = arith.constant 0 : i32
    %27 = arith.cmpi eq, %arg0, %c0_i32_13 : i32
    %28 = arith.extui %27 : i1 to i32
    %c0_i32_14 = arith.constant 0 : i32
    %29 = arith.cmpi ne, %28, %c0_i32_14 : i32
    scf.if %29 {
      %c0_15 = arith.constant 0 : index
      %30 = memref.load %arg5[%c0_15] : memref<1xf32, #tpu.memory_space<smem>>
      %c0_16 = arith.constant 0 : index
      %31 = memref.load %arg6[%c0_16] : memref<1xf32, #tpu.memory_space<smem>>
      %cst_17 = arith.constant 1.000000e+00 : f32
      %32 = arith.maximumf %31, %cst_17 : f32
      %33 = arith.divf %30, %32 : f32
      %c0_18 = arith.constant 0 : index
      %34 = memref.load %arg4[%c0_18] : memref<1xf32, #tpu.memory_space<smem>>
      memref.store %33, %arg4[%c0_18] : memref<1xf32, #tpu.memory_space<smem>>
    } else {
    }
    return
  }
  func.func @transform_0(%arg0: i32) -> (i32, i32) {
    %c0_i32 = arith.constant 0 : i32
    %c0_i32_0 = arith.constant 0 : i32
    return %arg0, %c0_i32 : i32, i32
  }
  func.func @transform_1(%arg0: i32) -> (i32, i32) {
    %c0_i32 = arith.constant 0 : i32
    %c0_i32_0 = arith.constant 0 : i32
    return %arg0, %c0_i32 : i32, i32
  }
  func.func @transform_2(%arg0: i32) -> (i32, i32) {
    %c0_i32 = arith.constant 0 : i32
    %c0_i32_0 = arith.constant 0 : i32
    return %arg0, %c0_i32 : i32, i32
  }
  func.func @transform_3(%arg0: i32) -> i32 {
    %c0_i32 = arith.constant 0 : i32
    %c0_i32_0 = arith.constant 0 : i32
    return %c0_i32 : i32
  }
}

</mosaic_0001>

<bundles_post_ra>
// kernel: mae_image_forward.7
= control target key start
LH: loop header
LB: loop body
LE: loop exit
PB: predicated region body
PF: predicated region fallthrough
CT: control target
= control target key end

     0   :  { %s613_s15 = smov 0   ;;  %s615_s16 = smov 0   ;;  %s696_s0 = inlined_call_operand.vmem [shape: f32[2,8,192], index: 0, kind: input, shape index: {}]   ;;  %s697_s1 = inlined_call_operand.vmem [shape: bf16[192,32], index: 1, kind: input, shape index: {}]   ;;  %s698_s2 = inlined_call_operand.vmem [shape: f32[1,32], index: 2, kind: input, shape index: {}]   ;;  %s699_s3 = inlined_call_operand.vmem [shape: f32[1,8,32], index: 3, kind: input, shape index: {}]   ;;  %s700_s4 = inlined_call_operand.vmem [shape: bf16[2,8,32], index: 4, kind: output, shape index: {}]  }
   0x1   :  { %s617_s17 = smov 0  }
   0x2 LB: > { %s26_s18 = sadd.s32 1, %s581_s16  ;;  %p505_p0 = scmp.ge.s32.totalorder %s585_s17, 1  ;;  %s585_s17 = sphi %s617_s17, %s14_s17   ;;  %s581_s16 = sphi %s615_s16, %s702_s16   ;;  %s577_s15 = sphi %s613_s15, %s701_s15  }
   0x3   : > { %p28_p1 = scmp.ge.s32.totalorder %s26_s18, 2  ;;  %p191_p2 = scmp.lt.s32.totalorder %s585_s17, 3 }
   0x5   : > { %s704_s18 = smov (%p28_p1, %s26_s18), 0  ;;  %p192_p3 = pnand %p505_p0, %p191_p2 }
   0x6   : > { %p227_p4 = scmp.lt.s32.totalorder (!%p192_p3), %s577_s15, 1 }
   0x7   : > { %195 = sbr.rel (%p192_p3) target bundleno = 261 (0x105), region = 36 }
   0xc   : > { %v551_v0 = vld [vmem:[%s697_s1 + $0x38] sm:$0xff]   ;;  %v587_v1 = vmov 0   ;;  %v552_v2 = vld [vmem:[%s697_s1 + $0x30] sm:$0xff]   ;;  %s706_s15 = smov (!%p227_p4, %s577_s15), 1  ;;  %v553_v3 = vld [vmem:[%s697_s1 + $0x28] sm:$0xff]   ;;  %vm355_vm0 = vcmask 523264  }
   0xd   : > { %359 = vmatprep.subr.bf16.mxu0 %v587_v1  ;;  %s525_s25 = sshll.u32 %s706_s15, 4  ;;  %v554_v4 = vld [vmem:[%s697_s1 + $0x20] sm:$0xff]   ;;  %v555_v7 = vld [vmem:[%s697_s1 + $0x18] sm:$0xff]   ;;  %v556_v8 = vld [vmem:[%s697_s1 + $0x10] sm:$0xff]   ;;  %s508_s30 = sshll.u32 %s706_s15, 2  ;;  %vm402_vm1 = vcmask 257024  }
   0xe   : > { %360 = vmatpush1.bf16.msra.mxu0 %v551_v0  ;;  %s646_s28 = scalar_lea.vmem %s696_s0, %s525_s25  ;;  %v557_v9 = vld [vmem:[%s697_s1 + $0x8] sm:$0xff]   ;;  %v558_v10 = vld [vmem:[%s697_s1] sm:$0xff]   ;;  %v559_v11 = vld [vmem:[%s697_s1 + $0x58] sm:$0xff]  }
   0xf   : > { %361 = vmatprep.subr.bf16.mxu0 %v587_v1  ;;  %v249_v5 = vld [vmem:[%s646_s28 + $0x8] sm:$0xff]  ;;  %v560_v12 = vld [vmem:[%s697_s1 + $0x50] sm:$0xff]   ;;  %v562_v14 = vld [vmem:[%s697_s1 + $0x40] sm:$0xff]  }
  0x10   : > { %v251_v6 = vpack.c.bf16 %v249_v5, %v249_v5  ;;  %v561_v13 = vld [vmem:[%s697_s1 + $0x48] sm:$0xff]   ;;  %v248_v15 = vld [vmem:[%s646_s28] sm:$0xff]  ;;  %s246_s28 = scalar_lea.vmem %s700_s4, %s508_s30 }
  0x11   : > { %v250_v16 = vpack.c.bf16 %v248_v15, %v248_v15  ;;  %v509_v17 = vld [vmem:[%s698_s2] ss:$0 sm:$0xff] }
  0x12   : > { %362 = vmatpush1.bf16.msra.mxu0 %v552_v2  ;;  %522 = vmatprep.mubr.msk.bf16.mxu0 %vm355_vm0, %v251_v6  ;;  %v399_v19 = vld [vmem:[%s699_s3] sm:$0xff] }
  0x13   : > { %363 = vmatprep.subr.bf16.mxu0 %v587_v1 }
  0x16   : > { %364 = vmatpush1.bf16.msra.mxu0 %v553_v3 }
  0x17   : > { %365 = vmatprep.subr.bf16.mxu0 %v587_v1 }
  0x1a   : > { %366 = vmatpush1.bf16.msra.mxu0 %v554_v4 }
  0x1b   : > { %367 = vmatprep.subr.bf16.mxu0 %v587_v1 }
  0x1e   : > { %368 = vmatpush1.bf16.msra.mxu0 %v555_v7 }
  0x1f   : > { %369 = vmatprep.subr.bf16.mxu0 %v587_v1 }
  0x22   : > { %370 = vmatpush1.bf16.msra.mxu0 %v556_v8 }
  0x23   : > { %371 = vmatprep.subr.bf16.mxu0 %v587_v1 }
  0x26   : > { %372 = vmatpush1.bf16.msra.mxu0 %v557_v9 }
  0x27   : > { %373 = vmatprep.subr.bf16.mxu0 %v587_v1 }
  0x2a   : > { %374 = vmatpush1.bf16.msra.mxu0 %v558_v10 }
  0x2b   : > { %383 = vmatprep.subr.bf16.mxu0 %v587_v1 }
  0x2e   : > { %384 = vmatpush2.bf16.msra.mxu0 %v559_v11 }
  0x2f   : > { %385 = vmatprep.subr.bf16.mxu0 %v587_v1 }
  0x32   : > { %386 = vmatpush2.bf16.msra.mxu0 %v560_v12 }
  0x33   : > { %387 = vmatprep.subr.bf16.mxu0 %v587_v1 }
  0x36   : > { %388 = vmatpush2.bf16.msra.mxu0 %v561_v13 }
  0x37   : > { %389 = vmatprep.subr.bf16.mxu0 %v587_v1 }
  0x3a   : > { %390 = vmatpush2.bf16.msra.mxu0 %v562_v14 }
  0x3d   : > { %392 = vmatmul.mubr.bf16.vlgmr.msra.gmra.mxu0 %v250_v16 }
  0xfd   : > { %v393_v18 = vpop.f32.mrf.mxu0 }
  0xfe   : > { %v394_v20 = vadd.f32 %v509_v17, %v393_v18 }
  0xff   : > { %v395_v21 = vpop.f32.mrf.mxu0 }
 0x100   : > { %v400_v22 = vadd.f32 %v399_v19, %v394_v20 }
 0x101   : > { %v396_v23 = vpop.f32.mrf.mxu0 }
 0x102   : > { %v401_v24 = vpack.c.bf16 %v400_v22, %v400_v22 }
 0x103   : > { %v397_v25 = vpop.f32.mrf.mxu0 }
 0x104   : > { %403 = vst.msk [vmem:[%s246_s28] sm:$0xf] %vm402_vm1, %v401_v24 }
 0x105 PF: > { %s14_s17 = sadd.s32 1, %s585_s17   ;;  %s701_s15 = smov %s581_s16 }
 0x106   : > { %p11_p5 = scmp.ge.s32.totalorder %s14_s17, 4   ;;  %s702_s16 = smov %s704_s18 }
 0x108   :  { %13 = sbr.rel (!%p11_p5) target bundleno = 2 (0x2), region = 69 }

// kernel: mae_image_forward.10
= control target key start
LH: loop header
LB: loop body
LE: loop exit
PB: predicated region body
PF: predicated region fallthrough
CT: control target
= control target key end

     0   :  { %s546_s18 = smov 0   ;;  %s548_s19 = smov 0   ;;  %s601_s0 = inlined_call_operand.vmem [shape: bf16[2,3,32], index: 0, kind: input, shape index: {}]   ;;  %s602_s1 = inlined_call_operand.vmem [shape: f32[1,32], index: 1, kind: input, shape index: {}]   ;;  %s603_s2 = inlined_call_operand.vmem [shape: f32[1,32], index: 2, kind: input, shape index: {}]   ;;  %s604_s3 = inlined_call_operand.vmem [shape: bf16[32,32], index: 3, kind: input, shape index: {}]   ;;  %s605_s4 = inlined_call_operand.vmem [shape: f32[1,32], index: 4, kind: input, shape index: {}]   ;;  %s606_s5 = inlined_call_operand.vmem [shape: bf16[2,3,32], index: 5, kind: output, shape index: {}]  }
   0x1   :  { %s550_s20 = smov 0  }
   0x2 LB: > { %s27_s21 = sadd.s32 1, %s508_s19  ;;  %p438_p0 = scmp.ge.s32.totalorder %s512_s20, 1  ;;  %s512_s20 = sphi %s550_s20, %s15_s20   ;;  %s508_s19 = sphi %s548_s19, %s608_s19   ;;  %s504_s18 = sphi %s546_s18, %s607_s18  }
   0x3   : > { %p29_p1 = scmp.ge.s32.totalorder %s27_s21, 2  ;;  %p205_p2 = scmp.lt.s32.totalorder %s512_s20, 3 }
   0x5   : > { %s610_s21 = smov (%p29_p1, %s27_s21), 0  ;;  %p206_p3 = pnand %p438_p0, %p205_p2 }
   0x6   : > { %p237_p4 = scmp.lt.s32.totalorder (!%p206_p3), %s504_s18, 1 }
   0x7   : > { %209 = sbr.rel (%p206_p3) target bundleno = 527 (0x20f), region = 40 }
   0xc   : > { %s612_s18 = smov (!%p237_p4, %s504_s18), 1  ;;  %vm256_vm0 = vcmask 256000   ;;  %v486_v8 = vld [vmem:[%s604_s3 + $0x8] sm:$0xff]   ;;  %v514_v9 = vmov 0.0   ;;  %vm515_vm1 = vmmov 0   ;;  %v487_v10 = vld [vmem:[%s604_s3] sm:$0xff]  }
   0xd   : > { %s439_s22 = sshll.u32 %s612_s18, 1  ;;  %452 = vmatprep.subr.bf16.mxu0 %v514_v9  ;;  %456 = vmatprep.mubr.msk.bf16.mxu0 %vm515_vm1, %v514_v9  ;;  %v441_v15 = vld [vmem:[%s602_s1] ss:$0 sm:$0xff]  ;;  %vm309_vm2 = vcmask 261120   ;;  %vm354_vm3 = vcmask 254976  }
   0xe   : > { %s243_s25 = scalar_lea.vmem %s601_s0, %s439_s22  ;;  %453 = vmatpush3.bf16.msra.mxu0 %v486_v8  ;;  %v442_v17 = vld [vmem:[%s603_s2] ss:$0 sm:$0xff]  ;;  %s250_s13 = scalar_lea.vmem %s606_s5, %s439_s22  ;;  %vm355_vm4 = vsmask.f32 1280 }
   0xf   : > { %v252_v0 = vld [vmem:[%s243_s25] sm:$0x3]  ;;  %454 = vmatprep.subr.bf16.mxu0 %v514_v9  ;;  %vm356_vm5 = vmand %vm354_vm3, %vm355_vm4 }
  0x10   : > { %v253_v1 = vunpack.c.l.bf16 %v252_v0  ;;  %v443_v21 = vld [vmem:[%s605_s4] ss:$0 sm:$0xff] }
  0x11   : > { %v357_v24 = vld [vmem:[%s250_s13] sm:$0x3] }
  0x12   : > { %v257_v2 = vsel %vm256_vm0, %v253_v1, 0.0  ;;  %455 = vmatpush3.bf16.msra.mxu0 %v487_v10 }
  0x13   : > { %258 = vadd.xlane.f32.xlu0 %v257_v2 }
  0x9c   : > { %v259_v3 = vpop.xlane.xlu0 %258 }
  0x9d   : > { %v261_v4 = vmul.f32 0.03125, %v259_v3 }
  0x9f   : > { %v262_v5 = vsub.f32 %v253_v1, %v261_v4 }
  0xa1   : > { %v263_v6 = vmul.f32 %v262_v5, %v262_v5 }
  0xa3   : > { %v264_v7 = vsel %vm256_vm0, %v263_v6, 0.0 }
  0xa4   : > { %265 = vadd.xlane.f32.xlu0 %v264_v7 }
 0x12d   : > { %v266_v11 = vpop.xlane.xlu0 %265 }
 0x12e   : > { %v267_v12 = vmul.f32 0.03125, %v266_v11 }
 0x130   : > { %v268_v13 = vadd.f32 1e-06, %v267_v12 }
 0x132   : > { %488 = vrsqrt.f32 %v268_v13 }
 0x13f   : > { %v489_v14 = vpop.eup %488 }
 0x140   : > { %v270_v16 = vmul.f32 %v489_v14, %v262_v5 }
 0x142   : > { %v277_v18 = vmul.f32 %v441_v15, %v270_v16 }
 0x144   : > { %v284_v19 = vadd.f32 %v442_v17, %v277_v18 }
 0x146   : > { %v285_v20 = vpack.c.bf16 %v284_v19, %v284_v19 }
 0x148   : > { %457 = vmatmul.mubr.msk.bf16.vlgmr.msra.gmra.mxu0 %vm309_vm2, %v285_v20 }
 0x208   : > { %v347_v22 = vpop.f32.mrf.mxu0 }
 0x209   : > { %v348_v23 = vadd.f32 %v443_v21, %v347_v22 }
 0x20a   : > { %v458_v25 = vpop.f32.mrf.mxu0 }
 0x20b   : > { %v353_v26 = vpack.c.bf16 %v348_v23, %v348_v23 }
 0x20c   : > { %v350_v27 = vpop.f32.mrf.mxu0 }
 0x20d   : > { %v358_v28 = vsel %vm356_vm5, %v353_v26, %v357_v24 }
 0x20e   : > { %359 = vst [vmem:[%s250_s13] sm:$0x3] %v358_v28  ;;  %v459_v29 = vpop.f32.mrf.mxu0 }
 0x20f PF: > { %s15_s20 = sadd.s32 1, %s512_s20   ;;  %s607_s18 = smov %s508_s19 }
 0x210   : > { %p12_p5 = scmp.ge.s32.totalorder %s15_s20, 4   ;;  %s608_s19 = smov %s610_s21 }
 0x212   :  { %14 = sbr.rel (!%p12_p5) target bundleno = 2 (0x2), region = 70 }

// kernel: mae_image_forward.8
= control target key start
LH: loop header
LB: loop body
LE: loop exit
PB: predicated region body
PF: predicated region fallthrough
CT: control target
= control target key end

     0   :  { %s1676_s25 = smov 0   ;;  %s1863_s0 = inlined_call_operand.vmem [shape: bf16[2,3,32], index: 0, kind: input, shape index: {}]   ;;  %s1864_s1 = inlined_call_operand.vmem [shape: f32[1,32], index: 1, kind: input, shape index: {}]   ;;  %s1865_s2 = inlined_call_operand.vmem [shape: f32[1,32], index: 2, kind: input, shape index: {}]   ;;  %s1866_s3 = inlined_call_operand.vmem [shape: bf16[32,96], index: 3, kind: input, shape index: {}]   ;;  %s1867_s4 = inlined_call_operand.vmem [shape: f32[1,96], index: 4, kind: input, shape index: {}]   ;;  %s1868_s5 = inlined_call_operand.vmem [shape: bf16[32,32], index: 5, kind: input, shape index: {}]   ;;  %s1869_s6 = inlined_call_operand.vmem [shape: f32[1,32], index: 6, kind: input, shape index: {}]   ;;  %s1870_s7 = inlined_call_operand.vmem [shape: f32[1,32], index: 7, kind: input, shape index: {}]   ;;  %s1871_s8 = inlined_call_operand.vmem [shape: f32[1,32], index: 8, kind: input, shape index: {}]   ;;  %s1872_s9 = inlined_call_operand.vmem [shape: bf16[32,128], index: 9, kind: input, shape index: {}]   ;;  %s1873_s10 = inlined_call_operand.vmem [shape: f32[1,128], index: 10, kind: input, shape index: {}]   ;;  %s1874_s11 = inlined_call_operand.vmem [shape: bf16[128,32], index: 11, kind: input, shape index: {}]   ;;  %s1875_s12 = inlined_call_operand.vmem [shape: f32[1,32], index: 12, kind: input, shape index: {}]   ;;  %s1876_s13 = inlined_call_operand.vmem [shape: bf16[2,3,32], index: 13, kind: output, shape index: {}]  }
   0x1 LB: > { %s1352_s26 = sadd.s32 4294967295, %s1587_s25   ;;  %p1356_p0 = scmp.ge.s32.totalorder %s1587_s25, 1  ;;  %s1587_s25 = sphi %s1676_s25, %s23_s25  }
   0x2   : > { %p386_p1 = scmp.lt.s32.totalorder %s1587_s25, 3 }
   0x4   : > { %p387_p2 = pnand %p1356_p0, %p386_p1 }
   0x5   : > { %p428_p3 = scmp.lt.s32.totalorder (!%p387_p2), %s1352_s26, 1  ;;  %s1591_s24 = smov (!%p387_p2), 120  }
   0x6   : > { %390 = sbr.rel (%p387_p2) target bundleno = 2460 (0x99c), region = 72  ;;  %s1592_s28 = smov (!%p387_p2), 96  }
   0x7   : > { %s1593_s29 = smov (!%p387_p2), 88   ;;  %s1595_s14 = smov (!%p387_p2), 112  }
   0x8   : > { %s1596_s15 = smov (!%p387_p2), 72   ;;  %s1597_s16 = smov (!%p387_p2), 104  }
   0x9   : > { %s1598_s17 = smov (!%p387_p2), 64   ;;  %s1599_s18 = smov (!%p387_p2), 56  }
   0xa   : > { %s1600_s19 = smov (!%p387_p2), 48   ;;  %s1601_s20 = smov (!%p387_p2), 40  }
   0xb   : > { %s1878_s26 = smov (!%p428_p3, %s1352_s26), 1  ;;  %vm441_vm0 = vcmask 256000   ;;  %v1545_v8 = vld [vmem:[%s1866_s3 + $0x8] sm:$0xff]   ;;  %v1589_v9 = vmov 0.0   ;;  %vm1590_vm1 = vmmov 0   ;;  %v1546_v10 = vld [vmem:[%s1866_s3] sm:$0xff]  }
   0xc   : > { %s1357_s27 = sshll.u32 %s1878_s26, 1  ;;  %1428 = vmatprep.subr.bf16.mxu0 %v1589_v9  ;;  %1432 = vmatprep.mubr.msk.bf16.mxu0 %vm1590_vm1, %v1589_v9  ;;  %v1359_v15 = vld [vmem:[%s1864_s1] ss:$0 sm:$0xff]  ;;  %vm494_vm2 = vcmask 261120   ;;  %vm542_vm3 = vcmask 64512   ;;  %vm590_vm4 = vcmask 18432  }
   0xd   : > { %s431_s30 = scalar_lea.vmem %s1863_s0, %s1357_s27  ;;  %1429 = vmatpush3.bf16.msra.mxu0 %v1545_v8  ;;  %1448 = vmatprep.subr.bf16.mxu1 %v1589_v9  ;;  %v1360_v17 = vld [vmem:[%s1865_s2] ss:$0 sm:$0xff]  ;;  %vm609_vm5 = vcmask 1040384   ;;  %vm610_vm6 = vcmask 1041408   ;;  %vm605_vm7 = vcmask 23552   ;;  %vm656_vm8 = vcmask 59392  }
   0xe   : > { %v437_v0 = vld [vmem:[%s431_s30] sm:$0x3]  ;;  %1430 = vmatprep.subr.bf16.mxu0 %v1589_v9  ;;  %1450 = vmatprep.mubr.msk.bf16.mxu1 %vm1590_vm1, %v1589_v9  ;;  %s1594_s30 = smov 80   ;;  %s1603_s21 = smov 8   ;;  %vm773_vm9 = vcmask 124992   ;;  %vm890_vm10 = vcmask 190592  }
   0xf   : > { %v1692_v1 = vunpack.c.l.bf16 %v437_v0  ;;  %v1361_v21 = vld [vmem:[%s1867_s4] ss:$0 sm:$0xff]  ;;  %vm1007_vm11 = vcmask 256192   ;;  %vm1293_vm12 = vcmask 254976   ;;  %vm1294_vm13 = vsmask.f32 1280 }
  0x10   : > { %vm1295_vm14 = vmand %vm1293_vm12, %vm1294_vm13 }
  0x11   : > { %v442_v2 = vsel %vm441_vm0, %v1692_v1, 0.0  ;;  %1431 = vmatpush3.bf16.msra.mxu0 %v1546_v10 }
  0x12   : > { %443 = vadd.xlane.f32.xlu0 %v442_v2  ;;  %1436 = vmatprep.subr.bf16.mxu0 %v1589_v9 }
  0x9b   : > { %v444_v3 = vpop.xlane.xlu0 %443 }
  0x9c   : > { %v446_v4 = vmul.f32 0.03125, %v444_v3 }
  0x9e   : > { %v447_v5 = vsub.f32 %v1692_v1, %v446_v4 }
  0xa0   : > { %v448_v6 = vmul.f32 %v447_v5, %v447_v5 }
  0xa2   : > { %v449_v7 = vsel %vm441_vm0, %v448_v6, 0.0 }
  0xa3   : > { %450 = vadd.xlane.f32.xlu0 %v449_v7 }
 0x12c   : > { %v451_v11 = vpop.xlane.xlu0 %450 }
 0x12d   : > { %v452_v12 = vmul.f32 0.03125, %v451_v11 }
 0x12f   : > { %v453_v13 = vadd.f32 1e-06, %v452_v12 }
 0x131   : > { %1559 = vrsqrt.f32 %v453_v13 }
 0x13e   : > { %v1560_v14 = vpop.eup %1559 }
 0x13f   : > { %v455_v16 = vmul.f32 %v1560_v14, %v447_v5 }
 0x141   : > { %v462_v18 = vmul.f32 %v1359_v15, %v455_v16 }
 0x143   : > { %v469_v19 = vadd.f32 %v1360_v17, %v462_v18 }
 0x145   : > { %v470_v20 = vpack.c.bf16 %v469_v19, %v469_v19 }
 0x147   : > { %1433 = vmatmul.mubr.msk.bf16.vlgmr.msra.gmra.mxu0 %vm494_vm2, %v470_v20 }
 0x148   : > { %1438 = vmatprep.mubr.msk.bf16.mxu0 %vm1590_vm1, %v1589_v9 }
 0x207   : > { %v532_v22 = vpop.f32.mrf.mxu0 }
 0x208   : > { %v533_v23 = vadd.f32 %v1361_v21, %v532_v22  ;;  %v1602_v21 = vmov 65535  }
 0x209   : > { %v1434_v24 = vpop.f32.mrf.mxu0  ;;  %v611_v22 = vsel %vm609_vm5, 4294967295, %v1602_v21 }
 0x20a   : > { %v1724_v25 = vpack.c.bf16 %v533_v23, %v533_v23  ;;  %v612_v24 = vsel %vm610_vm6, %v611_v22, 0  ;;  %v1549_v22 = vld [vmem:[%s1872_s9 + $0x8] sm:$0xff]  }
 0x20b   : > { %v535_v26 = vpop.f32.mrf.mxu0 }
 0x20c   : > { %658 = vrot.lane.b32.xlu0 %v1724_v25, %s1591_s24  ;;  %540 = vrot.lane.b32.xlu1 %v1724_v25, %s1592_s28 }
 0x20d   : > { %v1435_v27 = vpop.f32.mrf.mxu0 }
 0x210   : > { %660 = vrot.lane.b32.xlu1 %v1724_v25, %s1593_s29  ;;  %s1604_s29 = smov 16  }
 0x214   : > { %777 = vrot.lane.b32.xlu1 %v1724_v25, %s1594_s30  ;;  %s1605_s30 = smov 24  }
 0x218   : > { %775 = vrot.lane.b32.xlu1 %v1724_v25, %s1595_s14 }
 0x21c   : > { %894 = vrot.lane.b32.xlu1 %v1724_v25, %s1596_s15 }
 0x220   : > { %892 = vrot.lane.b32.xlu1 %v1724_v25, %s1597_s16 }
 0x27e   : > { %v541_v28 = vpop.permute.xlu1 %540  ;;  %v659_v33 = vpop.permute.xlu0 %658 }
 0x27f   : > { %v547_v29 = vsel %vm542_vm3, %v541_v28, 0 }
 0x280   : > { %1437 = vmatpush3.bf16.xpose.msra.mxu0 %v547_v29 }
 0x281   : > { %1442 = vmatprep.subr.bf16.mxu0 %v1589_v9 }
 0x282   : > { %v661_v30 = vpop.permute.xlu1 %660 }
 0x283   : > { %v666_v31 = vsel %vm542_vm3, %v661_v30, 0 }
 0x284   : > { %1449 = vmatpush3.bf16.xpose.msra.mxu1 %v666_v31 }
 0x285   : > { %1460 = vmatprep.subr.bf16.mxu1 %v1589_v9 }
 0x286   : > { %v778_v32 = vpop.permute.xlu1 %777 }
 0x287   : > { %1439 = vmatmul.mubr.msk.bf16.vlgmr.msra.gmra.mxu0 %vm542_vm3, %v1724_v25  ;;  %v783_v35 = vsel %vm542_vm3, %v778_v32, 0 }
 0x288   : > { %1444 = vmatprep.mubr.msk.bf16.mxu0 %vm1590_vm1, %v1589_v9 }
 0x28a   : > { %v776_v34 = vpop.permute.xlu1 %775 }
 0x28b   : > { %1451 = vmatmul.mubr.msk.bf16.vlgmr.msra.gmra.mxu1 %vm542_vm3, %v659_v33 }
 0x28c   : > { %1461 = vmatpush3.bf16.xpose.msra.mxu1 %v783_v35  ;;  %1462 = vmatprep.mubr.msk.bf16.mxu1 %vm1590_vm1, %v1589_v9 }
 0x28d   : > { %1472 = vmatprep.subr.bf16.mxu1 %v1589_v9 }
 0x28e   : > { %v895_v36 = vpop.permute.xlu1 %894 }
 0x28f   : > { %v900_v37 = vsel %vm542_vm3, %v895_v36, 0 }
 0x292   : > { %v893_v38 = vpop.permute.xlu1 %892 }
 0x293   : > { %1463 = vmatmul.mubr.msk.bf16.vlgmr.msra.gmra.mxu1 %vm542_vm3, %v776_v34 }
 0x294   : > { %1473 = vmatpush3.bf16.xpose.msra.mxu1 %v900_v37  ;;  %1474 = vmatprep.mubr.msk.bf16.mxu1 %vm1590_vm1, %v1589_v9 }
 0x295   : > { %1484 = vmatprep.subr.bf16.mxu1 %v1589_v9 }
 0x29b   : > { %1475 = vmatmul.mubr.msk.bf16.vlgmr.msra.gmra.mxu1 %vm542_vm3, %v893_v38 }
 0x29c   : > { %1488 = vmatprep.mubr.msk.bf16.mxu1 %vm1590_vm1, %v1589_v9 }
 0x347   : > { %v583_v39 = vpop.f32.mrf.mxu0 }
 0x348   : > { %v589_v40 = vmul.f32 0.35355338, %v583_v39 }
 0x349   : > { %v1440_v41 = vpop.f32.mrf.mxu0 }
 0x34a   : > { %v591_v42 = vsel %vm590_vm4, %v589_v40, -inf }
 0x34b   : > { %v702_v43 = vpop.f32.mrf.mxu1  ;;  %592 = vmax.xlane.f32.xlu1 %v591_v42  ;;  %v586_v44 = vpop.f32.mrf.mxu0 }
 0x34c   : > { %v708_v45 = vmul.f32 0.35355338, %v702_v43 }
 0x34d   : > { %v1441_v46 = vpop.f32.mrf.mxu0  ;;  %v1452_v47 = vpop.f32.mrf.mxu1 }
 0x34e   : > { %v709_v48 = vsel %vm590_vm4, %v708_v45, -inf }
 0x34f   : > { %710 = vmax.xlane.f32.xlu0 %v709_v48  ;;  %v705_v49 = vpop.f32.mrf.mxu1 }
 0x351   : > { %v1453_v50 = vpop.f32.mrf.mxu1 }
 0x353   : > { %v819_v51 = vpop.f32.mrf.mxu1 }
 0x354   : > { %v825_v52 = vmul.f32 0.35355338, %v819_v51 }
 0x355   : > { %v1464_v53 = vpop.f32.mrf.mxu1 }
 0x356   : > { %v826_v54 = vsel %vm590_vm4, %v825_v52, -inf }
 0x357   : > { %v822_v55 = vpop.f32.mrf.mxu1  ;;  %827 = vmax.xlane.f32.xlu1 %v826_v54 }
 0x359   : > { %v1465_v56 = vpop.f32.mrf.mxu1 }
 0x35a   : > { %v1547_v56 = vld [vmem:[%s1868_s5 + $0x8] sm:$0xff]  }
 0x35b   : > { %v936_v57 = vpop.f32.mrf.mxu1  ;;  %1485 = vmatpush3.bf16.msra.mxu1 %v1547_v56 }
 0x35c   : > { %v942_v58 = vmul.f32 0.35355338, %v936_v57  ;;  %v1548_v57 = vld [vmem:[%s1868_s5] sm:$0xff]   ;;  %1486 = vmatprep.subr.bf16.mxu1 %v1589_v9 }
 0x35d   : > { %v1476_v59 = vpop.f32.mrf.mxu1 }
 0x35e   : > { %v943_v60 = vsel %vm590_vm4, %v942_v58, -inf }
 0x35f   : > { %944 = vmax.xlane.f32.xlu0 %v943_v60  ;;  %v939_v61 = vpop.f32.mrf.mxu1  ;;  %1487 = vmatpush3.bf16.msra.mxu1 %v1548_v57 }
 0x360   : > { %1500 = vmatprep.subr.bf16.mxu1 %v1589_v9 }
 0x361   : > { %v1477_v62 = vpop.f32.mrf.mxu1 }
 0x3d4   : > { %v593_v63 = vpop.xlane.xlu1 %592 }
 0x3d5   : > { %v594_v0 = vsub.f32 %v589_v40, %v593_v63 }
 0x3d7   : > { %v595_v2 = vmul.f32 1.442695, %v594_v0 }
 0x3d8   : > { %v711_v3 = vpop.xlane.xlu0 %710 }
 0x3d9   : > { %1561 = vpow2.f32 %v595_v2  ;;  %v712_v4 = vsub.f32 %v708_v45, %v711_v3 }
 0x3db   : > { %v713_v5 = vmul.f32 1.442695, %v712_v4 }
 0x3dd   : > { %1563 = vpow2.f32 %v713_v5 }
 0x3e0   : > { %v828_v16 = vpop.xlane.xlu1 %827 }
 0x3e1   : > { %v829_v17 = vsub.f32 %v825_v52, %v828_v16 }
 0x3e3   : > { %v830_v18 = vmul.f32 1.442695, %v829_v17 }
 0x3e6   : > { %v1562_v6 = vpop.eup %1561 }
 0x3e7   : > { %v597_v7 = vsel %vm590_vm4, %v1562_v6, 0.0 }
 0x3e8   : > { %v945_v8 = vpop.xlane.xlu0 %944  ;;  %598 = vadd.xlane.f32.xlu1 %v597_v7 }
 0x3e9   : > { %v946_v10 = vsub.f32 %v942_v58, %v945_v8  ;;  %v1373_v8 = vld [vmem:[%s1869_s6] ss:$0 sm:$0xff] }
 0x3ea   : > { %v1564_v11 = vpop.eup %1563 }
 0x3eb   : > { %v947_v12 = vmul.f32 1.442695, %v946_v10  ;;  %v715_v13 = vsel %vm590_vm4, %v1564_v11, 0.0 }
 0x3ec   : > { %716 = vadd.xlane.f32.xlu0 %v715_v13 }
 0x3ed   : > { %1565 = vpow2.f32 %v947_v12 }
 0x3ee   : > { %1567 = vpow2.f32 %v830_v18 }
 0x3f9   : > { %603 = vrot.lane.b32.xlu1 %v1724_v25, %s1598_s17 }
 0x3fa   : > { %v1566_v14 = vpop.eup %1565 }
 0x3fb   : > { %v949_v15 = vsel %vm590_vm4, %v1566_v14, 0.0  ;;  %v1568_v19 = vpop.eup %1567 }
 0x3fc   : > { %950 = vadd.xlane.f32.xlu0 %v949_v15  ;;  %v832_v20 = vsel %vm590_vm4, %v1568_v19, 0.0 }
 0x412   : > { %721 = vrot.lane.b32.xlu0 %v1724_v25, %s1599_s18  ;;  %s435_s18 = scalar_lea.vmem %s1876_s13, %s1357_s27 }
 0x413   : > { %v1296_v57 = vld [vmem:[%s435_s18] sm:$0x3] }
 0x41d   : > { %833 = vadd.xlane.f32.xlu1 %v832_v20 }
 0x42e   : > { %838 = vrot.lane.b32.xlu1 %v1724_v25, %s1600_s19 }
 0x432   : > { %955 = vrot.lane.b32.xlu1 %v1724_v25, %s1601_s20 }
 0x471   : > { %v599_v23 = vpop.xlane.xlu1 %598 }
 0x472   : > { %1569 = vrcp.f32 %v599_v23  ;;  %v1551_v23 = vld [vmem:[%s1874_s11 + $0x38] sm:$0xff]  }
 0x475   : > { %v604_v26 = vpop.permute.xlu1 %603  ;;  %v717_v27 = vpop.xlane.xlu0 %716 }
 0x476   : > { %v614_v28 = vand.u32 %v612_v24, %v604_v26  ;;  %1571 = vrcp.f32 %v717_v27 }
 0x478   : > { %1443 = vmatpush3.bf16.msra.mxu0 %v614_v28 }
 0x479   : > { %1454 = vmatprep.subr.bf16.mxu0 %v1589_v9 }
 0x47f   : > { %v1570_v29 = vpop.eup %1569 }
 0x480   : > { %v601_v30 = vmul.f32 %v1570_v29, %v1562_v6 }
 0x482   : > { %v602_v31 = vpack.c.bf16 %v601_v30, %v601_v30  ;;  %v1377_v30 = vld [vmem:[%s1870_s7] ss:$0 sm:$0xff] }
 0x483   : > { %v1572_v32 = vpop.eup %1571 }
 0x484   : > { %1445 = vmatmul.mubr.msk.bf16.vlgmr.msra.gmra.mxu0 %vm605_vm7, %v602_v31  ;;  %v719_v34 = vmul.f32 %v1572_v32, %v1564_v11 }
 0x485   : > { %v951_v25 = vpop.xlane.xlu0 %950  ;;  %1456 = vmatprep.mubr.msk.bf16.mxu0 %vm1590_vm1, %v1589_v9 }
 0x486   : > { %v720_v36 = vpack.c.bf16 %v719_v34, %v719_v34 }
 0x489   : > { %v722_v33 = vpop.permute.xlu0 %721 }
 0x48a   : > { %v727_v35 = vand.u32 %v722_v33, %v612_v24 }
 0x48c   : > { %1455 = vmatpush3.bf16.msra.mxu0 %v727_v35  ;;  %v1553_v35 = vld [vmem:[%s1874_s11 + $0x28] sm:$0xff]  }
 0x48d   : > { %1466 = vmatprep.subr.bf16.mxu0 %v1589_v9 }
 0x48f   : > { %1457 = vmatmul.mubr.msk.bf16.vlgmr.msra.gmra.mxu0 %vm605_vm7, %v720_v36  ;;  %v1554_v36 = vld [vmem:[%s1874_s11 + $0x20] sm:$0xff]  }
 0x490   : > { %1468 = vmatprep.mubr.msk.bf16.mxu0 %vm1590_vm1, %v1589_v9 }
 0x4a6   : > { %v834_v37 = vpop.xlane.xlu1 %833 }
 0x4a7   : > { %1573 = vrcp.f32 %v834_v37  ;;  %v1555_v37 = vld [vmem:[%s1874_s11 + $0x18] sm:$0xff]  }
 0x4a8   : > { %1575 = vrcp.f32 %v951_v25  ;;  %v1378_v25 = vld [vmem:[%s1871_s8] ss:$0 sm:$0xff] }
 0x4aa   : > { %v839_v38 = vpop.permute.xlu1 %838 }
 0x4ab   : > { %v844_v39 = vand.u32 %v839_v38, %v612_v24  ;;  %v1556_v38 = vld [vmem:[%s1874_s11 + $0x10] sm:$0xff]  }
 0x4ad   : > { %1467 = vmatpush3.bf16.msra.mxu0 %v844_v39  ;;  %v1557_v39 = vld [vmem:[%s1874_s11 + $0x8] sm:$0xff]  }
 0x4ae   : > { %1478 = vmatprep.subr.bf16.mxu0 %v1589_v9  ;;  %v956_v41 = vpop.permute.xlu1 %955 }
 0x4af   : > { %v961_v45 = vand.u32 %v956_v41, %v612_v24  ;;  %v1552_v24 = vld [vmem:[%s1874_s11 + $0x30] sm:$0xff]   ;;  %v1379_v41 = vld [vmem:[%s1873_s10] ss:$0 sm:$0xff] }
 0x4b4   : > { %v1574_v40 = vpop.eup %1573 }
 0x4b5   : > { %v836_v42 = vmul.f32 %v1574_v40, %v1568_v19  ;;  %v1576_v44 = vpop.eup %1575  ;;  %v1558_v40 = vld [vmem:[%s1874_s11] sm:$0xff]  }
 0x4b6   : > { %v953_v46 = vmul.f32 %v1576_v44, %v1566_v14 }
 0x4b7   : > { %v837_v43 = vpack.c.bf16 %v836_v42, %v836_v42 }
 0x4b8   : > { %v954_v47 = vpack.c.bf16 %v953_v46, %v953_v46 }
 0x4b9   : > { %1469 = vmatmul.mubr.msk.bf16.vlgmr.msra.gmra.mxu0 %vm605_vm7, %v837_v43 }
 0x4ba   : > { %1479 = vmatpush3.bf16.msra.mxu0 %v961_v45  ;;  %1480 = vmatprep.mubr.msk.bf16.mxu0 %vm1590_vm1, %v1589_v9 }
 0x4bb   : > { %1492 = vmatprep.subr.bf16.mxu0 %v1589_v9 }
 0x4c1   : > { %1481 = vmatmul.mubr.msk.bf16.vlgmr.msra.gmra.mxu0 %vm605_vm7, %v954_v47 }
 0x4c2   : > { %1496 = vmatprep.mubr.msk.bf16.mxu0 %vm1590_vm1, %v1589_v9  ;;  %1493 = vmatpush3.bf16.msra.mxu0 %v1549_v22 }
 0x4c3   : > { %1494 = vmatprep.subr.bf16.mxu0 %v1589_v9 }
 0x544   : > { %v650_v48 = vpop.f32.mrf.mxu0 }
 0x545   : > { %657 = vst.msk [vmem:[#allocation2] sm:$0x7] %vm656_vm8, %v650_v48 }
 0x546   : > { %v1446_v49 = vpop.f32.mrf.mxu0 }
 0x548   : > { %v653_v50 = vpop.f32.mrf.mxu0 }
 0x54a   : > { %v1447_v51 = vpop.f32.mrf.mxu0 }
 0x54f   : > { %v763_v52 = vpop.f32.mrf.mxu0 }
 0x550   : > { %770 = vrot.lane.b32.xlu0 %v763_v52, %s1603_s21  ;;  %v1383_v52 = vld [vmem:[%s1875_s12] ss:$0 sm:$0xff] }
 0x551   : > { %v1458_v53 = vpop.f32.mrf.mxu0 }
 0x553   : > { %v766_v54 = vpop.f32.mrf.mxu0 }
 0x555   : > { %v1459_v55 = vpop.f32.mrf.mxu0 }
 0x579   : > { %v880_v58 = vpop.f32.mrf.mxu0 }
 0x57a   : > { %887 = vrot.lane.b32.xlu1 %v880_v58, %s1604_s29 }
 0x57b   : > { %v1470_v59 = vpop.f32.mrf.mxu0 }
 0x57d   : > { %v883_v60 = vpop.f32.mrf.mxu0 }
 0x57f   : > { %v1471_v61 = vpop.f32.mrf.mxu0 }
 0x581   : > { %v997_v62 = vpop.f32.mrf.mxu0 }
 0x582   : > { %1004 = vrot.lane.b32.xlu0 %v997_v62, %s1605_s30 }
 0x583   : > { %v1482_v63 = vpop.f32.mrf.mxu0 }
 0x585   : > { %v1000_v0 = vpop.f32.mrf.mxu0 }
 0x587   : > { %v1483_v2 = vpop.f32.mrf.mxu0 }
 0x5c2   : > { %v771_v3 = vpop.permute.xlu0 %770 }
 0x5c3   : > { %774 = vst.msk [vmem:[#allocation2] sm:$0x7] %vm773_vm9, %v771_v3 }
 0x5ec   : > { %v888_v4 = vpop.permute.xlu1 %887 }
 0x5ed   : > { %891 = vst.msk [vmem:[#allocation2] sm:$0x7] %vm890_vm10, %v888_v4 }
 0x5f4   : > { %v1005_v5 = vpop.permute.xlu0 %1004 }
 0x5f5   : > { %1008 = vst.msk [vmem:[#allocation2] sm:$0x7] %vm1007_vm11, %v1005_v5 }
 0x5fc   : > { %v1009_v6 = vld [vmem:[#allocation2] sm:$0x7] }
 0x5fd   : > { %v1010_v7 = vpack.c.bf16 %v1009_v6, %v1009_v6 }
 0x5ff   : > { %1489 = vmatmul.mubr.msk.bf16.vlgmr.msra.gmra.mxu1 %vm494_vm2, %v1010_v7 }
 0x600   : > { %1516 = vmatprep.mubr.msk.bf16.mxu1 %vm1590_vm1, %v1589_v9  ;;  %1501 = vmatpush3.bf16.msra.mxu1 %v1551_v23 }
 0x601   : > { %1502 = vmatprep.subr.bf16.mxu1 %v1589_v9 }
 0x604   : > { %1503 = vmatpush3.bf16.msra.mxu1 %v1552_v24 }
 0x605   : > { %1504 = vmatprep.subr.bf16.mxu1 %v1589_v9 }
 0x608   : > { %1505 = vmatpush3.bf16.msra.mxu1 %v1553_v35 }
 0x609   : > { %1506 = vmatprep.subr.bf16.mxu1 %v1589_v9 }
 0x60c   : > { %1507 = vmatpush3.bf16.msra.mxu1 %v1554_v36 }
 0x60d   : > { %1508 = vmatprep.subr.bf16.mxu1 %v1589_v9 }
 0x610   : > { %1509 = vmatpush3.bf16.msra.mxu1 %v1555_v37 }
 0x611   : > { %1510 = vmatprep.subr.bf16.mxu1 %v1589_v9 }
 0x614   : > { %1511 = vmatpush3.bf16.msra.mxu1 %v1556_v38 }
 0x615   : > { %1512 = vmatprep.subr.bf16.mxu1 %v1589_v9 }
 0x618   : > { %1513 = vmatpush3.bf16.msra.mxu1 %v1557_v39 }
 0x619   : > { %1514 = vmatprep.subr.bf16.mxu1 %v1589_v9 }
 0x61c   : > { %1515 = vmatpush3.bf16.msra.mxu1 %v1558_v40 }
 0x6bf   : > { %v1071_v10 = vpop.f32.mrf.mxu1 }
 0x6c0   : > { %v1072_v11 = vadd.f32 %v1373_v8, %v1071_v10 }
 0x6c1   : > { %v1490_v12 = vpop.f32.mrf.mxu1 }
 0x6c2   : > { %v1797_v13 = vadd.f32 %v1072_v11, %v1692_v1  ;;  %v1550_v1 = vld [vmem:[%s1872_s9] sm:$0xff]  }
 0x6c3   : > { %v1074_v14 = vpop.f32.mrf.mxu1  ;;  %1495 = vmatpush3.bf16.msra.mxu0 %v1550_v1 }
 0x6c4   : > { %v1080_v15 = vsel %vm441_vm0, %v1797_v13, 0.0 }
 0x6c5   : > { %1081 = vadd.xlane.f32.xlu1 %v1080_v15  ;;  %v1491_v16 = vpop.f32.mrf.mxu1 }
 0x74e   : > { %v1082_v17 = vpop.xlane.xlu1 %1081 }
 0x74f   : > { %v1083_v18 = vmul.f32 0.03125, %v1082_v17 }
 0x751   : > { %v1084_v19 = vsub.f32 %v1797_v13, %v1083_v18 }
 0x753   : > { %v1085_v20 = vmul.f32 %v1084_v19, %v1084_v19 }
 0x755   : > { %v1086_v21 = vsel %vm441_vm0, %v1085_v20, 0.0 }
 0x756   : > { %1087 = vadd.xlane.f32.xlu0 %v1086_v21 }
 0x7df   : > { %v1088_v26 = vpop.xlane.xlu0 %1087 }
 0x7e0   : > { %v1089_v27 = vmul.f32 0.03125, %v1088_v26 }
 0x7e2   : > { %v1090_v28 = vadd.f32 1e-06, %v1089_v27 }
 0x7e4   : > { %1577 = vrsqrt.f32 %v1090_v28 }
 0x7f1   : > { %v1578_v29 = vpop.eup %1577 }
 0x7f2   : > { %v1092_v31 = vmul.f32 %v1578_v29, %v1084_v19 }
 0x7f4   : > { %v1099_v32 = vmul.f32 %v1377_v30, %v1092_v31 }
 0x7f6   : > { %v1106_v33 = vadd.f32 %v1378_v25, %v1099_v32 }
 0x7f8   : > { %v1107_v34 = vpack.c.bf16 %v1106_v33, %v1106_v33 }
 0x7fa   : > { %1497 = vmatmul.mubr.msk.bf16.vlgmr.msra.gmra.mxu0 %vm494_vm2, %v1107_v34 }
 0x8ba   : > { %v1168_v42 = vpop.f32.mrf.mxu0 }
 0x8bb   : > { %v1169_v43 = vadd.f32 %v1379_v41, %v1168_v42 }
 0x8bc   : > { %v1498_v44 = vpop.f32.mrf.mxu0 }
 0x8bd   : > { %v1175_v45 = vmul.f32 0.70710677, %v1169_v43  ;;  %v1174_v49 = vmul.f32 0.5, %v1169_v43 }
 0x8be   : > { %v1171_v46 = vpop.f32.mrf.mxu0 }
 0x8bf   : > { %1579 = verf.f32 %v1175_v45 }
 0x8c0   : > { %v1499_v47 = vpop.f32.mrf.mxu0 }
 0x8cc   : > { %v1580_v48 = vpop.eup %1579 }
 0x8cd   : > { %v1177_v9 = vadd.f32 1.0, %v1580_v48 }
 0x8cf   : > { %v1178_v50 = vmul.f32 %v1177_v9, %v1174_v49 }
 0x8d1   : > { %v1179_v51 = vpack.c.bf16 %v1178_v50, %v1178_v50 }
 0x8d3   : > { %1517 = vmatmul.mubr.bf16.vlgmr.msra.gmra.mxu1 %v1179_v51 }
 0x993   : > { %v1285_v53 = vpop.f32.mrf.mxu1 }
 0x994   : > { %v1286_v54 = vadd.f32 %v1383_v52, %v1285_v53 }
 0x995   : > { %v1518_v55 = vpop.f32.mrf.mxu1 }
 0x996   : > { %v1291_v56 = vadd.f32 %v1286_v54, %v1797_v13 }
 0x997   : > { %v1288_v58 = vpop.f32.mrf.mxu1 }
 0x998   : > { %v1292_v59 = vpack.c.bf16 %v1291_v56, %v1291_v56 }
 0x999   : > { %v1519_v60 = vpop.f32.mrf.mxu1 }
 0x99a   : > { %v1297_v61 = vsel %vm1295_vm14, %v1292_v59, %v1296_v57 }
 0x99b   : > { %1298 = vst [vmem:[%s435_s18] sm:$0x3] %v1297_v61 }
 0x99c PF: > { %s23_s25 = sadd.s32 1, %s1587_s25  }
 0x99d   : > { %p20_p4 = scmp.ge.s32.totalorder %s23_s25, 4  }
 0x99f   :  { %22 = sbr.rel (!%p20_p4) target bundleno = 1 (0x1), region = 102 }

// kernel: mae_image_forward.12
= control target key start
LH: loop header
LB: loop body
LE: loop exit
PB: predicated region body
PF: predicated region fallthrough
CT: control target
= control target key end

     0   :  { %s610_s18 = smov 0   ;;  %s612_s19 = smov 0   ;;  %s671_s0 = inlined_call_operand.vmem [shape: bf16[2,9,32], index: 0, kind: input, shape index: {}]   ;;  %s672_s1 = inlined_call_operand.vmem [shape: f32[1,32], index: 1, kind: input, shape index: {}]   ;;  %s673_s2 = inlined_call_operand.vmem [shape: f32[1,32], index: 2, kind: input, shape index: {}]   ;;  %s674_s3 = inlined_call_operand.vmem [shape: bf16[32,192], index: 3, kind: input, shape index: {}]   ;;  %s675_s4 = inlined_call_operand.vmem [shape: f32[1,192], index: 4, kind: input, shape index: {}]   ;;  %s676_s5 = inlined_call_operand.vmem [shape: f32[2,9,192], index: 5, kind: output, shape index: {}]  }
   0x1   :  { %s614_s20 = smov 0  }
   0x2 LB: > { %s27_s21 = sadd.s32 1, %s573_s19  ;;  %p504_p0 = scmp.ge.s32.totalorder %s577_s20, 1  ;;  %s577_s20 = sphi %s614_s20, %s15_s20   ;;  %s573_s19 = sphi %s612_s19, %s678_s19   ;;  %s569_s18 = sphi %s610_s18, %s677_s18  }
   0x3   : > { %p29_p1 = scmp.ge.s32.totalorder %s27_s21, 2  ;;  %p208_p2 = scmp.lt.s32.totalorder %s577_s20, 3 }
   0x5   : > { %s680_s21 = smov (%p29_p1, %s27_s21), 0  ;;  %p209_p3 = pnand %p504_p0, %p208_p2 }
   0x6   : > { %p246_p4 = scmp.lt.s32.totalorder (!%p209_p3), %s569_s18, 1 }
   0x7   : > { %212 = sbr.rel (%p209_p3) target bundleno = 534 (0x216), region = 40 }
   0xc   : > { %s682_s18 = smov (!%p246_p4, %s569_s18), 1  ;;  %vm273_vm0 = vcmask 261120   ;;  %vm277_vm1 = vcmask 253952   ;;  %v545_v16 = vld [vmem:[%s674_s3 + $0x14] ss:$8 sps:$4 sm:$0xff]   ;;  %v579_v19 = vmov 0   ;;  %v325_v38 = vlaneseq }
   0xd   : > { %s518_s22 = sshll.u32 %s682_s18, 3  ;;  %v547_v17 = vld [vmem:[%s674_s3 + $0x10] ss:$8 sps:$4 sm:$0xff]   ;;  %v548_v18 = vld [vmem:[%s674_s3 + $0x4] ss:$8 sps:$4 sm:$0xff]   ;;  %370 = vmatprep.subr.bf16.mxu0 %v545_v16  ;;  %390 = vmatprep.mubr.bf16.mxu0 %v579_v19  ;;  %s519_s15 = sshll.u32 %s682_s18, 5 }
   0xe   : > { %s253_s25 = scalar_lea.vmem %s671_s0, %s518_s22  ;;  %371 = vmatpush1.bf16.msra.mxu0 %v547_v17  ;;  %v550_v20 = vld [vmem:[%s674_s3] ss:$8 sps:$4 sm:$0xff]   ;;  %v326_v39 = vshrl.u32 %v325_v38, 7  ;;  %s264_s22 = scalar_lea.vmem %s676_s5, %s519_s15  ;;  %vm402_vm2 = vcmask 523264   ;;  %vm405_vm3 = vcmask 516096  }
   0xf   : > { %v267_v0 = vld [vmem:[%s253_s25] sm:$0xf]  ;;  %v268_v1 = vld [vmem:[%s253_s25 + $0x4] sm:$0x1]  ;;  %372 = vmatprep.subr.bf16.mxu0 %v548_v18 }
  0x10   : > { %v269_v2 = vunpack.c.l.bf16 %v267_v0  ;;  %v270_v3 = vunpack.c.l.bf16 %v268_v1  ;;  %v509_v29 = vld [vmem:[%s672_s1] ss:$0 sm:$0xff]  ;;  %v327_v40 = vsub.s32 0, %v326_v39  ;;  %v331_v42 = vsub.s32 1, %v326_v39 }
  0x11   : > { %v510_v33 = vld [vmem:[%s673_s2] ss:$0 sm:$0xff] }
  0x12   : > { %v274_v4 = vsel %vm273_vm0, %v269_v2, 0.0  ;;  %v278_v5 = vsel %vm277_vm1, %v270_v3, 0.0  ;;  %373 = vmatpush1.bf16.msra.mxu0 %v550_v20  ;;  %v323_v41 = vld [vmem:[%s675_s4] sm:$0x3] }
  0x13   : > { %275 = vadd.xlane.f32.xlu0 %v274_v4  ;;  %v328_v43 = vrot.slane %v323_v41, %v327_v40  ;;  %v332_v44 = vrot.slane %v323_v41, %v331_v42 }
  0x17   : > { %279 = vadd.xlane.f32.xlu0 %v278_v5 }
  0x9c   : > { %v276_v6 = vpop.xlane.xlu0 %275 }
  0x9d   : > { %v282_v7 = vmul.f32 0.03125, %v276_v6 }
  0x9f   : > { %v284_v8 = vsub.f32 %v269_v2, %v282_v7 }
  0xa0   : > { %v280_v9 = vpop.xlane.xlu0 %279 }
  0xa1   : > { %v283_v10 = vmul.f32 0.03125, %v280_v9  ;;  %v286_v11 = vmul.f32 %v284_v8, %v284_v8 }
  0xa3   : > { %v285_v12 = vsub.f32 %v270_v3, %v283_v10  ;;  %v288_v13 = vsel %vm273_vm0, %v286_v11, 0.0 }
  0xa4   : > { %289 = vadd.xlane.f32.xlu1 %v288_v13 }
  0xa5   : > { %v287_v14 = vmul.f32 %v285_v12, %v285_v12 }
  0xa7   : > { %v291_v15 = vsel %vm277_vm1, %v287_v14, 0.0 }
  0xa8   : > { %292 = vadd.xlane.f32.xlu1 %v291_v15 }
 0x12d   : > { %v290_v21 = vpop.xlane.xlu1 %289 }
 0x12e   : > { %v294_v22 = vmul.f32 0.03125, %v290_v21 }
 0x130   : > { %v296_v23 = vadd.f32 1e-06, %v294_v22 }
 0x131   : > { %v293_v24 = vpop.xlane.xlu1 %292 }
 0x132   : > { %551 = vrsqrt.f32 %v296_v23  ;;  %v295_v25 = vmul.f32 0.03125, %v293_v24 }
 0x134   : > { %v297_v26 = vadd.f32 1e-06, %v295_v25 }
 0x136   : > { %553 = vrsqrt.f32 %v297_v26 }
 0x13f   : > { %v552_v27 = vpop.eup %551 }
 0x140   : > { %v300_v28 = vmul.f32 %v552_v27, %v284_v8 }
 0x142   : > { %v308_v32 = vmul.f32 %v509_v29, %v300_v28 }
 0x143   : > { %v554_v30 = vpop.eup %553 }
 0x144   : > { %v301_v31 = vmul.f32 %v554_v30, %v285_v12  ;;  %v316_v35 = vadd.f32 %v510_v33, %v308_v32 }
 0x146   : > { %v309_v34 = vmul.f32 %v509_v29, %v301_v31 }
 0x148   : > { %v317_v36 = vadd.f32 %v510_v33, %v309_v34 }
 0x14a   : > { %v318_v37 = vpack.c.bf16 %v317_v36, %v316_v35 }
 0x14c   : > { %515 = vmatmul.mubr.msk.bf16.vlgmr.msra.gmra.mxu0 %vm273_vm0, %v318_v37 }
 0x20c   : > { %v392_v45 = vpop.f32.mrf.mxu0 }
 0x20d   : > { %v393_v46 = vadd.f32 %v392_v45, %v328_v43 }
 0x20e   : > { %v394_v47 = vpop.f32.mrf.mxu0 }
 0x20f   : > { %401 = vst [vmem:[%s264_s22] sm:$0xff] %v393_v46  ;;  %v395_v48 = vadd.f32 %v394_v47, %v332_v44 }
 0x210   : > { %v396_v49 = vpop.f32.mrf.mxu0 }
 0x211   : > { %403 = vst.msk [vmem:[%s264_s22 + $0x8] sm:$0xff] %vm402_vm2, %v395_v48  ;;  %v397_v50 = vadd.f32 %v396_v49, %v328_v43 }
 0x212   : > { %v398_v51 = vpop.f32.mrf.mxu0 }
 0x213   : > { %404 = vst [vmem:[%s264_s22 + $0x10] sm:$0x1] %v397_v50  ;;  %v399_v52 = vadd.f32 %v398_v51, %v332_v44 }
 0x215   : > { %406 = vst.msk [vmem:[%s264_s22 + $0x18] sm:$0x1] %vm405_vm3, %v399_v52 }
 0x216 PF: > { %s15_s20 = sadd.s32 1, %s577_s20   ;;  %s677_s18 = smov %s573_s19 }
 0x217   : > { %p12_p5 = scmp.ge.s32.totalorder %s15_s20, 4   ;;  %s678_s19 = smov %s680_s21 }
 0x219   :  { %14 = sbr.rel (!%p12_p5) target bundleno = 2 (0x2), region = 70 }

// kernel: mae_image_forward.11
= control target key start
LH: loop header
LB: loop body
LE: loop exit
PB: predicated region body
PF: predicated region fallthrough
CT: control target
= control target key end

     0   :  { %s1841_s25 = smov 0   ;;  %s2066_s0 = inlined_call_operand.vmem [shape: bf16[2,9,32], index: 0, kind: input, shape index: {}]   ;;  %s2067_s1 = inlined_call_operand.vmem [shape: f32[1,32], index: 1, kind: input, shape index: {}]   ;;  %s2068_s2 = inlined_call_operand.vmem [shape: f32[1,32], index: 2, kind: input, shape index: {}]   ;;  %s2069_s3 = inlined_call_operand.vmem [shape: bf16[32,96], index: 3, kind: input, shape index: {}]   ;;  %s2070_s4 = inlined_call_operand.vmem [shape: f32[1,96], index: 4, kind: input, shape index: {}]   ;;  %s2071_s5 = inlined_call_operand.vmem [shape: bf16[32,32], index: 5, kind: input, shape index: {}]   ;;  %s2072_s6 = inlined_call_operand.vmem [shape: f32[1,32], index: 6, kind: input, shape index: {}]   ;;  %s2073_s7 = inlined_call_operand.vmem [shape: f32[1,32], index: 7, kind: input, shape index: {}]   ;;  %s2074_s8 = inlined_call_operand.vmem [shape: f32[1,32], index: 8, kind: input, shape index: {}]   ;;  %s2075_s9 = inlined_call_operand.vmem [shape: bf16[32,128], index: 9, kind: input, shape index: {}]   ;;  %s2076_s10 = inlined_call_operand.vmem [shape: f32[1,128], index: 10, kind: input, shape index: {}]   ;;  %s2077_s11 = inlined_call_operand.vmem [shape: bf16[128,32], index: 11, kind: input, shape index: {}]   ;;  %s2078_s12 = inlined_call_operand.vmem [shape: f32[1,32], index: 12, kind: input, shape index: {}]   ;;  %s2079_s13 = inlined_call_operand.vmem [shape: bf16[2,9,32], index: 13, kind: output, shape index: {}]  }
   0x1 LB: > { %s1487_s26 = sadd.s32 4294967295, %s1752_s25   ;;  %p1491_p0 = scmp.ge.s32.totalorder %s1752_s25, 1  ;;  %s1752_s25 = sphi %s1841_s25, %s23_s25  }
   0x2   : > { %p387_p1 = scmp.lt.s32.totalorder %s1752_s25, 3 }
   0x4   : > { %p388_p2 = pnand %p1491_p0, %p387_p1 }
   0x5   : > { %p431_p3 = scmp.lt.s32.totalorder (!%p388_p2), %s1487_s26, 1  ;;  %s1756_s24 = smov (!%p388_p2), 88  }
   0x6   : > { %391 = sbr.rel (%p388_p2) target bundleno = 2451 (0x993), region = 72  ;;  %s1757_s28 = smov (!%p388_p2), 96  }
   0x7   : > { %s1758_s29 = smov (!%p388_p2), 120   ;;  %s1760_s14 = smov (!%p388_p2), 80  }
   0x8   : > { %s1761_s15 = smov (!%p388_p2), 104   ;;  %s1762_s16 = smov (!%p388_p2), 72  }
   0x9   : > { %s1763_s17 = smov (!%p388_p2), 64   ;;  %s1765_s18 = smov (!%p388_p2), 48  }
   0xa   : > { %s1766_s19 = smov (!%p388_p2), 40   ;;  %s1767_s20 = smov (!%p388_p2), 56  }
   0xb   : > { %s2081_s26 = smov (!%p431_p3, %s1487_s26), 1  ;;  %vm448_vm0 = vcmask 261120   ;;  %vm452_vm1 = vcmask 253952   ;;  %v1688_v16 = vld [vmem:[%s2069_s3 + $0x8] sm:$0xff]   ;;  %v1754_v17 = vmov 0.0   ;;  %vm1755_vm2 = vmmov 0  }
   0xc   : > { %s1533_s27 = sshll.u32 %s2081_s26, 3  ;;  %1571 = vmatprep.subr.bf16.mxu0 %v1754_v17  ;;  %1575 = vmatprep.mubr.msk.bf16.mxu0 %vm1755_vm2, %v1754_v17  ;;  %v1689_v18 = vld [vmem:[%s2069_s3] sm:$0xff]   ;;  %vm565_vm3 = vcmask 64512   ;;  %vm615_vm4 = vcmask 72704   ;;  %vm619_vm5 = vcmask 65536   ;;  %vm645_vm6 = vcmask 1043456  }
   0xd   : > { %s435_s30 = scalar_lea.vmem %s2066_s0, %s1533_s27  ;;  %1572 = vmatpush3.bf16.msra.mxu0 %v1688_v16  ;;  %1591 = vmatprep.subr.bf16.mxu1 %v1754_v17  ;;  %v1496_v27 = vld [vmem:[%s2067_s1] ss:$0 sm:$0xff]  ;;  %vm646_vm7 = vcmask 1044480   ;;  %vm694_vm8 = vcmask 57344   ;;  %s1768_s21 = smov 8   ;;  %vm829_vm9 = vcmask 130112  }
   0xe   : > { %v442_v0 = vld [vmem:[%s435_s30] sm:$0xf]  ;;  %v443_v1 = vld [vmem:[%s435_s30 + $0x4] sm:$0x1]  ;;  %1573 = vmatprep.subr.bf16.mxu0 %v1754_v17  ;;  %1593 = vmatprep.mubr.msk.bf16.mxu1 %vm1755_vm2, %v1754_v17  ;;  %s1759_s30 = smov 112   ;;  %vm831_vm10 = vcmask 122944  }
   0xf   : > { %v1857_v2 = vunpack.c.l.bf16 %v442_v0  ;;  %v1859_v3 = vunpack.c.l.bf16 %v443_v1  ;;  %v1497_v31 = vld [vmem:[%s2068_s2] ss:$0 sm:$0xff]  ;;  %vm966_vm11 = vcmask 195712   ;;  %vm968_vm12 = vcmask 188544  }
  0x10   : > { %v1498_v37 = vld [vmem:[%s2070_s4] ss:$0 sm:$0xff]  ;;  %vm1103_vm13 = vcmask 261312   ;;  %vm1105_vm14 = vcmask 254144   ;;  %vm1424_vm15 = vcmask 257024  }
  0x11   : > { %v449_v4 = vsel %vm448_vm0, %v1857_v2, 0.0  ;;  %v453_v5 = vsel %vm452_vm1, %v1859_v3, 0.0  ;;  %1574 = vmatpush3.bf16.msra.mxu0 %v1689_v18 }
  0x12   : > { %450 = vadd.xlane.f32.xlu0 %v449_v4  ;;  %1579 = vmatprep.subr.bf16.mxu0 %v1754_v17 }
  0x16   : > { %454 = vadd.xlane.f32.xlu0 %v453_v5 }
  0x9b   : > { %v451_v6 = vpop.xlane.xlu0 %450 }
  0x9c   : > { %v457_v7 = vmul.f32 0.03125, %v451_v6 }
  0x9e   : > { %v459_v8 = vsub.f32 %v1857_v2, %v457_v7 }
  0x9f   : > { %v455_v9 = vpop.xlane.xlu0 %454 }
  0xa0   : > { %v458_v10 = vmul.f32 0.03125, %v455_v9  ;;  %v461_v11 = vmul.f32 %v459_v8, %v459_v8 }
  0xa2   : > { %v460_v12 = vsub.f32 %v1859_v3, %v458_v10  ;;  %v463_v13 = vsel %vm448_vm0, %v461_v11, 0.0 }
  0xa3   : > { %464 = vadd.xlane.f32.xlu1 %v463_v13 }
  0xa4   : > { %v462_v14 = vmul.f32 %v460_v12, %v460_v12 }
  0xa6   : > { %v466_v15 = vsel %vm452_vm1, %v462_v14, 0.0 }
  0xa7   : > { %467 = vadd.xlane.f32.xlu1 %v466_v15 }
 0x12c   : > { %v465_v19 = vpop.xlane.xlu1 %464 }
 0x12d   : > { %v469_v20 = vmul.f32 0.03125, %v465_v19 }
 0x12f   : > { %v471_v21 = vadd.f32 1e-06, %v469_v20 }
 0x130   : > { %v468_v22 = vpop.xlane.xlu1 %467 }
 0x131   : > { %1702 = vrsqrt.f32 %v471_v21  ;;  %v470_v23 = vmul.f32 0.03125, %v468_v22 }
 0x133   : > { %v472_v24 = vadd.f32 1e-06, %v470_v23 }
 0x135   : > { %1704 = vrsqrt.f32 %v472_v24 }
 0x13e   : > { %v1703_v25 = vpop.eup %1702 }
 0x13f   : > { %v475_v26 = vmul.f32 %v1703_v25, %v459_v8 }
 0x141   : > { %v483_v30 = vmul.f32 %v1496_v27, %v475_v26 }
 0x142   : > { %v1705_v28 = vpop.eup %1704 }
 0x143   : > { %v476_v29 = vmul.f32 %v1705_v28, %v460_v12  ;;  %v491_v33 = vadd.f32 %v1497_v31, %v483_v30 }
 0x145   : > { %v484_v32 = vmul.f32 %v1496_v27, %v476_v29 }
 0x147   : > { %v492_v34 = vadd.f32 %v1497_v31, %v484_v32 }
 0x149   : > { %v493_v35 = vpack.c.bf16 %v492_v34, %v491_v33 }
 0x14b   : > { %1576 = vmatmul.mubr.msk.bf16.vlgmr.msra.gmra.mxu0 %vm448_vm0, %v493_v35 }
 0x14c   : > { %1581 = vmatprep.mubr.msk.bf16.mxu0 %vm1755_vm2, %v1754_v17 }
 0x20b   : > { %v554_v36 = vpop.f32.mrf.mxu0 }
 0x20c   : > { %v555_v40 = vadd.f32 %v1498_v37, %v554_v36 }
 0x20d   : > { %v1577_v38 = vpop.f32.mrf.mxu0 }
 0x20f   : > { %v557_v39 = vpop.f32.mrf.mxu0 }
 0x210   : > { %v558_v41 = vadd.f32 %v1498_v37, %v557_v39 }
 0x211   : > { %v1578_v42 = vpop.f32.mrf.mxu0 }
 0x212   : > { %v1895_v43 = vpack.c.bf16 %v558_v41, %v555_v40  ;;  %v1764_v41 = vmov 65535  }
 0x213   : > { %v647_v42 = vsel %vm645_vm6, 4294967295, %v1764_v41 }
 0x214   : > { %698 = vrot.lane.b32.xlu1 %v1895_v43, %s1756_s24  ;;  %563 = vrot.lane.b32.xlu0 %v1895_v43, %s1757_s28  ;;  %s1769_s24 = smov 16  }
 0x218   : > { %696 = vrot.lane.b32.xlu1 %v1895_v43, %s1758_s29  ;;  %833 = vrot.lane.b32.xlu0 %v1895_v43, %s1759_s30  ;;  %s1770_s30 = smov 24  }
 0x21c   : > { %835 = vrot.lane.b32.xlu1 %v1895_v43, %s1760_s14  ;;  %970 = vrot.lane.b32.xlu0 %v1895_v43, %s1761_s15 }
 0x220   : > { %972 = vrot.lane.b32.xlu1 %v1895_v43, %s1762_s16 }
 0x286   : > { %v699_v44 = vpop.permute.xlu1 %698  ;;  %v564_v45 = vpop.permute.xlu0 %563 }
 0x287   : > { %v570_v46 = vsel %vm565_vm3, %v564_v45, 0  ;;  %v704_v47 = vsel %vm565_vm3, %v699_v44, 0 }
 0x288   : > { %1580 = vmatpush3.bf16.xpose.msra.mxu0 %v570_v46  ;;  %1592 = vmatpush3.bf16.xpose.msra.mxu1 %v704_v47 }
 0x289   : > { %1603 = vmatprep.subr.bf16.mxu1 %v1754_v17  ;;  %1585 = vmatprep.subr.bf16.mxu0 %v1754_v17 }
 0x28a   : > { %v697_v48 = vpop.permute.xlu1 %696  ;;  %v834_v52 = vpop.permute.xlu0 %833 }
 0x28e   : > { %v836_v49 = vpop.permute.xlu1 %835  ;;  %v971_v54 = vpop.permute.xlu0 %970 }
 0x28f   : > { %v841_v50 = vsel %vm565_vm3, %v836_v49, 0  ;;  %1582 = vmatmul.mubr.msk.bf16.vlgmr.msra.gmra.mxu0 %vm565_vm3, %v1895_v43  ;;  %1594 = vmatmul.mubr.msk.bf16.vlgmr.msra.gmra.mxu1 %vm565_vm3, %v697_v48  ;;  %v1934_v49 = vsel %vm646_vm7, %v647_v42, 0 }
 0x290   : > { %1604 = vmatpush3.bf16.xpose.msra.mxu1 %v841_v50  ;;  %1605 = vmatprep.mubr.msk.bf16.mxu1 %vm1755_vm2, %v1754_v17 }
 0x291   : > { %1615 = vmatprep.subr.bf16.mxu1 %v1754_v17  ;;  %1587 = vmatprep.mubr.msk.bf16.mxu0 %vm1755_vm2, %v1754_v17 }
 0x292   : > { %v973_v51 = vpop.permute.xlu1 %972 }
 0x293   : > { %v978_v53 = vsel %vm565_vm3, %v973_v51, 0 }
 0x297   : > { %1606 = vmatmul.mubr.msk.bf16.vlgmr.msra.gmra.mxu1 %vm565_vm3, %v834_v52 }
 0x298   : > { %1616 = vmatpush3.bf16.xpose.msra.mxu1 %v978_v53  ;;  %1617 = vmatprep.mubr.msk.bf16.mxu1 %vm1755_vm2, %v1754_v17 }
 0x299   : > { %1627 = vmatprep.subr.bf16.mxu1 %v1754_v17 }
 0x29f   : > { %1618 = vmatmul.mubr.msk.bf16.vlgmr.msra.gmra.mxu1 %vm565_vm3, %v971_v54 }
 0x2a0   : > { %1631 = vmatprep.mubr.msk.bf16.mxu1 %vm1755_vm2, %v1754_v17 }
 0x34f   : > { %v606_v55 = vpop.f32.mrf.mxu0  ;;  %v740_v56 = vpop.f32.mrf.mxu1 }
 0x350   : > { %v613_v57 = vmul.f32 0.35355338, %v606_v55  ;;  %v747_v4 = vmul.f32 0.35355338, %v740_v56 }
 0x351   : > { %v1583_v58 = vpop.f32.mrf.mxu0  ;;  %v1595_v59 = vpop.f32.mrf.mxu1 }
 0x352   : > { %v616_v60 = vsel %vm615_vm4, %v613_v57, -inf  ;;  %v749_v11 = vsel %vm615_vm4, %v747_v4, -inf }
 0x353   : > { %v743_v61 = vpop.f32.mrf.mxu1  ;;  %617 = vmax.xlane.f32.xlu1 %v616_v60  ;;  %v609_v62 = vpop.f32.mrf.mxu0 }
 0x354   : > { %v614_v63 = vmul.f32 0.35355338, %v609_v62  ;;  %v748_v9 = vmul.f32 0.35355338, %v743_v61 }
 0x355   : > { %v1584_v0 = vpop.f32.mrf.mxu0  ;;  %v1596_v1 = vpop.f32.mrf.mxu1 }
 0x356   : > { %v620_v5 = vsel %vm619_vm5, %v614_v63, -inf  ;;  %v752_v15 = vsel %vm619_vm5, %v748_v9, -inf }
 0x357   : > { %v877_v6 = vpop.f32.mrf.mxu1  ;;  %621 = vmax.xlane.f32.xlu0 %v620_v5 }
 0x358   : > { %v884_v7 = vmul.f32 0.35355338, %v877_v6 }
 0x359   : > { %v1607_v8 = vpop.f32.mrf.mxu1 }
 0x35a   : > { %v886_v10 = vsel %vm615_vm4, %v884_v7, -inf }
 0x35b   : > { %v880_v12 = vpop.f32.mrf.mxu1  ;;  %887 = vmax.xlane.f32.xlu1 %v886_v10  ;;  %750 = vmax.xlane.f32.xlu0 %v749_v11 }
 0x35c   : > { %v885_v14 = vmul.f32 0.35355338, %v880_v12 }
 0x35d   : > { %v1608_v13 = vpop.f32.mrf.mxu1 }
 0x35e   : > { %v889_v21 = vsel %vm619_vm5, %v885_v14, -inf }
 0x35f   : > { %v1014_v16 = vpop.f32.mrf.mxu1  ;;  %753 = vmax.xlane.f32.xlu0 %v752_v15 }
 0x360   : > { %v1021_v18 = vmul.f32 0.35355338, %v1014_v16 }
 0x361   : > { %v1619_v19 = vpop.f32.mrf.mxu1 }
 0x362   : > { %v1023_v20 = vsel %vm615_vm4, %v1021_v18, -inf }
 0x363   : > { %v1017_v22 = vpop.f32.mrf.mxu1  ;;  %1024 = vmax.xlane.f32.xlu1 %v1023_v20  ;;  %890 = vmax.xlane.f32.xlu0 %v889_v21 }
 0x364   : > { %v1022_v23 = vmul.f32 0.35355338, %v1017_v22 }
 0x365   : > { %v1620_v24 = vpop.f32.mrf.mxu1 }
 0x366   : > { %v1026_v25 = vsel %vm619_vm5, %v1022_v23, -inf }
 0x367   : > { %1027 = vmax.xlane.f32.xlu0 %v1026_v25 }
 0x374   : > { %640 = vrot.lane.b32.xlu1 %v1895_v43, %s1763_s17 }
 0x3dc   : > { %v618_v26 = vpop.xlane.xlu1 %617 }
 0x3dd   : > { %v623_v27 = vsub.f32 %v613_v57, %v618_v26 }
 0x3df   : > { %v625_v28 = vmul.f32 1.442695, %v623_v27 }
 0x3e0   : > { %v622_v29 = vpop.xlane.xlu0 %621 }
 0x3e1   : > { %1706 = vpow2.f32 %v625_v28  ;;  %v624_v30 = vsub.f32 %v614_v63, %v622_v29 }
 0x3e3   : > { %v627_v31 = vmul.f32 1.442695, %v624_v30 }
 0x3e4   : > { %v888_v32 = vpop.xlane.xlu1 %887  ;;  %v751_v33 = vpop.xlane.xlu0 %750 }
 0x3e5   : > { %1708 = vpow2.f32 %v627_v31  ;;  %v892_v34 = vsub.f32 %v884_v7, %v888_v32  ;;  %v755_v35 = vsub.f32 %v747_v4, %v751_v33 }
 0x3e7   : > { %v757_v36 = vmul.f32 1.442695, %v755_v35  ;;  %v894_v37 = vmul.f32 1.442695, %v892_v34 }
 0x3e8   : > { %v754_v38 = vpop.xlane.xlu0 %753 }
 0x3e9   : > { %v756_v39 = vsub.f32 %v748_v9, %v754_v38  ;;  %1710 = vpow2.f32 %v757_v36 }
 0x3ea   : > { %1712 = vpow2.f32 %v894_v37 }
 0x3eb   : > { %v759_v40 = vmul.f32 1.442695, %v756_v39 }
 0x3ec   : > { %v1025_v44 = vpop.xlane.xlu1 %1024  ;;  %v891_v45 = vpop.xlane.xlu0 %890 }
 0x3ed   : > { %1714 = vpow2.f32 %v759_v40  ;;  %v1029_v46 = vsub.f32 %v1021_v18, %v1025_v44  ;;  %v893_v47 = vsub.f32 %v885_v14, %v891_v45 }
 0x3ee   : > { %v1707_v48 = vpop.eup %1706 }
 0x3ef   : > { %v1031_v50 = vmul.f32 1.442695, %v1029_v46  ;;  %v896_v51 = vmul.f32 1.442695, %v893_v47  ;;  %v629_v52 = vsel %vm615_vm4, %v1707_v48, 0.0 }
 0x3f0   : > { %630 = vadd.xlane.f32.xlu1 %v629_v52  ;;  %v641_v53 = vpop.permute.xlu1 %640  ;;  %v1028_v54 = vpop.xlane.xlu0 %1027 }
 0x3f1   : > { %1716 = vpow2.f32 %v1031_v50  ;;  %v650_v55 = vand.u32 %v1934_v49, %v641_v53  ;;  %v1030_v56 = vsub.f32 %v1022_v23, %v1028_v54  ;;  %v1690_v54 = vld [vmem:[%s2071_s5 + $0x8] sm:$0xff]  }
 0x3f2   : > { %v1709_v57 = vpop.eup %1708  ;;  %1718 = vpow2.f32 %v896_v51  ;;  %1628 = vmatpush3.bf16.msra.mxu1 %v1690_v54  ;;  %v1699_v54 = vld [vmem:[%s2077_s11 + $0x10] sm:$0xff]  }
 0x3f3   : > { %v1033_v58 = vmul.f32 1.442695, %v1030_v56  ;;  %1586 = vmatpush3.bf16.msra.mxu0 %v650_v55  ;;  %v632_v59 = vsel %vm619_vm5, %v1709_v57, 0.0  ;;  %v1691_v56 = vld [vmem:[%s2071_s5] sm:$0xff]   ;;  %1629 = vmatprep.subr.bf16.mxu1 %v1754_v17 }
 0x3f4   : > { %633 = vadd.xlane.f32.xlu0 %v632_v59  ;;  %1597 = vmatprep.subr.bf16.mxu0 %v1754_v17 }
 0x3f5   : > { %1720 = vpow2.f32 %v1033_v58 }
 0x3f6   : > { %v1711_v60 = vpop.eup %1710  ;;  %1630 = vmatpush3.bf16.msra.mxu1 %v1691_v56  ;;  %v1701_v56 = vld [vmem:[%s2077_s11] sm:$0xff]  }
 0x3f7   : > { %v761_v61 = vsel %vm615_vm4, %v1711_v60, 0.0  ;;  %v1941_v62 = vpop.eup %1712  ;;  %1643 = vmatprep.subr.bf16.mxu1 %v1754_v17 }
 0x3f8   : > { %762 = vadd.xlane.f32.xlu1 %v761_v61  ;;  %v898_v1 = vsel %vm615_vm4, %v1941_v62, 0.0 }
 0x3fa   : > { %v1715_v63 = vpop.eup %1714 }
 0x3fb   : > { %v764_v0 = vsel %vm619_vm5, %v1715_v63, 0.0 }
 0x3fc   : > { %765 = vadd.xlane.f32.xlu0 %v764_v0  ;;  %899 = vadd.xlane.f32.xlu1 %v898_v1 }
 0x3fe   : > { %v1946_v4 = vpop.eup %1716 }
 0x3ff   : > { %v1719_v5 = vpop.eup %1718  ;;  %v1035_v6 = vsel %vm615_vm4, %v1946_v4, 0.0 }
 0x400   : > { %v901_v7 = vsel %vm619_vm5, %v1719_v5, 0.0  ;;  %1036 = vadd.xlane.f32.xlu1 %v1035_v6 }
 0x401   : > { %902 = vadd.xlane.f32.xlu0 %v901_v7 }
 0x402   : > { %v1721_v8 = vpop.eup %1720 }
 0x403   : > { %v1038_v9 = vsel %vm619_vm5, %v1721_v8, 0.0 }
 0x405   : > { %1039 = vadd.xlane.f32.xlu0 %v1038_v9 }
 0x411   : > { %909 = vrot.lane.b32.xlu1 %v1895_v43, %s1765_s18  ;;  %s440_s18 = scalar_lea.vmem %s2079_s13, %s1533_s27 }
 0x415   : > { %1046 = vrot.lane.b32.xlu1 %v1895_v43, %s1766_s19 }
 0x41b   : > { %772 = vrot.lane.b32.xlu0 %v1895_v43, %s1767_s20 }
 0x479   : > { %v631_v10 = vpop.xlane.xlu1 %630 }
 0x47a   : > { %1722 = vrcp.f32 %v631_v10  ;;  %v1510_v10 = vld [vmem:[%s2072_s6] ss:$0 sm:$0xff] }
 0x47d   : > { %v634_v11 = vpop.xlane.xlu0 %633 }
 0x47e   : > { %1724 = vrcp.f32 %v634_v11 }
 0x481   : > { %v763_v12 = vpop.xlane.xlu1 %762 }
 0x482   : > { %1726 = vrcp.f32 %v763_v12 }
 0x485   : > { %v766_v13 = vpop.xlane.xlu0 %765  ;;  %v900_v14 = vpop.xlane.xlu1 %899 }
 0x486   : > { %1728 = vrcp.f32 %v766_v13 }
 0x487   : > { %v1723_v15 = vpop.eup %1722  ;;  %1730 = vrcp.f32 %v900_v14 }
 0x488   : > { %v637_v19 = vmul.f32 %v1723_v15, %v1707_v48 }
 0x489   : > { %v1037_v21 = vpop.xlane.xlu1 %1036 }
 0x48a   : > { %v903_v16 = vpop.xlane.xlu0 %902 }
 0x48b   : > { %v1725_v18 = vpop.eup %1724  ;;  %1732 = vrcp.f32 %v903_v16 }
 0x48c   : > { %v638_v20 = vmul.f32 %v1725_v18, %v1709_v57 }
 0x48d   : > { %v910_v27 = vpop.permute.xlu1 %909 }
 0x48e   : > { %v1040_v22 = vpop.xlane.xlu0 %1039  ;;  %v639_v23 = vpack.c.bf16 %v638_v20, %v637_v19  ;;  %v915_v31 = vand.u32 %v910_v27, %v1934_v49 }
 0x48f   : > { %v1727_v43 = vpop.eup %1726  ;;  %1734 = vrcp.f32 %v1040_v22 }
 0x490   : > { %1588 = vmatmul.mubr.msk.bf16.vlgmr.msra.gmra.mxu0 %vm615_vm4, %v639_v23  ;;  %1736 = vrcp.f32 %v1037_v21  ;;  %v769_v28 = vmul.f32 %v1727_v43, %v1711_v60 }
 0x491   : > { %1599 = vmatprep.mubr.msk.bf16.mxu0 %vm1755_vm2, %v1754_v17  ;;  %v1047_v35 = vpop.permute.xlu1 %1046 }
 0x492   : > { %v773_v24 = vpop.permute.xlu0 %772  ;;  %v1052_v39 = vand.u32 %v1047_v35, %v1934_v49 }
 0x493   : > { %v1729_v25 = vpop.eup %1728  ;;  %v778_v26 = vand.u32 %v773_v24, %v1934_v49 }
 0x494   : > { %v770_v29 = vmul.f32 %v1729_v25, %v1715_v63  ;;  %v1731_v32 = vpop.eup %1730 }
 0x495   : > { %1598 = vmatpush3.bf16.msra.mxu0 %v778_v26  ;;  %v906_v36 = vmul.f32 %v1731_v32, %v1941_v62 }
 0x496   : > { %1609 = vmatprep.subr.bf16.mxu0 %v1754_v17  ;;  %v771_v30 = vpack.c.bf16 %v770_v29, %v769_v28  ;;  %v1692_v29 = vld [vmem:[%s2075_s9 + $0x8] sm:$0xff]  }
 0x498   : > { %1600 = vmatmul.mubr.msk.bf16.vlgmr.msra.gmra.mxu0 %vm615_vm4, %v771_v30  ;;  %v1733_v33 = vpop.eup %1732  ;;  %v1693_v30 = vld [vmem:[%s2075_s9] sm:$0xff]  }
 0x499   : > { %1610 = vmatpush3.bf16.msra.mxu0 %v915_v31  ;;  %1611 = vmatprep.mubr.msk.bf16.mxu0 %vm1755_vm2, %v1754_v17  ;;  %v907_v34 = vmul.f32 %v1733_v33, %v1719_v5  ;;  %v1694_v31 = vld [vmem:[%s2077_s11 + $0x38] sm:$0xff]  }
 0x49a   : > { %1621 = vmatprep.subr.bf16.mxu0 %v1754_v17 }
 0x49b   : > { %v908_v37 = vpack.c.bf16 %v907_v34, %v906_v36 }
 0x49c   : > { %v1735_v38 = vpop.eup %1734 }
 0x49d   : > { %v1737_v40 = vpop.eup %1736  ;;  %v1044_v41 = vmul.f32 %v1735_v38, %v1721_v8 }
 0x49e   : > { %v1043_v42 = vmul.f32 %v1737_v40, %v1946_v4  ;;  %v1514_v40 = vld [vmem:[%s2073_s7] ss:$0 sm:$0xff] }
 0x4a0   : > { %1612 = vmatmul.mubr.msk.bf16.vlgmr.msra.gmra.mxu0 %vm615_vm4, %v908_v37  ;;  %v1045_v44 = vpack.c.bf16 %v1044_v41, %v1043_v42 }
 0x4a1   : > { %1622 = vmatpush3.bf16.msra.mxu0 %v1052_v39  ;;  %1623 = vmatprep.mubr.msk.bf16.mxu0 %vm1755_vm2, %v1754_v17 }
 0x4a2   : > { %1635 = vmatprep.subr.bf16.mxu0 %v1754_v17 }
 0x4a8   : > { %1624 = vmatmul.mubr.msk.bf16.vlgmr.msra.gmra.mxu0 %vm615_vm4, %v1045_v44 }
 0x4a9   : > { %1639 = vmatprep.mubr.msk.bf16.mxu0 %vm1755_vm2, %v1754_v17  ;;  %1636 = vmatpush3.bf16.msra.mxu0 %v1692_v29 }
 0x4aa   : > { %1637 = vmatprep.subr.bf16.mxu0 %v1754_v17 }
 0x4ad   : > { %1638 = vmatpush3.bf16.msra.mxu0 %v1693_v30 }
 0x550   : > { %v686_v45 = vpop.f32.mrf.mxu0 }
 0x551   : > { %693 = vst.msk [vmem:[#allocation2] sm:$0xff] %vm565_vm3, %v686_v45  ;;  %v1515_v45 = vld [vmem:[%s2074_s8] ss:$0 sm:$0xff] }
 0x552   : > { %v1589_v46 = vpop.f32.mrf.mxu0 }
 0x554   : > { %v689_v47 = vpop.f32.mrf.mxu0 }
 0x555   : > { %695 = vst.msk [vmem:[#allocation2 + $0x8] sm:$0x1] %vm694_vm8, %v689_v47 }
 0x556   : > { %v1590_v48 = vpop.f32.mrf.mxu0 }
 0x558   : > { %v814_v49 = vpop.f32.mrf.mxu0 }
 0x559   : > { %823 = vrot.lane.b32.xlu1 %v814_v49, %s1768_s21 }
 0x55a   : > { %v1601_v50 = vpop.f32.mrf.mxu0 }
 0x55b   : > { %v1695_v50 = vld [vmem:[%s2077_s11 + $0x30] sm:$0xff]  }
 0x55c   : > { %v817_v51 = vpop.f32.mrf.mxu0 }
 0x55d   : > { %825 = vrot.lane.b32.xlu0 %v817_v51, %s1768_s21  ;;  %v1696_v51 = vld [vmem:[%s2077_s11 + $0x28] sm:$0xff]  }
 0x55e   : > { %v1602_v52 = vpop.f32.mrf.mxu0 }
 0x55f   : > { %v1697_v52 = vld [vmem:[%s2077_s11 + $0x20] sm:$0xff]  }
 0x560   : > { %v951_v53 = vpop.f32.mrf.mxu0 }
 0x561   : > { %960 = vrot.lane.b32.xlu1 %v951_v53, %s1769_s24  ;;  %v1698_v53 = vld [vmem:[%s2077_s11 + $0x18] sm:$0xff]  }
 0x562   : > { %v1613_v55 = vpop.f32.mrf.mxu0 }
 0x563   : > { %v1700_v55 = vld [vmem:[%s2077_s11 + $0x8] sm:$0xff]  }
 0x564   : > { %v954_v57 = vpop.f32.mrf.mxu0 }
 0x565   : > { %962 = vrot.lane.b32.xlu0 %v954_v57, %s1769_s24  ;;  %v1516_v57 = vld [vmem:[%s2076_s10] ss:$0 sm:$0xff] }
 0x566   : > { %v1614_v58 = vpop.f32.mrf.mxu0 }
 0x568   : > { %v1088_v59 = vpop.f32.mrf.mxu0 }
 0x569   : > { %1097 = vrot.lane.b32.xlu1 %v1088_v59, %s1770_s30 }
 0x56a   : > { %v1625_v60 = vpop.f32.mrf.mxu0 }
 0x56c   : > { %v1091_v61 = vpop.f32.mrf.mxu0 }
 0x56d   : > { %1099 = vrot.lane.b32.xlu0 %v1091_v61, %s1770_s30 }
 0x56e   : > { %v1626_v62 = vpop.f32.mrf.mxu0 }
 0x5cb   : > { %v824_v63 = vpop.permute.xlu1 %823 }
 0x5cc   : > { %830 = vst.msk [vmem:[#allocation2] sm:$0xff] %vm829_vm9, %v824_v63 }
 0x5cf   : > { %v826_v0 = vpop.permute.xlu0 %825 }
 0x5d0   : > { %832 = vst.msk [vmem:[#allocation2 + $0x8] sm:$0x1] %vm831_vm10, %v826_v0 }
 0x5d3   : > { %v961_v1 = vpop.permute.xlu1 %960 }
 0x5d4   : > { %967 = vst.msk [vmem:[#allocation2] sm:$0xff] %vm966_vm11, %v961_v1 }
 0x5d7   : > { %v963_v4 = vpop.permute.xlu0 %962 }
 0x5d8   : > { %969 = vst.msk [vmem:[#allocation2 + $0x8] sm:$0x1] %vm968_vm12, %v963_v4 }
 0x5db   : > { %v1098_v5 = vpop.permute.xlu1 %1097 }
 0x5dc   : > { %1104 = vst.msk [vmem:[#allocation2] sm:$0xff] %vm1103_vm13, %v1098_v5 }
 0x5df   : > { %v1100_v6 = vpop.permute.xlu0 %1099 }
 0x5e0   : > { %1106 = vst.msk [vmem:[#allocation2 + $0x8] sm:$0x1] %vm1105_vm14, %v1100_v6 }
 0x5e3   : > { %v1107_v7 = vld [vmem:[#allocation2] sm:$0xff] }
 0x5e7   : > { %v1108_v8 = vld [vmem:[#allocation2 + $0x8] sm:$0x1] }
 0x5e8   : > { %v1109_v9 = vpack.c.bf16 %v1108_v8, %v1107_v7 }
 0x5ea   : > { %1632 = vmatmul.mubr.msk.bf16.vlgmr.msra.gmra.mxu1 %vm448_vm0, %v1109_v9 }
 0x5eb   : > { %1659 = vmatprep.mubr.msk.bf16.mxu1 %vm1755_vm2, %v1754_v17  ;;  %1644 = vmatpush3.bf16.msra.mxu1 %v1694_v31 }
 0x5ec   : > { %1645 = vmatprep.subr.bf16.mxu1 %v1754_v17 }
 0x5ef   : > { %1646 = vmatpush3.bf16.msra.mxu1 %v1695_v50 }
 0x5f0   : > { %1647 = vmatprep.subr.bf16.mxu1 %v1754_v17 }
 0x5f3   : > { %1648 = vmatpush3.bf16.msra.mxu1 %v1696_v51 }
 0x5f4   : > { %1649 = vmatprep.subr.bf16.mxu1 %v1754_v17 }
 0x5f7   : > { %1650 = vmatpush3.bf16.msra.mxu1 %v1697_v52 }
 0x5f8   : > { %1651 = vmatprep.subr.bf16.mxu1 %v1754_v17 }
 0x5fb   : > { %1652 = vmatpush3.bf16.msra.mxu1 %v1698_v53 }
 0x5fc   : > { %1653 = vmatprep.subr.bf16.mxu1 %v1754_v17 }
 0x5ff   : > { %1654 = vmatpush3.bf16.msra.mxu1 %v1699_v54 }
 0x600   : > { %1655 = vmatprep.subr.bf16.mxu1 %v1754_v17 }
 0x603   : > { %1656 = vmatpush3.bf16.msra.mxu1 %v1700_v55 }
 0x604   : > { %1657 = vmatprep.subr.bf16.mxu1 %v1754_v17 }
 0x607   : > { %1658 = vmatpush3.bf16.msra.mxu1 %v1701_v56 }
 0x6aa   : > { %v1170_v11 = vpop.f32.mrf.mxu1 }
 0x6ab   : > { %v1171_v12 = vadd.f32 %v1510_v10, %v1170_v11 }
 0x6ac   : > { %v1633_v13 = vpop.f32.mrf.mxu1 }
 0x6ad   : > { %v1991_v14 = vadd.f32 %v1171_v12, %v1857_v2  ;;  %v1520_v12 = vld [vmem:[%s2078_s12] ss:$0 sm:$0xff] }
 0x6ae   : > { %v1173_v15 = vpop.f32.mrf.mxu1 }
 0x6af   : > { %v1174_v16 = vadd.f32 %v1510_v10, %v1173_v15  ;;  %v1181_v18 = vsel %vm448_vm0, %v1991_v14, 0.0 }
 0x6b0   : > { %1182 = vadd.xlane.f32.xlu1 %v1181_v18  ;;  %v1634_v19 = vpop.f32.mrf.mxu1 }
 0x6b1   : > { %v1996_v20 = vadd.f32 %v1174_v16, %v1859_v3 }
 0x6b3   : > { %v1184_v21 = vsel %vm452_vm1, %v1996_v20, 0.0 }
 0x6b4   : > { %1185 = vadd.xlane.f32.xlu0 %v1184_v21 }
 0x739   : > { %v1183_v22 = vpop.xlane.xlu1 %1182 }
 0x73a   : > { %v1187_v23 = vmul.f32 0.03125, %v1183_v22 }
 0x73c   : > { %v1189_v43 = vsub.f32 %v1991_v14, %v1187_v23 }
 0x73d   : > { %v1186_v2 = vpop.xlane.xlu0 %1185 }
 0x73e   : > { %v1188_v24 = vmul.f32 0.03125, %v1186_v2  ;;  %v1191_v25 = vmul.f32 %v1189_v43, %v1189_v43  ;;  %v1429_v2 = vld [vmem:[%s440_s18 + $0x4] sm:$0x1] }
 0x740   : > { %v1190_v26 = vsub.f32 %v1996_v20, %v1188_v24  ;;  %v1193_v27 = vsel %vm448_vm0, %v1191_v25, 0.0 }
 0x741   : > { %1194 = vadd.xlane.f32.xlu0 %v1193_v27 }
 0x742   : > { %v1192_v28 = vmul.f32 %v1190_v26, %v1190_v26 }
 0x744   : > { %v1196_v3 = vsel %vm452_vm1, %v1192_v28, 0.0 }
 0x745   : > { %1197 = vadd.xlane.f32.xlu0 %v1196_v3 }
 0x7ca   : > { %v1195_v32 = vpop.xlane.xlu0 %1194 }
 0x7cb   : > { %v1199_v33 = vmul.f32 0.03125, %v1195_v32 }
 0x7cd   : > { %v1201_v34 = vadd.f32 1e-06, %v1199_v33 }
 0x7ce   : > { %v1198_v35 = vpop.xlane.xlu0 %1197 }
 0x7cf   : > { %1738 = vrsqrt.f32 %v1201_v34  ;;  %v1200_v36 = vmul.f32 0.03125, %v1198_v35 }
 0x7d1   : > { %v1202_v37 = vadd.f32 1e-06, %v1200_v36 }
 0x7d3   : > { %1740 = vrsqrt.f32 %v1202_v37 }
 0x7dc   : > { %v1739_v38 = vpop.eup %1738 }
 0x7dd   : > { %v1205_v39 = vmul.f32 %v1739_v38, %v1189_v43 }
 0x7df   : > { %v1213_v44 = vmul.f32 %v1514_v40, %v1205_v39 }
 0x7e0   : > { %v1741_v41 = vpop.eup %1740 }
 0x7e1   : > { %v1206_v42 = vmul.f32 %v1741_v41, %v1190_v26  ;;  %v1221_v47 = vadd.f32 %v1515_v45, %v1213_v44 }
 0x7e3   : > { %v1214_v46 = vmul.f32 %v1514_v40, %v1206_v42 }
 0x7e5   : > { %v1222_v48 = vadd.f32 %v1515_v45, %v1214_v46 }
 0x7e7   : > { %v1223_v49 = vpack.c.bf16 %v1222_v48, %v1221_v47 }
 0x7e9   : > { %1640 = vmatmul.mubr.msk.bf16.vlgmr.msra.gmra.mxu0 %vm448_vm0, %v1223_v49  ;;  %vm1427_vm0 = vsmask.f32 256 }
 0x7ea   : > { %vm1428_vm2 = vmand %vm452_vm1, %vm1427_vm0 }
 0x8a9   : > { %v1284_v58 = vpop.f32.mrf.mxu0 }
 0x8aa   : > { %v1285_v59 = vadd.f32 %v1516_v57, %v1284_v58 }
 0x8ab   : > { %v1641_v60 = vpop.f32.mrf.mxu0 }
 0x8ac   : > { %v1293_v61 = vmul.f32 0.70710677, %v1285_v59  ;;  %v1291_v6 = vmul.f32 0.5, %v1285_v59 }
 0x8ad   : > { %v1287_v62 = vpop.f32.mrf.mxu0 }
 0x8ae   : > { %1742 = verf.f32 %v1293_v61  ;;  %v1288_v63 = vadd.f32 %v1516_v57, %v1287_v62 }
 0x8af   : > { %v1642_v0 = vpop.f32.mrf.mxu0 }
 0x8b0   : > { %v1294_v1 = vmul.f32 0.70710677, %v1288_v63  ;;  %v1292_v7 = vmul.f32 0.5, %v1288_v63 }
 0x8b2   : > { %1744 = verf.f32 %v1294_v1 }
 0x8bb   : > { %v1743_v17 = vpop.eup %1742 }
 0x8bc   : > { %v1297_v4 = vadd.f32 1.0, %v1743_v17 }
 0x8be   : > { %v1299_v9 = vmul.f32 %v1297_v4, %v1291_v6 }
 0x8bf   : > { %v1745_v5 = vpop.eup %1744 }
 0x8c0   : > { %v1298_v8 = vadd.f32 1.0, %v1745_v5 }
 0x8c2   : > { %v1300_v10 = vmul.f32 %v1298_v8, %v1292_v7 }
 0x8c4   : > { %v1301_v11 = vpack.c.bf16 %v1300_v10, %v1299_v9 }
 0x8c6   : > { %1660 = vmatmul.mubr.bf16.vlgmr.msra.gmra.mxu1 %v1301_v11 }
 0x986   : > { %v1407_v13 = vpop.f32.mrf.mxu1 }
 0x987   : > { %v1408_v15 = vadd.f32 %v1520_v12, %v1407_v13 }
 0x988   : > { %v1661_v16 = vpop.f32.mrf.mxu1 }
 0x989   : > { %v1414_v18 = vadd.f32 %v1408_v15, %v1991_v14 }
 0x98a   : > { %v1410_v19 = vpop.f32.mrf.mxu1 }
 0x98b   : > { %v1535_v21 = vpack.c.bf16 %v1414_v18, %v1414_v18  ;;  %v1411_v22 = vadd.f32 %v1520_v12, %v1410_v19 }
 0x98c   : > { %v1662_v23 = vpop.f32.mrf.mxu1 }
 0x98d   : > { %1425 = vst.msk [vmem:[%s440_s18] sm:$0xf] %vm1424_vm15, %v1535_v21  ;;  %v1415_v43 = vadd.f32 %v1411_v22, %v1996_v20 }
 0x98f   : > { %v1536_v24 = vpack.c.bf16 %v1415_v43, %v1415_v43 }
 0x991   : > { %v1430_v25 = vsel %vm1428_vm2, %v1536_v24, %v1429_v2 }
 0x992   : > { %1431 = vst [vmem:[%s440_s18 + $0x4] sm:$0x1] %v1430_v25 }
 0x993 PF: > { %s23_s25 = sadd.s32 1, %s1752_s25  }
 0x994   : > { %p20_p4 = scmp.ge.s32.totalorder %s23_s25, 4  }
 0x996   :  { %22 = sbr.rel (!%p20_p4) target bundleno = 1 (0x1), region = 102 }

// kernel: mae_image_forward.13
= control target key start
LH: loop header
LB: loop body
LE: loop exit
PB: predicated region body
PF: predicated region fallthrough
CT: control target
= control target key end

     0   :  { %vm39_vm0 = vcmask 523264   ;;  %s188_s0 = inlined_call_operand.vmem [shape: f32[16,192], index: 0, kind: input, shape index: {}]   ;;  %s189_s1 = inlined_call_operand.vmem [shape: f32[16,192], index: 1, kind: input, shape index: {}]   ;;  %s190_s2 = inlined_call_operand.vmem [shape: f32[16,1], index: 2, kind: input, shape index: {}]   ;;  %s191_s3 = inlined_call_operand.hbm [shape: f32[1], index: 3, kind: output, shape index: {}]  }
   0x1   :  { %v23_v0 = vld [vmem:[%s188_s0] sm:$0xff]  ;;  %v24_v1 = vld [vmem:[%s188_s0 + $0x8] sm:$0xff]  ;;  %v25_v5 = vld [vmem:[%s188_s0 + $0x10] sm:$0xff] }
   0x2   :  { %v27_v2 = vld [vmem:[%s189_s1] sm:$0xff]  ;;  %v28_v3 = vld [vmem:[%s189_s1 + $0x8] sm:$0xff]  ;;  %v26_v6 = vld [vmem:[%s188_s0 + $0x18] sm:$0xff] }
   0x3   :  { %v31_v4 = vsub.f32 %v23_v0, %v27_v2  ;;  %v32_v7 = vsub.f32 %v24_v1, %v28_v3  ;;  %v29_v8 = vld [vmem:[%s189_s1 + $0x10] sm:$0xff]  ;;  %v30_v9 = vld [vmem:[%s189_s1 + $0x18] sm:$0xff] }
   0x4   :  { %v33_v11 = vsub.f32 %v25_v5, %v29_v8  ;;  %v34_v12 = vsub.f32 %v26_v6, %v30_v9 }
   0x5   :  { %v35_v10 = vmul.f32 %v31_v4, %v31_v4 }
   0x6   :  { %8 = vsyncpa [#allocation5], 0  ;;  %v36_v13 = vmul.f32 %v32_v7, %v32_v7  ;;  %v37_v14 = vmul.f32 %v33_v11, %v33_v11  ;;  %v38_v15 = vmul.f32 %v34_v12, %v34_v12  ;;  %v51_v22 = vld [vmem:[%s190_s2] sm:$0xff]  ;;  %v52_v23 = vld [vmem:[%s190_s2 + $0x8] sm:$0xff]  ;;  %vm56_vm1 = vcmask 7168   ;;  %s133_s4 = smov 1.0  }
   0x7   :  { %v73_v30 = vsel %vm56_vm1, %v51_v22, 0.0  ;;  %v74_v31 = vsel %vm56_vm1, %v52_v23, 0.0  ;;  %s134_s8 = smov [#allocation4]  }
   0x8   :  { %v40_v16 = vsel %vm39_vm0, %v36_v13, 0.0  ;;  %v44_v18 = vsel %vm39_vm0, %v38_v15, 0.0  ;;  %v75_v33 = vadd.f32 %v74_v31, %v73_v30 }
   0x9   :  { %v41_v17 = vadd.f32 %v40_v16, %v35_v10  ;;  %v45_v19 = vadd.f32 %v44_v18, %v37_v14 }
   0xb   :  { %42 = vadd.xlane.f32.xlu0 %v41_v17 }
   0xf   :  { %46 = vadd.xlane.f32.xlu0 %v45_v19 }
  0x94   :  { %v43_v20 = vpop.xlane.xlu0 %42 }
  0x95   :  { %v49_v21 = vmul.f32 0.0052083335, %v43_v20 }
  0x97   :  { %v54_v25 = vmul.f32 %v51_v22, %v49_v21 }
  0x98   :  { %v47_v24 = vpop.xlane.xlu0 %46 }
  0x99   :  { %v50_v26 = vmul.f32 0.0052083335, %v47_v24  ;;  %v57_v28 = vsel %vm56_vm1, %v54_v25, 0.0 }
  0x9b   :  { %v55_v27 = vmul.f32 %v52_v23, %v50_v26 }
  0x9d   :  { %v58_v29 = vsel %vm56_vm1, %v55_v27, 0.0 }
  0x9e   :  { %v59_v32 = vadd.f32 %v58_v29, %v57_v28 }
  0xa0   :  { %60 = vadd.xlane.f32.xlu1 %v59_v32 }
  0xa4   :  { %76 = vadd.xlane.f32.xlu1 %v75_v33 }
 0x129   :  { %v61_v34 = vpop.xlane.xlu1 %60 }
 0x12a   :  { %v62_v35 = vrot.slane %v61_v34, 4 }
 0x12c   :  { %v63_v36 = vadd.f32 %v62_v35, %v61_v34 }
 0x12d   :  { %v77_v37 = vpop.xlane.xlu1 %76 }
 0x12e   :  { %v64_v38 = vrot.slane %v63_v36, 2  ;;  %v78_v39 = vrot.slane %v77_v37, 4 }
 0x130   :  { %v79_v40 = vadd.f32 %v78_v39, %v77_v37  ;;  %v65_v41 = vadd.f32 %v64_v38, %v63_v36 }
 0x132   :  { %v80_v42 = vrot.slane %v79_v40, 2  ;;  %v66_v43 = vrot.slane %v65_v41, 1 }
 0x134   :  { %v81_v44 = vadd.f32 %v80_v42, %v79_v40  ;;  %v67_v45 = vadd.f32 %v66_v43, %v65_v41 }
 0x136   :  { %113 = vpush %v67_v45  ;;  %v82_v46 = vrot.slane %v81_v44, 1 }
 0x138   :  { %v83_v47 = vadd.f32 %v82_v46, %v81_v44 }
 0x13a   :  { %115 = vpush %v83_v47 }
 0x167   :  { %s114_s2 = spop %113 }
 0x16b   :  { %s116_s30 = spop %115 }
 0x16c   :  { %s93_s5 = smax.f32 %s133_s4, %s116_s30 }
 0x16d   :  { %v94_v48 = vstv %s93_s5 }
 0x16e   :  { %121 = vrcp.f32 %v94_v48 }
 0x17b   :  { %v122_v49 = vpop.eup %121 }
 0x17c   :  { %117 = vpush %v122_v49 }
 0x1ad   :  { %s118_s6 = spop %117 }
 0x1ae   :  { %s97_s7 = smul.f32 %s118_s6, %s114_s2 }
 0x1b0   :  { %99 = sst [smem:[#allocation4]] %s97_s7 }
 0x1b1   :  { %107 = dma.smem_to_hbm %s134_s8, 16, %s191_s3, [#allocation5]  }
 0x1b2   :  { %131 = dma.done.wait [#allocation5], 16  }
 0x1b3   :  { %132 = vsyncadd [#allocation5], 4294967280 }
 0x1b4   :  { %111 = sfence }
 0x1b5   :  { %112 = vsyncpa [#allocation5], 1 }

</bundles_post_ra>
